<compile_context>
chip_gen: v6e
topology: v6e:2x2x1
jax: 0.10.0
libtpu: 0.0.40
codegen_flags: <defaults>
</compile_context>

<pallas_src>
import jax
import jax.numpy as jnp
from jax.experimental import pallas as pl
from jax.experimental.pallas import tpu as pltpu


def _round_up(x, m):
    return (x + m - 1) // m * m


def _tpu_vmem_bytes():
    """Physical VMEM capacity; conservative fallback when not on a TPU."""
    try:
        info = pltpu.get_tpu_info()
        for name in ("vmem_capacity_bytes", "vmem_size_bytes", "vmem_bytes"):
            v = getattr(info, name, None)
            if v:
                return int(v)
    except Exception:
        pass
    return 64 * 1024 * 1024


_VMEM_CAP = _tpu_vmem_bytes()
_VMEM_LIMIT = int(_VMEM_CAP * 3 // 4)               # headroom for compiler scratch
_DEFAULT_ROW_TILE = 512 if _VMEM_CAP >= (96 << 20) else 256


def _row_tiling(n, target):
    """Row tile (multiple of 8); bounds padded-row overhead to <= ~12.5%."""
    n8 = _round_up(n, 8)
    tm = min(_round_up(target, 8), n8)
    while tm > 8 and _round_up(n8, tm) - n8 > max(n8 // 8, 8):
        tm = _round_up(tm // 2, 8)
    return tm, _round_up(n8, tm)


def _pad_rows(x, n_pad):
    n = x.shape[0]
    if n == n_pad:
        return x
    return jnp.pad(x, ((0, n_pad - n), (0, 0)))


# ----------------------------------------------------------------------------
# Kernel 1: downsample + 2-layer unidirectional LSTM (PyTorch gate order
# i, f, g, o).  Grid = (batch shards, time chunks); per chunk the input
# projections are batched (T*B rows) on the MXU; only the recurrent Whh dots
# are serial.  h/c state lives in VMEM scratch across time chunks.
# ----------------------------------------------------------------------------
def _lstm2_kernel(x_ref, dsw_ref, dsb_ref, wih0_ref, b0_ref, whh0_ref,
                  wih1_ref, whh1_ref, b1_ref, o_ref,
                  h1, c1, h2, c2, h1seq, gx0_s, gx1_s):
    @pl.when(pl.program_id(1) == 0)
    def _():
        h1[...] = jnp.zeros_like(h1)
        c1[...] = jnp.zeros_like(c1)
        h2[...] = jnp.zeros_like(h2)
        c2[...] = jnp.zeros_like(c2)

    T, Bs, D = x_ref.shape
    H = h1.shape[-1]
    H4 = 4 * H

    def cell(g, c_prev):
        i = jax.nn.sigmoid(g[:, 0 * H:1 * H])
        f = jax.nn.sigmoid(g[:, 1 * H:2 * H])
        gg = jnp.tanh(g[:, 2 * H:3 * H])
        o = jax.nn.sigmoid(g[:, 3 * H:4 * H])
        c_new = f * c_prev + i * gg
        return o * jnp.tanh(c_new), c_new

    # downsample + layer-0 input projection, batched over the whole chunk
    xm = x_ref[...].reshape(T * Bs, D)                         # bf16
    ds = jnp.dot(xm, dsw_ref[...],
                 preferred_element_type=jnp.float32) + dsb_ref[...]
    gx0 = jnp.dot(ds.astype(jnp.bfloat16), wih0_ref[...],
                  preferred_element_type=jnp.float32) + b0_ref[...]
    gx0_s[...] = gx0.reshape(T, Bs, H4)

    # layer-0 recurrence: only the (Bs,H)@(H,4H) Whh0 dot is serial
    h1_v, c1_v = h1[...], c1[...]
    for t in range(T):                                         # T static -> unrolled
        g0 = gx0_s[t] + jnp.dot(h1_v.astype(jnp.bfloat16), whh0_ref[...],
                                preferred_element_type=jnp.float32)
        h1_v, c1_v = cell(g0, c1_v)
        h1seq[t] = h1_v.astype(jnp.bfloat16)
    h1[...] = h1_v
    c1[...] = c1_v

    # nn.LSTM inter-layer dropout(0.2) -> identity in eval mode
    # layer-1 input projection, batched over the chunk
    gx1 = jnp.dot(h1seq[...].reshape(T * Bs, H), wih1_ref[...],
                  preferred_element_type=jnp.float32) + b1_ref[...]
    gx1_s[...] = gx1.reshape(T, Bs, H4)

    # layer-1 recurrence
    h2_v, c2_v = h2[...], c2[...]
    for t in range(T):
        g1 = gx1_s[t] + jnp.dot(h2_v.astype(jnp.bfloat16), whh1_ref[...],
                                preferred_element_type=jnp.float32)
        h2_v, c2_v = cell(g1, c2_v)
        o_ref[t] = h2_v.astype(o_ref.dtype)
    h2[...] = h2_v
    c2[...] = c2_v


def lstm2(x_bf16, wp, *, time_chunk=8):
    S, B, D = x_bf16.shape
    H = wp["whh0"].shape[0]
    H4 = 4 * H

    T = min(time_chunk, S)
    S_pad = _round_up(S, T)          # pad time instead of falling back to T=1
    B_pad = _round_up(B, 8)          # full-sublane vregs / unmasked stores
    if (S_pad, B_pad) != (S, B):
        x_bf16 = jnp.pad(x_bf16, ((0, S_pad - S), (0, B_pad - B), (0, 0)))

    # split batch across 2 TensorCores when it is large enough (v7x megacore)
    nb = 2 if B_pad % 16 == 0 else 1
    Bs = B_pad // nb

    def const(arr):
        return pl.BlockSpec(arr.shape, lambda b, c: (0, 0))

    flops = 2 * S_pad * B_pad * (D * H + 16 * H * H)
    bytes_accessed = (x_bf16.size * 2 + S_pad * B_pad * H * 2
                      + (D * H + 16 * H * H) * 2)

    out = pl.pallas_call(
        _lstm2_kernel,
        out_shape=jax.ShapeDtypeStruct((S_pad, B_pad, H), jnp.bfloat16),
        grid=(nb, S_pad // T),
        in_specs=[
            pl.BlockSpec((T, Bs, D), lambda b, c: (c, b, 0)),
            const(wp["ds_w"]), const(wp["ds_b"]),
            const(wp["wih0"]), const(wp["b0"]), const(wp["whh0"]),
            const(wp["wih1"]), const(wp["whh1"]), const(wp["b1"]),
        ],
        out_specs=pl.BlockSpec((T, Bs, H), lambda b, c: (c, b, 0)),
        scratch_shapes=[
            pltpu.VMEM((Bs, H), jnp.float32),        # h1
            pltpu.VMEM((Bs, H), jnp.float32),        # c1 (fp32 cell state)
            pltpu.VMEM((Bs, H), jnp.float32),        # h2
            pltpu.VMEM((Bs, H), jnp.float32),        # c2
            pltpu.VMEM((T, Bs, H), jnp.bfloat16),    # layer-0 hidden, whole chunk
            pltpu.VMEM((T, Bs, H4), jnp.float32),    # layer-0 input gates, chunk
            pltpu.VMEM((T, Bs, H4), jnp.float32),    # layer-1 input gates, chunk
        ],
        compiler_params=pltpu.CompilerParams(
            dimension_semantics=("parallel", "arbitrary"),
            vmem_limit_bytes=_VMEM_LIMIT,
        ),
        cost_estimate=pl.CostEstimate(
            flops=flops,
            transcendentals=S_pad * B_pad * H * 10,
            bytes_accessed=bytes_accessed),
    )(x_bf16, wp["ds_w"], wp["ds_b"], wp["wih0"], wp["b0"], wp["whh0"],
      wp["wih1"], wp["whh1"], wp["b1"])
    return out[:S, :B]


# ----------------------------------------------------------------------------
# Kernel 2: row-tiled fused  norm1 -> linear1 -> relu -> linear2 -> +res
#                            -> norm2 -> classification head -> softmax
# Classification output padded to 128 lanes (lane-dense stores); padded
# columns carry bias -1e30 so exp() is exactly 0 and normalization is exact.
# ----------------------------------------------------------------------------
def _mlp_head_kernel(x_ref, res_ref, ln1w_ref, ln1b_ref, w1_ref, b1_ref,
                     w2_ref, b2_ref, ln2w_ref, ln2b_ref, wc_ref, bc_ref,
                     o_ref):
    def layernorm(v, w, b, eps=1e-5):
        mu = jnp.mean(v, axis=-1, keepdims=True)
        var = jnp.mean((v - mu) ** 2, axis=-1, keepdims=True)
        return (v - mu) * jax.lax.rsqrt(var + eps) * w + b

    # dropout1 -> identity (eval); norm1 over d_model // 2 (fp32 stats)
    x = layernorm(x_ref[...].astype(jnp.float32), ln1w_ref[...], ln1b_ref[...])
    h = jnp.dot(x.astype(jnp.bfloat16), w1_ref[...],
                preferred_element_type=jnp.float32) + b1_ref[...]
    h = jnp.maximum(h, 0.0)                                    # relu(linear1)
    y = jnp.dot(h.astype(jnp.bfloat16), w2_ref[...],
                preferred_element_type=jnp.float32) + b2_ref[...]
    # dropout2 -> identity; residual add; norm2 over d_model
    y = layernorm(res_ref[...] + y, ln2w_ref[...], ln2b_ref[...])
    # classification_head (padded cols bias -1e30 -> exp == 0) + exact softmax
    logits = jnp.dot(y.astype(jnp.bfloat16), wc_ref[...],
                     preferred_element_type=jnp.float32) + bc_ref[...]
    m = jnp.max(logits, axis=-1, keepdims=True)
    e = jnp.exp(logits - m)
    o_ref[...] = e / jnp.sum(e, axis=-1, keepdims=True)


def mlp_head(x_bf16, res_f32, wp, *, row_tile=None):
    if row_tile is None:
        row_tile = _DEFAULT_ROW_TILE
    n, h = x_bf16.shape
    d = res_f32.shape[1]
    ff = wp["l1_w"].shape[1]
    cpad = wp["cls_w_pad"].shape[1]
    tm, n_pad = _row_tiling(n, row_tile)
    x_bf16 = _pad_rows(x_bf16, n_pad)
    res_f32 = _pad_rows(res_f32, n_pad)

    def const(arr):
        return pl.BlockSpec(arr.shape, lambda i: (0, 0))

    flops = 2 * n_pad * (h * ff + ff * d + d * cpad)
    bytes_accessed = (x_bf16.size * 2 + res_f32.size * 4 + n_pad * cpad * 4
                      + (wp["l1_w"].size + wp["l2_w"].size
                         + wp["cls_w_pad"].size) * 2)

    out = pl.pallas_call(
        _mlp_head_kernel,
        out_shape=jax.ShapeDtypeStruct((n_pad, cpad), jnp.float32),
        grid=(n_pad // tm,),
        in_specs=[
            pl.BlockSpec((tm, h), lambda i: (i, 0)),
            pl.BlockSpec((tm, d), lambda i: (i, 0)),
            const(wp["ln1_w"]), const(wp["ln1_b"]),
            const(wp["l1_w"]), const(wp["l1_b"]),
            const(wp["l2_w"]), const(wp["l2_b"]),
            const(wp["ln2_w"]), const(wp["ln2_b"]),
            const(wp["cls_w_pad"]), const(wp["cls_b_pad"]),
        ],
        out_specs=pl.BlockSpec((tm, cpad), lambda i: (i, 0)),
        compiler_params=pltpu.CompilerParams(
            dimension_semantics=("parallel",),
            vmem_limit_bytes=_VMEM_LIMIT,
        ),
        cost_estimate=pl.CostEstimate(
            flops=flops, transcendentals=n_pad * cpad,
            bytes_accessed=bytes_accessed),
    )(x_bf16, res_f32, wp["ln1_w"], wp["ln1_b"], wp["l1_w"], wp["l1_b"],
      wp["l2_w"], wp["l2_b"], wp["ln2_w"], wp["ln2_b"],
      wp["cls_w_pad"], wp["cls_b_pad"])
    return out[:n]


# ----------------------------------------------------------------------------
# Weight prep: bf16 matmul weights, (1, M) biases, lane-dense (128-padded)
# classification head (pad bias stays fp32 so -1e30 never becomes -inf).
# ----------------------------------------------------------------------------
def _prep_weights(p):
    bf16 = jnp.bfloat16
    nc = p["cls_b"].shape[-1]
    cpad = _round_up(nc, 128)
    cls_w_pad = jnp.zeros((p["cls_w"].shape[0], cpad), jnp.float32)
    cls_w_pad = cls_w_pad.at[:, :nc].set(p["cls_w"])
    cls_b_pad = jnp.full((1, cpad), -1e30, jnp.float32)
    cls_b_pad = cls_b_pad.at[0, :nc].set(p["cls_b"])
    return {
        "ds_w": p["ds_w"].astype(bf16),
        "ds_b": p["ds_b"].reshape(1, -1),
        # LSTM: biases are the pre-summed b_ih + b_hh per layer
        "wih0": p["wih0"].astype(bf16),
        "whh0": p["whh0"].astype(bf16),
        "b0": p["b0"].reshape(1, -1),
        "wih1": p["wih1"].astype(bf16),
        "whh1": p["whh1"].astype(bf16),
        "b1": p["b1"].reshape(1, -1),
        "ln1_w": p["ln1_w"].reshape(1, -1), "ln1_b": p["ln1_b"].reshape(1, -1),
        "l1_w": p["l1_w"].astype(bf16), "l1_b": p["l1_b"].reshape(1, -1),
        "l2_w": p["l2_w"].astype(bf16), "l2_b": p["l2_b"].reshape(1, -1),
        "ln2_w": p["ln2_w"].reshape(1, -1), "ln2_b": p["ln2_b"].reshape(1, -1),
        "cls_w_pad": cls_w_pad.astype(bf16),
        "cls_b_pad": cls_b_pad,
    }


# ----------------------------------------------------------------------------
# Full forward: FeedbackModel.forward(ids, mask) -> (softmax probs, 0, {})
# ----------------------------------------------------------------------------
def feedback_forward(params, ids, mask):
    # TODO(synk): the HuggingFace AutoModel transformer backbone has no clean
    # Pallas equivalent; replaced by a deterministic embedding lookup gated by
    # the attention mask, producing the (B, S, D) hidden states the LSTM head
    # consumes.
    hidden = jnp.take(params["emb"], ids, axis=0) * mask[..., None].astype(jnp.float32)
    B, S, D = hidden.shape
    H = D // 2
    nc = params["cls_b"].shape[-1]
    wp = _prep_weights(params)

    # ---- ResidualLSTM: time-major, like permute(1, 0, 2) ----
    x = jnp.transpose(hidden, (1, 0, 2))                      # (S, B, D)
    res = x.reshape(S * B, D)                                 # residual (fp32)

    # downsample + 2-layer LSTM fused in one kernel; bf16 output across HBM
    lstm_out = lstm2(x.astype(jnp.bfloat16), wp)              # (S, B, H) bf16

    probs_pad = mlp_head(lstm_out.reshape(S * B, H), res, wp) # (S*B, 128)
    probs = probs_pad[:, :nc].reshape(S, B, nc).transpose(1, 0, 2)  # (B, S, nc)

    loss = 0
    return probs, loss, {}


# ----------------------------------------------------------------------------
# Deterministic parameter construction + smoke test
# ----------------------------------------------------------------------------
def make_params(key, vocab, d_model, num_classes):
    H, FF = d_model // 2, 4 * d_model
    ks = jax.random.split(key, 16)
    sc = 0.05
    n = lambda k, shape: (jax.random.normal(k, shape, jnp.float32) * sc)
    return {
        "emb": n(ks[0], (vocab, d_model)),
        # downsample: Linear(d_model, d_model//2), weights stored transposed
        "ds_w": n(ks[1], (d_model, H)), "ds_b": n(ks[2], (H,)),
        # LSTM layer 0 / 1 (weight_ih/hh transposed, biases combined b_ih+b_hh)
        "wih0": n(ks[3], (H, 4 * H)), "whh0": n(ks[4], (H, 4 * H)),
        "b0": n(ks[5], (4 * H,)),
        "wih1": n(ks[6], (H, 4 * H)), "whh1": n(ks[7], (H, 4 * H)),
        "b1": n(ks[8], (4 * H,)),
        # norm1 / norm2 (PyTorch default init: ones / zeros)
        "ln1_w": jnp.ones((H,), jnp.float32), "ln1_b": jnp.zeros((H,), jnp.float32),
        "ln2_w": jnp.ones((d_model,), jnp.float32), "ln2_b": jnp.zeros((d_model,), jnp.float32),
        # linear1 / linear2
        "l1_w": n(ks[9], (H, FF)), "l1_b": n(ks[10], (FF,)),
        "l2_w": n(ks[11], (FF, d_model)), "l2_b": n(ks[12], (d_model,)),
        # classification_head: Linear(d_model, 15)
        "cls_w": n(ks[13], (d_model, num_classes)), "cls_b": n(ks[14], (num_classes,)),
    }


if __name__ == "__main__":
    B, S = 2, 8
    D = 256           # small stand-in for d_model=1024
    VOCAB, NUM_CLASSES = 100, 15

    key = jax.random.PRNGKey(0)
    kp, ki = jax.random.split(key)
    params = make_params(kp, VOCAB, D, NUM_CLASSES)

    ids = jax.random.randint(ki, (B, S), 0, VOCAB, dtype=jnp.int32)
    mask = jnp.ones((B, S), jnp.int32)

    probs, loss, metrics = jax.jit(feedback_forward)(params, ids, mask)
    probs = jax.block_until_ready(probs)

    assert probs.shape == (B, S, NUM_CLASSES)
    assert bool(jnp.all(jnp.isfinite(probs)))
    # exact softmax normalization (padded lanes contribute exactly 0)
    assert bool(jnp.allclose(jnp.sum(probs, axis=-1), 1.0, atol=1e-3))
    print("KERNEL_OK")
</pallas_src>

<mosaic_0001>
module attributes {stable_mosaic.version = 11 : i64} {
  func.func @_lstm2_kernel(%arg0: i32, %arg1: i32, %arg2: memref<8x8x256xbf16, #tpu.memory_space<vmem>>, %arg3: memref<256x128xbf16, #tpu.memory_space<vmem>>, %arg4: memref<1x128xf32, #tpu.memory_space<vmem>>, %arg5: memref<128x512xbf16, #tpu.memory_space<vmem>>, %arg6: memref<1x512xf32, #tpu.memory_space<vmem>>, %arg7: memref<128x512xbf16, #tpu.memory_space<vmem>>, %arg8: memref<128x512xbf16, #tpu.memory_space<vmem>>, %arg9: memref<128x512xbf16, #tpu.memory_space<vmem>>, %arg10: memref<1x512xf32, #tpu.memory_space<vmem>>, %arg11: memref<8x8x128xbf16, #tpu.memory_space<vmem>>, %arg12: memref<8x128xf32, #tpu.memory_space<vmem>>, %arg13: memref<8x128xf32, #tpu.memory_space<vmem>>, %arg14: memref<8x128xf32, #tpu.memory_space<vmem>>, %arg15: memref<8x128xf32, #tpu.memory_space<vmem>>, %arg16: memref<8x8x128xbf16, #tpu.memory_space<vmem>>, %arg17: memref<8x8x512xf32, #tpu.memory_space<vmem>>, %arg18: memref<8x8x512xf32, #tpu.memory_space<vmem>>) attributes {dimension_semantics = [#tpu.dimension_semantics<parallel>, #tpu.dimension_semantics<arbitrary>], iteration_bounds = array<i64: 1, 1>, scalar_prefetch = 0 : i64, scratch_operands = 7 : i64, tpu.core_type = #tpu.core_type<tc>, window_params = [{transform_indices = @transform_0, window_bounds = array<i64: 8, 8, 256>}, {pipeline_mode = #tpu.pipeline_mode<synchronous>, transform_indices = @transform_1, window_bounds = array<i64: 256, 128>}, {pipeline_mode = #tpu.pipeline_mode<synchronous>, transform_indices = @transform_2, window_bounds = array<i64: 1, 128>}, {pipeline_mode = #tpu.pipeline_mode<synchronous>, transform_indices = @transform_3, window_bounds = array<i64: 128, 512>}, {pipeline_mode = #tpu.pipeline_mode<synchronous>, transform_indices = @transform_4, window_bounds = array<i64: 1, 512>}, {pipeline_mode = #tpu.pipeline_mode<synchronous>, transform_indices = @transform_5, window_bounds = array<i64: 128, 512>}, {pipeline_mode = #tpu.pipeline_mode<synchronous>, transform_indices = @transform_6, window_bounds = array<i64: 128, 512>}, {pipeline_mode = #tpu.pipeline_mode<synchronous>, transform_indices = @transform_7, window_bounds = array<i64: 128, 512>}, {pipeline_mode = #tpu.pipeline_mode<synchronous>, transform_indices = @transform_8, window_bounds = array<i64: 1, 512>}, {transform_indices = @transform_9, window_bounds = array<i64: 8, 8, 128>}]} {
    %c0_i32 = arith.constant 0 : i32
    %0 = arith.cmpi eq, %arg1, %c0_i32 : i32
    %1 = arith.extui %0 : i1 to i32
    %c0_i32_0 = arith.constant 0 : i32
    %2 = arith.cmpi ne, %1, %c0_i32_0 : i32
    scf.if %2 {
      %cst_227 = arith.constant 0.000000e+00 : f32
      %595 = vector.broadcast %cst_227 : f32 to vector<8x128xf32>
      %c0_228 = arith.constant 0 : index
      %c0_229 = arith.constant 0 : index
      %596 = vector.load %arg12[%c0_228, %c0_229] : memref<8x128xf32, #tpu.memory_space<vmem>>, vector<8x128xf32>
      tpu.vector_store %arg12[%c0_228, %c0_229], %595 {strides = array<i32>} : memref<8x128xf32, #tpu.memory_space<vmem>>, vector<8x128xf32>,
      %cst_230 = arith.constant 0.000000e+00 : f32
      %597 = vector.broadcast %cst_230 : f32 to vector<8x128xf32>
      %c0_231 = arith.constant 0 : index
      %c0_232 = arith.constant 0 : index
      %598 = vector.load %arg13[%c0_231, %c0_232] : memref<8x128xf32, #tpu.memory_space<vmem>>, vector<8x128xf32>
      tpu.vector_store %arg13[%c0_231, %c0_232], %597 {strides = array<i32>} : memref<8x128xf32, #tpu.memory_space<vmem>>, vector<8x128xf32>,
      %cst_233 = arith.constant 0.000000e+00 : f32
      %599 = vector.broadcast %cst_233 : f32 to vector<8x128xf32>
      %c0_234 = arith.constant 0 : index
      %c0_235 = arith.constant 0 : index
      %600 = vector.load %arg14[%c0_234, %c0_235] : memref<8x128xf32, #tpu.memory_space<vmem>>, vector<8x128xf32>
      tpu.vector_store %arg14[%c0_234, %c0_235], %599 {strides = array<i32>} : memref<8x128xf32, #tpu.memory_space<vmem>>, vector<8x128xf32>,
      %cst_236 = arith.constant 0.000000e+00 : f32
      %601 = vector.broadcast %cst_236 : f32 to vector<8x128xf32>
      %c0_237 = arith.constant 0 : index
      %c0_238 = arith.constant 0 : index
      %602 = vector.load %arg15[%c0_237, %c0_238] : memref<8x128xf32, #tpu.memory_space<vmem>>, vector<8x128xf32>
      tpu.vector_store %arg15[%c0_237, %c0_238], %601 {strides = array<i32>} : memref<8x128xf32, #tpu.memory_space<vmem>>, vector<8x128xf32>,
    } else {
    }
    %c0 = arith.constant 0 : index
    %c0_1 = arith.constant 0 : index
    %c0_2 = arith.constant 0 : index
    %3 = vector.load %arg2[%c0, %c0_1, %c0_2] : memref<8x8x256xbf16, #tpu.memory_space<vmem>>, vector<8x8x256xbf16>
    %4 = vector.shape_cast %3 : vector<8x8x256xbf16> to vector<64x256xbf16>
    %c0_3 = arith.constant 0 : index
    %c0_4 = arith.constant 0 : index
    %5 = vector.load %arg3[%c0_3, %c0_4] : memref<256x128xbf16, #tpu.memory_space<vmem>>, vector<256x128xbf16>
    %cst = arith.constant dense<0.000000e+00> : vector<64x128xf32>
    %6 = tpu.matmul %4, %5, %cst {dimension_numbers = #tpu.dot_dimension_numbers<[1], [0], [0], [1], [0, 0, 1, 1], [], []>} : vector<64x256xbf16>, vector<256x128xbf16>, vector<64x128xf32> -> vector<64x128xf32>
    %c0_5 = arith.constant 0 : index
    %c0_6 = arith.constant 0 : index
    %7 = vector.load %arg4[%c0_5, %c0_6] : memref<1x128xf32, #tpu.memory_space<vmem>>, vector<1x128xf32>
    %8 = vector.broadcast %7 : vector<1x128xf32> to vector<64x128xf32>
    %9 = arith.addf %6, %8 : vector<64x128xf32>
    %10 = arith.truncf %9 : vector<64x128xf32> to vector<64x128xbf16>
    %c0_7 = arith.constant 0 : index
    %c0_8 = arith.constant 0 : index
    %11 = vector.load %arg5[%c0_7, %c0_8] : memref<128x512xbf16, #tpu.memory_space<vmem>>, vector<128x512xbf16>
    %cst_9 = arith.constant dense<0.000000e+00> : vector<64x512xf32>
    %12 = tpu.matmul %10, %11, %cst_9 {dimension_numbers = #tpu.dot_dimension_numbers<[1], [0], [0], [1], [0, 0, 1, 1], [], []>} : vector<64x128xbf16>, vector<128x512xbf16>, vector<64x512xf32> -> vector<64x512xf32>
    %c0_10 = arith.constant 0 : index
    %c0_11 = arith.constant 0 : index
    %13 = vector.load %arg6[%c0_10, %c0_11] : memref<1x512xf32, #tpu.memory_space<vmem>>, vector<1x512xf32>
    %14 = vector.broadcast %13 : vector<1x512xf32> to vector<64x512xf32>
    %15 = arith.addf %12, %14 : vector<64x512xf32>
    %16 = vector.shape_cast %15 : vector<64x512xf32> to vector<8x8x512xf32>
    %c0_12 = arith.constant 0 : index
    %c0_13 = arith.constant 0 : index
    %c0_14 = arith.constant 0 : index
    %17 = vector.load %arg17[%c0_12, %c0_13, %c0_14] : memref<8x8x512xf32, #tpu.memory_space<vmem>>, vector<8x8x512xf32>
    tpu.vector_store %arg17[%c0_12, %c0_13, %c0_14], %16 {strides = array<i32>} : memref<8x8x512xf32, #tpu.memory_space<vmem>>, vector<8x8x512xf32>,
    %c0_15 = arith.constant 0 : index
    %c0_16 = arith.constant 0 : index
    %18 = vector.load %arg12[%c0_15, %c0_16] : memref<8x128xf32, #tpu.memory_space<vmem>>, vector<8x128xf32>
    %c0_17 = arith.constant 0 : index
    %c0_18 = arith.constant 0 : index
    %19 = vector.load %arg13[%c0_17, %c0_18] : memref<8x128xf32, #tpu.memory_space<vmem>>, vector<8x128xf32>
    %c0_19 = arith.constant 0 : index
    %c0_20 = arith.constant 0 : index
    %c0_21 = arith.constant 0 : index
    %20 = vector.load %arg17[%c0_19, %c0_20, %c0_21] : memref<8x8x512xf32, #tpu.memory_space<vmem>>, vector<1x8x512xf32>
    %21 = vector.shape_cast %20 : vector<1x8x512xf32> to vector<8x512xf32>
    %22 = arith.truncf %18 : vector<8x128xf32> to vector<8x128xbf16>
    %c0_22 = arith.constant 0 : index
    %c0_23 = arith.constant 0 : index
    %23 = vector.load %arg7[%c0_22, %c0_23] : memref<128x512xbf16, #tpu.memory_space<vmem>>, vector<128x512xbf16>
    %cst_24 = arith.constant dense<0.000000e+00> : vector<8x512xf32>
    %24 = tpu.matmul %22, %23, %cst_24 {dimension_numbers = #tpu.dot_dimension_numbers<[1], [0], [0], [1], [0, 0, 1, 1], [], []>} : vector<8x128xbf16>, vector<128x512xbf16>, vector<8x512xf32> -> vector<8x512xf32>
    %25 = arith.addf %21, %24 : vector<8x512xf32>
    %26 = vector.extract_strided_slice %25 {offsets = [0, 0], sizes = [8, 128], strides = [1, 1]} : vector<8x512xf32> to vector<8x128xf32>
    %27 = arith.negf %26 : vector<8x128xf32>
    %28 = math.exp %27 : vector<8x128xf32>
    %cst_25 = arith.constant 1.000000e+00 : f32
    %29 = vector.broadcast %cst_25 : f32 to vector<8x128xf32>
    %30 = arith.addf %29, %28 : vector<8x128xf32>
    %31 = arith.divf %29, %30 : vector<8x128xf32>
    %32 = vector.extract_strided_slice %25 {offsets = [0, 128], sizes = [8, 128], strides = [1, 1]} : vector<8x512xf32> to vector<8x128xf32>
    %33 = arith.negf %32 : vector<8x128xf32>
    %34 = math.exp %33 : vector<8x128xf32>
    %cst_26 = arith.constant 1.000000e+00 : f32
    %35 = vector.broadcast %cst_26 : f32 to vector<8x128xf32>
    %36 = arith.addf %35, %34 : vector<8x128xf32>
    %37 = arith.divf %35, %36 : vector<8x128xf32>
    %38 = vector.extract_strided_slice %25 {offsets = [0, 256], sizes = [8, 128], strides = [1, 1]} : vector<8x512xf32> to vector<8x128xf32>
    %39 = math.tanh %38 : vector<8x128xf32>
    %40 = vector.extract_strided_slice %25 {offsets = [0, 384], sizes = [8, 128], strides = [1, 1]} : vector<8x512xf32> to vector<8x128xf32>
    %41 = arith.negf %40 : vector<8x128xf32>
    %42 = math.exp %41 : vector<8x128xf32>
    %cst_27 = arith.constant 1.000000e+00 : f32
    %43 = vector.broadcast %cst_27 : f32 to vector<8x128xf32>
    %44 = arith.addf %43, %42 : vector<8x128xf32>
    %45 = arith.divf %43, %44 : vector<8x128xf32>
    %46 = arith.mulf %37, %19 : vector<8x128xf32>
    %47 = arith.mulf %31, %39 : vector<8x128xf32>
    %48 = arith.addf %46, %47 : vector<8x128xf32>
    %49 = math.tanh %48 : vector<8x128xf32>
    %50 = arith.mulf %45, %49 : vector<8x128xf32>
    %51 = arith.truncf %50 : vector<8x128xf32> to vector<8x128xbf16>
    %c0_28 = arith.constant 0 : index
    %c0_29 = arith.constant 0 : index
    %c0_30 = arith.constant 0 : index
    %52 = vector.load %arg16[%c0_28, %c0_29, %c0_30] : memref<8x8x128xbf16, #tpu.memory_space<vmem>>, vector<1x8x128xbf16>
    %53 = vector.shape_cast %52 : vector<1x8x128xbf16> to vector<8x128xbf16>
    %54 = vector.shape_cast %51 : vector<8x128xbf16> to vector<1x8x128xbf16>
    tpu.vector_store %arg16[%c0_28, %c0_29, %c0_30], %54 {strides = array<i32>} : memref<8x8x128xbf16, #tpu.memory_space<vmem>>, vector<1x8x128xbf16>,
    %c1 = arith.constant 1 : index
    %c0_31 = arith.constant 0 : index
    %c0_32 = arith.constant 0 : index
    %55 = vector.load %arg17[%c1, %c0_31, %c0_32] : memref<8x8x512xf32, #tpu.memory_space<vmem>>, vector<1x8x512xf32>
    %56 = vector.shape_cast %55 : vector<1x8x512xf32> to vector<8x512xf32>
    %57 = arith.truncf %50 : vector<8x128xf32> to vector<8x128xbf16>
    %c0_33 = arith.constant 0 : index
    %c0_34 = arith.constant 0 : index
    %58 = vector.load %arg7[%c0_33, %c0_34] : memref<128x512xbf16, #tpu.memory_space<vmem>>, vector<128x512xbf16>
    %cst_35 = arith.constant dense<0.000000e+00> : vector<8x512xf32>
    %59 = tpu.matmul %57, %58, %cst_35 {dimension_numbers = #tpu.dot_dimension_numbers<[1], [0], [0], [1], [0, 0, 1, 1], [], []>} : vector<8x128xbf16>, vector<128x512xbf16>, vector<8x512xf32> -> vector<8x512xf32>
    %60 = arith.addf %56, %59 : vector<8x512xf32>
    %61 = vector.extract_strided_slice %60 {offsets = [0, 0], sizes = [8, 128], strides = [1, 1]} : vector<8x512xf32> to vector<8x128xf32>
    %62 = arith.negf %61 : vector<8x128xf32>
    %63 = math.exp %62 : vector<8x128xf32>
    %cst_36 = arith.constant 1.000000e+00 : f32
    %64 = vector.broadcast %cst_36 : f32 to vector<8x128xf32>
    %65 = arith.addf %64, %63 : vector<8x128xf32>
    %66 = arith.divf %64, %65 : vector<8x128xf32>
    %67 = vector.extract_strided_slice %60 {offsets = [0, 128], sizes = [8, 128], strides = [1, 1]} : vector<8x512xf32> to vector<8x128xf32>
    %68 = arith.negf %67 : vector<8x128xf32>
    %69 = math.exp %68 : vector<8x128xf32>
    %cst_37 = arith.constant 1.000000e+00 : f32
    %70 = vector.broadcast %cst_37 : f32 to vector<8x128xf32>
    %71 = arith.addf %70, %69 : vector<8x128xf32>
    %72 = arith.divf %70, %71 : vector<8x128xf32>
    %73 = vector.extract_strided_slice %60 {offsets = [0, 256], sizes = [8, 128], strides = [1, 1]} : vector<8x512xf32> to vector<8x128xf32>
    %74 = math.tanh %73 : vector<8x128xf32>
    %75 = vector.extract_strided_slice %60 {offsets = [0, 384], sizes = [8, 128], strides = [1, 1]} : vector<8x512xf32> to vector<8x128xf32>
    %76 = arith.negf %75 : vector<8x128xf32>
    %77 = math.exp %76 : vector<8x128xf32>
    %cst_38 = arith.constant 1.000000e+00 : f32
    %78 = vector.broadcast %cst_38 : f32 to vector<8x128xf32>
    %79 = arith.addf %78, %77 : vector<8x128xf32>
    %80 = arith.divf %78, %79 : vector<8x128xf32>
    %81 = arith.mulf %72, %48 : vector<8x128xf32>
    %82 = arith.mulf %66, %74 : vector<8x128xf32>
    %83 = arith.addf %81, %82 : vector<8x128xf32>
    %84 = math.tanh %83 : vector<8x128xf32>
    %85 = arith.mulf %80, %84 : vector<8x128xf32>
    %86 = arith.truncf %85 : vector<8x128xf32> to vector<8x128xbf16>
    %c1_39 = arith.constant 1 : index
    %c0_40 = arith.constant 0 : index
    %c0_41 = arith.constant 0 : index
    %87 = vector.load %arg16[%c1_39, %c0_40, %c0_41] : memref<8x8x128xbf16, #tpu.memory_space<vmem>>, vector<1x8x128xbf16>
    %88 = vector.shape_cast %87 : vector<1x8x128xbf16> to vector<8x128xbf16>
    %89 = vector.shape_cast %86 : vector<8x128xbf16> to vector<1x8x128xbf16>
    tpu.vector_store %arg16[%c1_39, %c0_40, %c0_41], %89 {strides = array<i32>} : memref<8x8x128xbf16, #tpu.memory_space<vmem>>, vector<1x8x128xbf16>,
    %c2 = arith.constant 2 : index
    %c0_42 = arith.constant 0 : index
    %c0_43 = arith.constant 0 : index
    %90 = vector.load %arg17[%c2, %c0_42, %c0_43] : memref<8x8x512xf32, #tpu.memory_space<vmem>>, vector<1x8x512xf32>
    %91 = vector.shape_cast %90 : vector<1x8x512xf32> to vector<8x512xf32>
    %92 = arith.truncf %85 : vector<8x128xf32> to vector<8x128xbf16>
    %c0_44 = arith.constant 0 : index
    %c0_45 = arith.constant 0 : index
    %93 = vector.load %arg7[%c0_44, %c0_45] : memref<128x512xbf16, #tpu.memory_space<vmem>>, vector<128x512xbf16>
    %cst_46 = arith.constant dense<0.000000e+00> : vector<8x512xf32>
    %94 = tpu.matmul %92, %93, %cst_46 {dimension_numbers = #tpu.dot_dimension_numbers<[1], [0], [0], [1], [0, 0, 1, 1], [], []>} : vector<8x128xbf16>, vector<128x512xbf16>, vector<8x512xf32> -> vector<8x512xf32>
    %95 = arith.addf %91, %94 : vector<8x512xf32>
    %96 = vector.extract_strided_slice %95 {offsets = [0, 0], sizes = [8, 128], strides = [1, 1]} : vector<8x512xf32> to vector<8x128xf32>
    %97 = arith.negf %96 : vector<8x128xf32>
    %98 = math.exp %97 : vector<8x128xf32>
    %cst_47 = arith.constant 1.000000e+00 : f32
    %99 = vector.broadcast %cst_47 : f32 to vector<8x128xf32>
    %100 = arith.addf %99, %98 : vector<8x128xf32>
    %101 = arith.divf %99, %100 : vector<8x128xf32>
    %102 = vector.extract_strided_slice %95 {offsets = [0, 128], sizes = [8, 128], strides = [1, 1]} : vector<8x512xf32> to vector<8x128xf32>
    %103 = arith.negf %102 : vector<8x128xf32>
    %104 = math.exp %103 : vector<8x128xf32>
    %cst_48 = arith.constant 1.000000e+00 : f32
    %105 = vector.broadcast %cst_48 : f32 to vector<8x128xf32>
    %106 = arith.addf %105, %104 : vector<8x128xf32>
    %107 = arith.divf %105, %106 : vector<8x128xf32>
    %108 = vector.extract_strided_slice %95 {offsets = [0, 256], sizes = [8, 128], strides = [1, 1]} : vector<8x512xf32> to vector<8x128xf32>
    %109 = math.tanh %108 : vector<8x128xf32>
    %110 = vector.extract_strided_slice %95 {offsets = [0, 384], sizes = [8, 128], strides = [1, 1]} : vector<8x512xf32> to vector<8x128xf32>
    %111 = arith.negf %110 : vector<8x128xf32>
    %112 = math.exp %111 : vector<8x128xf32>
    %cst_49 = arith.constant 1.000000e+00 : f32
    %113 = vector.broadcast %cst_49 : f32 to vector<8x128xf32>
    %114 = arith.addf %113, %112 : vector<8x128xf32>
    %115 = arith.divf %113, %114 : vector<8x128xf32>
    %116 = arith.mulf %107, %83 : vector<8x128xf32>
    %117 = arith.mulf %101, %109 : vector<8x128xf32>
    %118 = arith.addf %116, %117 : vector<8x128xf32>
    %119 = math.tanh %118 : vector<8x128xf32>
    %120 = arith.mulf %115, %119 : vector<8x128xf32>
    %121 = arith.truncf %120 : vector<8x128xf32> to vector<8x128xbf16>
    %c2_50 = arith.constant 2 : index
    %c0_51 = arith.constant 0 : index
    %c0_52 = arith.constant 0 : index
    %122 = vector.load %arg16[%c2_50, %c0_51, %c0_52] : memref<8x8x128xbf16, #tpu.memory_space<vmem>>, vector<1x8x128xbf16>
    %123 = vector.shape_cast %122 : vector<1x8x128xbf16> to vector<8x128xbf16>
    %124 = vector.shape_cast %121 : vector<8x128xbf16> to vector<1x8x128xbf16>
    tpu.vector_store %arg16[%c2_50, %c0_51, %c0_52], %124 {strides = array<i32>} : memref<8x8x128xbf16, #tpu.memory_space<vmem>>, vector<1x8x128xbf16>,
    %c3 = arith.constant 3 : index
    %c0_53 = arith.constant 0 : index
    %c0_54 = arith.constant 0 : index
    %125 = vector.load %arg17[%c3, %c0_53, %c0_54] : memref<8x8x512xf32, #tpu.memory_space<vmem>>, vector<1x8x512xf32>
    %126 = vector.shape_cast %125 : vector<1x8x512xf32> to vector<8x512xf32>
    %127 = arith.truncf %120 : vector<8x128xf32> to vector<8x128xbf16>
    %c0_55 = arith.constant 0 : index
    %c0_56 = arith.constant 0 : index
    %128 = vector.load %arg7[%c0_55, %c0_56] : memref<128x512xbf16, #tpu.memory_space<vmem>>, vector<128x512xbf16>
    %cst_57 = arith.constant dense<0.000000e+00> : vector<8x512xf32>
    %129 = tpu.matmul %127, %128, %cst_57 {dimension_numbers = #tpu.dot_dimension_numbers<[1], [0], [0], [1], [0, 0, 1, 1], [], []>} : vector<8x128xbf16>, vector<128x512xbf16>, vector<8x512xf32> -> vector<8x512xf32>
    %130 = arith.addf %126, %129 : vector<8x512xf32>
    %131 = vector.extract_strided_slice %130 {offsets = [0, 0], sizes = [8, 128], strides = [1, 1]} : vector<8x512xf32> to vector<8x128xf32>
    %132 = arith.negf %131 : vector<8x128xf32>
    %133 = math.exp %132 : vector<8x128xf32>
    %cst_58 = arith.constant 1.000000e+00 : f32
    %134 = vector.broadcast %cst_58 : f32 to vector<8x128xf32>
    %135 = arith.addf %134, %133 : vector<8x128xf32>
    %136 = arith.divf %134, %135 : vector<8x128xf32>
    %137 = vector.extract_strided_slice %130 {offsets = [0, 128], sizes = [8, 128], strides = [1, 1]} : vector<8x512xf32> to vector<8x128xf32>
    %138 = arith.negf %137 : vector<8x128xf32>
    %139 = math.exp %138 : vector<8x128xf32>
    %cst_59 = arith.constant 1.000000e+00 : f32
    %140 = vector.broadcast %cst_59 : f32 to vector<8x128xf32>
    %141 = arith.addf %140, %139 : vector<8x128xf32>
    %142 = arith.divf %140, %141 : vector<8x128xf32>
    %143 = vector.extract_strided_slice %130 {offsets = [0, 256], sizes = [8, 128], strides = [1, 1]} : vector<8x512xf32> to vector<8x128xf32>
    %144 = math.tanh %143 : vector<8x128xf32>
    %145 = vector.extract_strided_slice %130 {offsets = [0, 384], sizes = [8, 128], strides = [1, 1]} : vector<8x512xf32> to vector<8x128xf32>
    %146 = arith.negf %145 : vector<8x128xf32>
    %147 = math.exp %146 : vector<8x128xf32>
    %cst_60 = arith.constant 1.000000e+00 : f32
    %148 = vector.broadcast %cst_60 : f32 to vector<8x128xf32>
    %149 = arith.addf %148, %147 : vector<8x128xf32>
    %150 = arith.divf %148, %149 : vector<8x128xf32>
    %151 = arith.mulf %142, %118 : vector<8x128xf32>
    %152 = arith.mulf %136, %144 : vector<8x128xf32>
    %153 = arith.addf %151, %152 : vector<8x128xf32>
    %154 = math.tanh %153 : vector<8x128xf32>
    %155 = arith.mulf %150, %154 : vector<8x128xf32>
    %156 = arith.truncf %155 : vector<8x128xf32> to vector<8x128xbf16>
    %c3_61 = arith.constant 3 : index
    %c0_62 = arith.constant 0 : index
    %c0_63 = arith.constant 0 : index
    %157 = vector.load %arg16[%c3_61, %c0_62, %c0_63] : memref<8x8x128xbf16, #tpu.memory_space<vmem>>, vector<1x8x128xbf16>
    %158 = vector.shape_cast %157 : vector<1x8x128xbf16> to vector<8x128xbf16>
    %159 = vector.shape_cast %156 : vector<8x128xbf16> to vector<1x8x128xbf16>
    tpu.vector_store %arg16[%c3_61, %c0_62, %c0_63], %159 {strides = array<i32>} : memref<8x8x128xbf16, #tpu.memory_space<vmem>>, vector<1x8x128xbf16>,
    %c4 = arith.constant 4 : index
    %c0_64 = arith.constant 0 : index
    %c0_65 = arith.constant 0 : index
    %160 = vector.load %arg17[%c4, %c0_64, %c0_65] : memref<8x8x512xf32, #tpu.memory_space<vmem>>, vector<1x8x512xf32>
    %161 = vector.shape_cast %160 : vector<1x8x512xf32> to vector<8x512xf32>
    %162 = arith.truncf %155 : vector<8x128xf32> to vector<8x128xbf16>
    %c0_66 = arith.constant 0 : index
    %c0_67 = arith.constant 0 : index
    %163 = vector.load %arg7[%c0_66, %c0_67] : memref<128x512xbf16, #tpu.memory_space<vmem>>, vector<128x512xbf16>
    %cst_68 = arith.constant dense<0.000000e+00> : vector<8x512xf32>
    %164 = tpu.matmul %162, %163, %cst_68 {dimension_numbers = #tpu.dot_dimension_numbers<[1], [0], [0], [1], [0, 0, 1, 1], [], []>} : vector<8x128xbf16>, vector<128x512xbf16>, vector<8x512xf32> -> vector<8x512xf32>
    %165 = arith.addf %161, %164 : vector<8x512xf32>
    %166 = vector.extract_strided_slice %165 {offsets = [0, 0], sizes = [8, 128], strides = [1, 1]} : vector<8x512xf32> to vector<8x128xf32>
    %167 = arith.negf %166 : vector<8x128xf32>
    %168 = math.exp %167 : vector<8x128xf32>
    %cst_69 = arith.constant 1.000000e+00 : f32
    %169 = vector.broadcast %cst_69 : f32 to vector<8x128xf32>
    %170 = arith.addf %169, %168 : vector<8x128xf32>
    %171 = arith.divf %169, %170 : vector<8x128xf32>
    %172 = vector.extract_strided_slice %165 {offsets = [0, 128], sizes = [8, 128], strides = [1, 1]} : vector<8x512xf32> to vector<8x128xf32>
    %173 = arith.negf %172 : vector<8x128xf32>
    %174 = math.exp %173 : vector<8x128xf32>
    %cst_70 = arith.constant 1.000000e+00 : f32
    %175 = vector.broadcast %cst_70 : f32 to vector<8x128xf32>
    %176 = arith.addf %175, %174 : vector<8x128xf32>
    %177 = arith.divf %175, %176 : vector<8x128xf32>
    %178 = vector.extract_strided_slice %165 {offsets = [0, 256], sizes = [8, 128], strides = [1, 1]} : vector<8x512xf32> to vector<8x128xf32>
    %179 = math.tanh %178 : vector<8x128xf32>
    %180 = vector.extract_strided_slice %165 {offsets = [0, 384], sizes = [8, 128], strides = [1, 1]} : vector<8x512xf32> to vector<8x128xf32>
    %181 = arith.negf %180 : vector<8x128xf32>
    %182 = math.exp %181 : vector<8x128xf32>
    %cst_71 = arith.constant 1.000000e+00 : f32
    %183 = vector.broadcast %cst_71 : f32 to vector<8x128xf32>
    %184 = arith.addf %183, %182 : vector<8x128xf32>
    %185 = arith.divf %183, %184 : vector<8x128xf32>
    %186 = arith.mulf %177, %153 : vector<8x128xf32>
    %187 = arith.mulf %171, %179 : vector<8x128xf32>
    %188 = arith.addf %186, %187 : vector<8x128xf32>
    %189 = math.tanh %188 : vector<8x128xf32>
    %190 = arith.mulf %185, %189 : vector<8x128xf32>
    %191 = arith.truncf %190 : vector<8x128xf32> to vector<8x128xbf16>
    %c4_72 = arith.constant 4 : index
    %c0_73 = arith.constant 0 : index
    %c0_74 = arith.constant 0 : index
    %192 = vector.load %arg16[%c4_72, %c0_73, %c0_74] : memref<8x8x128xbf16, #tpu.memory_space<vmem>>, vector<1x8x128xbf16>
    %193 = vector.shape_cast %192 : vector<1x8x128xbf16> to vector<8x128xbf16>
    %194 = vector.shape_cast %191 : vector<8x128xbf16> to vector<1x8x128xbf16>
    tpu.vector_store %arg16[%c4_72, %c0_73, %c0_74], %194 {strides = array<i32>} : memref<8x8x128xbf16, #tpu.memory_space<vmem>>, vector<1x8x128xbf16>,
    %c5 = arith.constant 5 : index
    %c0_75 = arith.constant 0 : index
    %c0_76 = arith.constant 0 : index
    %195 = vector.load %arg17[%c5, %c0_75, %c0_76] : memref<8x8x512xf32, #tpu.memory_space<vmem>>, vector<1x8x512xf32>
    %196 = vector.shape_cast %195 : vector<1x8x512xf32> to vector<8x512xf32>
    %197 = arith.truncf %190 : vector<8x128xf32> to vector<8x128xbf16>
    %c0_77 = arith.constant 0 : index
    %c0_78 = arith.constant 0 : index
    %198 = vector.load %arg7[%c0_77, %c0_78] : memref<128x512xbf16, #tpu.memory_space<vmem>>, vector<128x512xbf16>
    %cst_79 = arith.constant dense<0.000000e+00> : vector<8x512xf32>
    %199 = tpu.matmul %197, %198, %cst_79 {dimension_numbers = #tpu.dot_dimension_numbers<[1], [0], [0], [1], [0, 0, 1, 1], [], []>} : vector<8x128xbf16>, vector<128x512xbf16>, vector<8x512xf32> -> vector<8x512xf32>
    %200 = arith.addf %196, %199 : vector<8x512xf32>
    %201 = vector.extract_strided_slice %200 {offsets = [0, 0], sizes = [8, 128], strides = [1, 1]} : vector<8x512xf32> to vector<8x128xf32>
    %202 = arith.negf %201 : vector<8x128xf32>
    %203 = math.exp %202 : vector<8x128xf32>
    %cst_80 = arith.constant 1.000000e+00 : f32
    %204 = vector.broadcast %cst_80 : f32 to vector<8x128xf32>
    %205 = arith.addf %204, %203 : vector<8x128xf32>
    %206 = arith.divf %204, %205 : vector<8x128xf32>
    %207 = vector.extract_strided_slice %200 {offsets = [0, 128], sizes = [8, 128], strides = [1, 1]} : vector<8x512xf32> to vector<8x128xf32>
    %208 = arith.negf %207 : vector<8x128xf32>
    %209 = math.exp %208 : vector<8x128xf32>
    %cst_81 = arith.constant 1.000000e+00 : f32
    %210 = vector.broadcast %cst_81 : f32 to vector<8x128xf32>
    %211 = arith.addf %210, %209 : vector<8x128xf32>
    %212 = arith.divf %210, %211 : vector<8x128xf32>
    %213 = vector.extract_strided_slice %200 {offsets = [0, 256], sizes = [8, 128], strides = [1, 1]} : vector<8x512xf32> to vector<8x128xf32>
    %214 = math.tanh %213 : vector<8x128xf32>
    %215 = vector.extract_strided_slice %200 {offsets = [0, 384], sizes = [8, 128], strides = [1, 1]} : vector<8x512xf32> to vector<8x128xf32>
    %216 = arith.negf %215 : vector<8x128xf32>
    %217 = math.exp %216 : vector<8x128xf32>
    %cst_82 = arith.constant 1.000000e+00 : f32
    %218 = vector.broadcast %cst_82 : f32 to vector<8x128xf32>
    %219 = arith.addf %218, %217 : vector<8x128xf32>
    %220 = arith.divf %218, %219 : vector<8x128xf32>
    %221 = arith.mulf %212, %188 : vector<8x128xf32>
    %222 = arith.mulf %206, %214 : vector<8x128xf32>
    %223 = arith.addf %221, %222 : vector<8x128xf32>
    %224 = math.tanh %223 : vector<8x128xf32>
    %225 = arith.mulf %220, %224 : vector<8x128xf32>
    %226 = arith.truncf %225 : vector<8x128xf32> to vector<8x128xbf16>
    %c5_83 = arith.constant 5 : index
    %c0_84 = arith.constant 0 : index
    %c0_85 = arith.constant 0 : index
    %227 = vector.load %arg16[%c5_83, %c0_84, %c0_85] : memref<8x8x128xbf16, #tpu.memory_space<vmem>>, vector<1x8x128xbf16>
    %228 = vector.shape_cast %227 : vector<1x8x128xbf16> to vector<8x128xbf16>
    %229 = vector.shape_cast %226 : vector<8x128xbf16> to vector<1x8x128xbf16>
    tpu.vector_store %arg16[%c5_83, %c0_84, %c0_85], %229 {strides = array<i32>} : memref<8x8x128xbf16, #tpu.memory_space<vmem>>, vector<1x8x128xbf16>,
    %c6 = arith.constant 6 : index
    %c0_86 = arith.constant 0 : index
    %c0_87 = arith.constant 0 : index
    %230 = vector.load %arg17[%c6, %c0_86, %c0_87] : memref<8x8x512xf32, #tpu.memory_space<vmem>>, vector<1x8x512xf32>
    %231 = vector.shape_cast %230 : vector<1x8x512xf32> to vector<8x512xf32>
    %232 = arith.truncf %225 : vector<8x128xf32> to vector<8x128xbf16>
    %c0_88 = arith.constant 0 : index
    %c0_89 = arith.constant 0 : index
    %233 = vector.load %arg7[%c0_88, %c0_89] : memref<128x512xbf16, #tpu.memory_space<vmem>>, vector<128x512xbf16>
    %cst_90 = arith.constant dense<0.000000e+00> : vector<8x512xf32>
    %234 = tpu.matmul %232, %233, %cst_90 {dimension_numbers = #tpu.dot_dimension_numbers<[1], [0], [0], [1], [0, 0, 1, 1], [], []>} : vector<8x128xbf16>, vector<128x512xbf16>, vector<8x512xf32> -> vector<8x512xf32>
    %235 = arith.addf %231, %234 : vector<8x512xf32>
    %236 = vector.extract_strided_slice %235 {offsets = [0, 0], sizes = [8, 128], strides = [1, 1]} : vector<8x512xf32> to vector<8x128xf32>
    %237 = arith.negf %236 : vector<8x128xf32>
    %238 = math.exp %237 : vector<8x128xf32>
    %cst_91 = arith.constant 1.000000e+00 : f32
    %239 = vector.broadcast %cst_91 : f32 to vector<8x128xf32>
    %240 = arith.addf %239, %238 : vector<8x128xf32>
    %241 = arith.divf %239, %240 : vector<8x128xf32>
    %242 = vector.extract_strided_slice %235 {offsets = [0, 128], sizes = [8, 128], strides = [1, 1]} : vector<8x512xf32> to vector<8x128xf32>
    %243 = arith.negf %242 : vector<8x128xf32>
    %244 = math.exp %243 : vector<8x128xf32>
    %cst_92 = arith.constant 1.000000e+00 : f32
    %245 = vector.broadcast %cst_92 : f32 to vector<8x128xf32>
    %246 = arith.addf %245, %244 : vector<8x128xf32>
    %247 = arith.divf %245, %246 : vector<8x128xf32>
    %248 = vector.extract_strided_slice %235 {offsets = [0, 256], sizes = [8, 128], strides = [1, 1]} : vector<8x512xf32> to vector<8x128xf32>
    %249 = math.tanh %248 : vector<8x128xf32>
    %250 = vector.extract_strided_slice %235 {offsets = [0, 384], sizes = [8, 128], strides = [1, 1]} : vector<8x512xf32> to vector<8x128xf32>
    %251 = arith.negf %250 : vector<8x128xf32>
    %252 = math.exp %251 : vector<8x128xf32>
    %cst_93 = arith.constant 1.000000e+00 : f32
    %253 = vector.broadcast %cst_93 : f32 to vector<8x128xf32>
    %254 = arith.addf %253, %252 : vector<8x128xf32>
    %255 = arith.divf %253, %254 : vector<8x128xf32>
    %256 = arith.mulf %247, %223 : vector<8x128xf32>
    %257 = arith.mulf %241, %249 : vector<8x128xf32>
    %258 = arith.addf %256, %257 : vector<8x128xf32>
    %259 = math.tanh %258 : vector<8x128xf32>
    %260 = arith.mulf %255, %259 : vector<8x128xf32>
    %261 = arith.truncf %260 : vector<8x128xf32> to vector<8x128xbf16>
    %c6_94 = arith.constant 6 : index
    %c0_95 = arith.constant 0 : index
    %c0_96 = arith.constant 0 : index
    %262 = vector.load %arg16[%c6_94, %c0_95, %c0_96] : memref<8x8x128xbf16, #tpu.memory_space<vmem>>, vector<1x8x128xbf16>
    %263 = vector.shape_cast %262 : vector<1x8x128xbf16> to vector<8x128xbf16>
    %264 = vector.shape_cast %261 : vector<8x128xbf16> to vector<1x8x128xbf16>
    tpu.vector_store %arg16[%c6_94, %c0_95, %c0_96], %264 {strides = array<i32>} : memref<8x8x128xbf16, #tpu.memory_space<vmem>>, vector<1x8x128xbf16>,
    %c7 = arith.constant 7 : index
    %c0_97 = arith.constant 0 : index
    %c0_98 = arith.constant 0 : index
    %265 = vector.load %arg17[%c7, %c0_97, %c0_98] : memref<8x8x512xf32, #tpu.memory_space<vmem>>, vector<1x8x512xf32>
    %266 = vector.shape_cast %265 : vector<1x8x512xf32> to vector<8x512xf32>
    %267 = arith.truncf %260 : vector<8x128xf32> to vector<8x128xbf16>
    %c0_99 = arith.constant 0 : index
    %c0_100 = arith.constant 0 : index
    %268 = vector.load %arg7[%c0_99, %c0_100] : memref<128x512xbf16, #tpu.memory_space<vmem>>, vector<128x512xbf16>
    %cst_101 = arith.constant dense<0.000000e+00> : vector<8x512xf32>
    %269 = tpu.matmul %267, %268, %cst_101 {dimension_numbers = #tpu.dot_dimension_numbers<[1], [0], [0], [1], [0, 0, 1, 1], [], []>} : vector<8x128xbf16>, vector<128x512xbf16>, vector<8x512xf32> -> vector<8x512xf32>
    %270 = arith.addf %266, %269 : vector<8x512xf32>
    %271 = vector.extract_strided_slice %270 {offsets = [0, 0], sizes = [8, 128], strides = [1, 1]} : vector<8x512xf32> to vector<8x128xf32>
    %272 = arith.negf %271 : vector<8x128xf32>
    %273 = math.exp %272 : vector<8x128xf32>
    %cst_102 = arith.constant 1.000000e+00 : f32
    %274 = vector.broadcast %cst_102 : f32 to vector<8x128xf32>
    %275 = arith.addf %274, %273 : vector<8x128xf32>
    %276 = arith.divf %274, %275 : vector<8x128xf32>
    %277 = vector.extract_strided_slice %270 {offsets = [0, 128], sizes = [8, 128], strides = [1, 1]} : vector<8x512xf32> to vector<8x128xf32>
    %278 = arith.negf %277 : vector<8x128xf32>
    %279 = math.exp %278 : vector<8x128xf32>
    %cst_103 = arith.constant 1.000000e+00 : f32
    %280 = vector.broadcast %cst_103 : f32 to vector<8x128xf32>
    %281 = arith.addf %280, %279 : vector<8x128xf32>
    %282 = arith.divf %280, %281 : vector<8x128xf32>
    %283 = vector.extract_strided_slice %270 {offsets = [0, 256], sizes = [8, 128], strides = [1, 1]} : vector<8x512xf32> to vector<8x128xf32>
    %284 = math.tanh %283 : vector<8x128xf32>
    %285 = vector.extract_strided_slice %270 {offsets = [0, 384], sizes = [8, 128], strides = [1, 1]} : vector<8x512xf32> to vector<8x128xf32>
    %286 = arith.negf %285 : vector<8x128xf32>
    %287 = math.exp %286 : vector<8x128xf32>
    %cst_104 = arith.constant 1.000000e+00 : f32
    %288 = vector.broadcast %cst_104 : f32 to vector<8x128xf32>
    %289 = arith.addf %288, %287 : vector<8x128xf32>
    %290 = arith.divf %288, %289 : vector<8x128xf32>
    %291 = arith.mulf %282, %258 : vector<8x128xf32>
    %292 = arith.mulf %276, %284 : vector<8x128xf32>
    %293 = arith.addf %291, %292 : vector<8x128xf32>
    %294 = math.tanh %293 : vector<8x128xf32>
    %295 = arith.mulf %290, %294 : vector<8x128xf32>
    %296 = arith.truncf %295 : vector<8x128xf32> to vector<8x128xbf16>
    %c7_105 = arith.constant 7 : index
    %c0_106 = arith.constant 0 : index
    %c0_107 = arith.constant 0 : index
    %297 = vector.load %arg16[%c7_105, %c0_106, %c0_107] : memref<8x8x128xbf16, #tpu.memory_space<vmem>>, vector<1x8x128xbf16>
    %298 = vector.shape_cast %297 : vector<1x8x128xbf16> to vector<8x128xbf16>
    %299 = vector.shape_cast %296 : vector<8x128xbf16> to vector<1x8x128xbf16>
    tpu.vector_store %arg16[%c7_105, %c0_106, %c0_107], %299 {strides = array<i32>} : memref<8x8x128xbf16, #tpu.memory_space<vmem>>, vector<1x8x128xbf16>,
    %c0_108 = arith.constant 0 : index
    %c0_109 = arith.constant 0 : index
    %300 = vector.load %arg12[%c0_108, %c0_109] : memref<8x128xf32, #tpu.memory_space<vmem>>, vector<8x128xf32>
    tpu.vector_store %arg12[%c0_108, %c0_109], %295 {strides = array<i32>} : memref<8x128xf32, #tpu.memory_space<vmem>>, vector<8x128xf32>,
    %c0_110 = arith.constant 0 : index
    %c0_111 = arith.constant 0 : index
    %301 = vector.load %arg13[%c0_110, %c0_111] : memref<8x128xf32, #tpu.memory_space<vmem>>, vector<8x128xf32>
    tpu.vector_store %arg13[%c0_110, %c0_111], %293 {strides = array<i32>} : memref<8x128xf32, #tpu.memory_space<vmem>>, vector<8x128xf32>,
    %c0_112 = arith.constant 0 : index
    %c0_113 = arith.constant 0 : index
    %c0_114 = arith.constant 0 : index
    %302 = vector.load %arg16[%c0_112, %c0_113, %c0_114] : memref<8x8x128xbf16, #tpu.memory_space<vmem>>, vector<8x8x128xbf16>
    %303 = vector.shape_cast %302 : vector<8x8x128xbf16> to vector<64x128xbf16>
    %c0_115 = arith.constant 0 : index
    %c0_116 = arith.constant 0 : index
    %304 = vector.load %arg8[%c0_115, %c0_116] : memref<128x512xbf16, #tpu.memory_space<vmem>>, vector<128x512xbf16>
    %cst_117 = arith.constant dense<0.000000e+00> : vector<64x512xf32>
    %305 = tpu.matmul %303, %304, %cst_117 {dimension_numbers = #tpu.dot_dimension_numbers<[1], [0], [0], [1], [0, 0, 1, 1], [], []>} : vector<64x128xbf16>, vector<128x512xbf16>, vector<64x512xf32> -> vector<64x512xf32>
    %c0_118 = arith.constant 0 : index
    %c0_119 = arith.constant 0 : index
    %306 = vector.load %arg10[%c0_118, %c0_119] : memref<1x512xf32, #tpu.memory_space<vmem>>, vector<1x512xf32>
    %307 = vector.broadcast %306 : vector<1x512xf32> to vector<64x512xf32>
    %308 = arith.addf %305, %307 : vector<64x512xf32>
    %309 = vector.shape_cast %308 : vector<64x512xf32> to vector<8x8x512xf32>
    %c0_120 = arith.constant 0 : index
    %c0_121 = arith.constant 0 : index
    %c0_122 = arith.constant 0 : index
    %310 = vector.load %arg18[%c0_120, %c0_121, %c0_122] : memref<8x8x512xf32, #tpu.memory_space<vmem>>, vector<8x8x512xf32>
    tpu.vector_store %arg18[%c0_120, %c0_121, %c0_122], %309 {strides = array<i32>} : memref<8x8x512xf32, #tpu.memory_space<vmem>>, vector<8x8x512xf32>,
    %c0_123 = arith.constant 0 : index
    %c0_124 = arith.constant 0 : index
    %311 = vector.load %arg14[%c0_123, %c0_124] : memref<8x128xf32, #tpu.memory_space<vmem>>, vector<8x128xf32>
    %c0_125 = arith.constant 0 : index
    %c0_126 = arith.constant 0 : index
    %312 = vector.load %arg15[%c0_125, %c0_126] : memref<8x128xf32, #tpu.memory_space<vmem>>, vector<8x128xf32>
    %c0_127 = arith.constant 0 : index
    %c0_128 = arith.constant 0 : index
    %c0_129 = arith.constant 0 : index
    %313 = vector.load %arg18[%c0_127, %c0_128, %c0_129] : memref<8x8x512xf32, #tpu.memory_space<vmem>>, vector<1x8x512xf32>
    %314 = vector.shape_cast %313 : vector<1x8x512xf32> to vector<8x512xf32>
    %315 = arith.truncf %311 : vector<8x128xf32> to vector<8x128xbf16>
    %c0_130 = arith.constant 0 : index
    %c0_131 = arith.constant 0 : index
    %316 = vector.load %arg9[%c0_130, %c0_131] : memref<128x512xbf16, #tpu.memory_space<vmem>>, vector<128x512xbf16>
    %cst_132 = arith.constant dense<0.000000e+00> : vector<8x512xf32>
    %317 = tpu.matmul %315, %316, %cst_132 {dimension_numbers = #tpu.dot_dimension_numbers<[1], [0], [0], [1], [0, 0, 1, 1], [], []>} : vector<8x128xbf16>, vector<128x512xbf16>, vector<8x512xf32> -> vector<8x512xf32>
    %318 = arith.addf %314, %317 : vector<8x512xf32>
    %319 = vector.extract_strided_slice %318 {offsets = [0, 0], sizes = [8, 128], strides = [1, 1]} : vector<8x512xf32> to vector<8x128xf32>
    %320 = arith.negf %319 : vector<8x128xf32>
    %321 = math.exp %320 : vector<8x128xf32>
    %cst_133 = arith.constant 1.000000e+00 : f32
    %322 = vector.broadcast %cst_133 : f32 to vector<8x128xf32>
    %323 = arith.addf %322, %321 : vector<8x128xf32>
    %324 = arith.divf %322, %323 : vector<8x128xf32>
    %325 = vector.extract_strided_slice %318 {offsets = [0, 128], sizes = [8, 128], strides = [1, 1]} : vector<8x512xf32> to vector<8x128xf32>
    %326 = arith.negf %325 : vector<8x128xf32>
    %327 = math.exp %326 : vector<8x128xf32>
    %cst_134 = arith.constant 1.000000e+00 : f32
    %328 = vector.broadcast %cst_134 : f32 to vector<8x128xf32>
    %329 = arith.addf %328, %327 : vector<8x128xf32>
    %330 = arith.divf %328, %329 : vector<8x128xf32>
    %331 = vector.extract_strided_slice %318 {offsets = [0, 256], sizes = [8, 128], strides = [1, 1]} : vector<8x512xf32> to vector<8x128xf32>
    %332 = math.tanh %331 : vector<8x128xf32>
    %333 = vector.extract_strided_slice %318 {offsets = [0, 384], sizes = [8, 128], strides = [1, 1]} : vector<8x512xf32> to vector<8x128xf32>
    %334 = arith.negf %333 : vector<8x128xf32>
    %335 = math.exp %334 : vector<8x128xf32>
    %cst_135 = arith.constant 1.000000e+00 : f32
    %336 = vector.broadcast %cst_135 : f32 to vector<8x128xf32>
    %337 = arith.addf %336, %335 : vector<8x128xf32>
    %338 = arith.divf %336, %337 : vector<8x128xf32>
    %339 = arith.mulf %330, %312 : vector<8x128xf32>
    %340 = arith.mulf %324, %332 : vector<8x128xf32>
    %341 = arith.addf %339, %340 : vector<8x128xf32>
    %342 = math.tanh %341 : vector<8x128xf32>
    %343 = arith.mulf %338, %342 : vector<8x128xf32>
    %344 = arith.truncf %343 : vector<8x128xf32> to vector<8x128xbf16>
    %c0_136 = arith.constant 0 : index
    %c0_137 = arith.constant 0 : index
    %c0_138 = arith.constant 0 : index
    %345 = vector.load %arg11[%c0_136, %c0_137, %c0_138] : memref<8x8x128xbf16, #tpu.memory_space<vmem>>, vector<1x8x128xbf16>
    %346 = vector.shape_cast %345 : vector<1x8x128xbf16> to vector<8x128xbf16>
    %347 = vector.shape_cast %344 : vector<8x128xbf16> to vector<1x8x128xbf16>
    tpu.vector_store %arg11[%c0_136, %c0_137, %c0_138], %347 {strides = array<i32>} : memref<8x8x128xbf16, #tpu.memory_space<vmem>>, vector<1x8x128xbf16>,
    %c1_139 = arith.constant 1 : index
    %c0_140 = arith.constant 0 : index
    %c0_141 = arith.constant 0 : index
    %348 = vector.load %arg18[%c1_139, %c0_140, %c0_141] : memref<8x8x512xf32, #tpu.memory_space<vmem>>, vector<1x8x512xf32>
    %349 = vector.shape_cast %348 : vector<1x8x512xf32> to vector<8x512xf32>
    %350 = arith.truncf %343 : vector<8x128xf32> to vector<8x128xbf16>
    %c0_142 = arith.constant 0 : index
    %c0_143 = arith.constant 0 : index
    %351 = vector.load %arg9[%c0_142, %c0_143] : memref<128x512xbf16, #tpu.memory_space<vmem>>, vector<128x512xbf16>
    %cst_144 = arith.constant dense<0.000000e+00> : vector<8x512xf32>
    %352 = tpu.matmul %350, %351, %cst_144 {dimension_numbers = #tpu.dot_dimension_numbers<[1], [0], [0], [1], [0, 0, 1, 1], [], []>} : vector<8x128xbf16>, vector<128x512xbf16>, vector<8x512xf32> -> vector<8x512xf32>
    %353 = arith.addf %349, %352 : vector<8x512xf32>
    %354 = vector.extract_strided_slice %353 {offsets = [0, 0], sizes = [8, 128], strides = [1, 1]} : vector<8x512xf32> to vector<8x128xf32>
    %355 = arith.negf %354 : vector<8x128xf32>
    %356 = math.exp %355 : vector<8x128xf32>
    %cst_145 = arith.constant 1.000000e+00 : f32
    %357 = vector.broadcast %cst_145 : f32 to vector<8x128xf32>
    %358 = arith.addf %357, %356 : vector<8x128xf32>
    %359 = arith.divf %357, %358 : vector<8x128xf32>
    %360 = vector.extract_strided_slice %353 {offsets = [0, 128], sizes = [8, 128], strides = [1, 1]} : vector<8x512xf32> to vector<8x128xf32>
    %361 = arith.negf %360 : vector<8x128xf32>
    %362 = math.exp %361 : vector<8x128xf32>
    %cst_146 = arith.constant 1.000000e+00 : f32
    %363 = vector.broadcast %cst_146 : f32 to vector<8x128xf32>
    %364 = arith.addf %363, %362 : vector<8x128xf32>
    %365 = arith.divf %363, %364 : vector<8x128xf32>
    %366 = vector.extract_strided_slice %353 {offsets = [0, 256], sizes = [8, 128], strides = [1, 1]} : vector<8x512xf32> to vector<8x128xf32>
    %367 = math.tanh %366 : vector<8x128xf32>
    %368 = vector.extract_strided_slice %353 {offsets = [0, 384], sizes = [8, 128], strides = [1, 1]} : vector<8x512xf32> to vector<8x128xf32>
    %369 = arith.negf %368 : vector<8x128xf32>
    %370 = math.exp %369 : vector<8x128xf32>
    %cst_147 = arith.constant 1.000000e+00 : f32
    %371 = vector.broadcast %cst_147 : f32 to vector<8x128xf32>
    %372 = arith.addf %371, %370 : vector<8x128xf32>
    %373 = arith.divf %371, %372 : vector<8x128xf32>
    %374 = arith.mulf %365, %341 : vector<8x128xf32>
    %375 = arith.mulf %359, %367 : vector<8x128xf32>
    %376 = arith.addf %374, %375 : vector<8x128xf32>
    %377 = math.tanh %376 : vector<8x128xf32>
    %378 = arith.mulf %373, %377 : vector<8x128xf32>
    %379 = arith.truncf %378 : vector<8x128xf32> to vector<8x128xbf16>
    %c1_148 = arith.constant 1 : index
    %c0_149 = arith.constant 0 : index
    %c0_150 = arith.constant 0 : index
    %380 = vector.load %arg11[%c1_148, %c0_149, %c0_150] : memref<8x8x128xbf16, #tpu.memory_space<vmem>>, vector<1x8x128xbf16>
    %381 = vector.shape_cast %380 : vector<1x8x128xbf16> to vector<8x128xbf16>
    %382 = vector.shape_cast %379 : vector<8x128xbf16> to vector<1x8x128xbf16>
    tpu.vector_store %arg11[%c1_148, %c0_149, %c0_150], %382 {strides = array<i32>} : memref<8x8x128xbf16, #tpu.memory_space<vmem>>, vector<1x8x128xbf16>,
    %c2_151 = arith.constant 2 : index
    %c0_152 = arith.constant 0 : index
    %c0_153 = arith.constant 0 : index
    %383 = vector.load %arg18[%c2_151, %c0_152, %c0_153] : memref<8x8x512xf32, #tpu.memory_space<vmem>>, vector<1x8x512xf32>
    %384 = vector.shape_cast %383 : vector<1x8x512xf32> to vector<8x512xf32>
    %385 = arith.truncf %378 : vector<8x128xf32> to vector<8x128xbf16>
    %c0_154 = arith.constant 0 : index
    %c0_155 = arith.constant 0 : index
    %386 = vector.load %arg9[%c0_154, %c0_155] : memref<128x512xbf16, #tpu.memory_space<vmem>>, vector<128x512xbf16>
    %cst_156 = arith.constant dense<0.000000e+00> : vector<8x512xf32>
    %387 = tpu.matmul %385, %386, %cst_156 {dimension_numbers = #tpu.dot_dimension_numbers<[1], [0], [0], [1], [0, 0, 1, 1], [], []>} : vector<8x128xbf16>, vector<128x512xbf16>, vector<8x512xf32> -> vector<8x512xf32>
    %388 = arith.addf %384, %387 : vector<8x512xf32>
    %389 = vector.extract_strided_slice %388 {offsets = [0, 0], sizes = [8, 128], strides = [1, 1]} : vector<8x512xf32> to vector<8x128xf32>
    %390 = arith.negf %389 : vector<8x128xf32>
    %391 = math.exp %390 : vector<8x128xf32>
    %cst_157 = arith.constant 1.000000e+00 : f32
    %392 = vector.broadcast %cst_157 : f32 to vector<8x128xf32>
    %393 = arith.addf %392, %391 : vector<8x128xf32>
    %394 = arith.divf %392, %393 : vector<8x128xf32>
    %395 = vector.extract_strided_slice %388 {offsets = [0, 128], sizes = [8, 128], strides = [1, 1]} : vector<8x512xf32> to vector<8x128xf32>
    %396 = arith.negf %395 : vector<8x128xf32>
    %397 = math.exp %396 : vector<8x128xf32>
    %cst_158 = arith.constant 1.000000e+00 : f32
    %398 = vector.broadcast %cst_158 : f32 to vector<8x128xf32>
    %399 = arith.addf %398, %397 : vector<8x128xf32>
    %400 = arith.divf %398, %399 : vector<8x128xf32>
    %401 = vector.extract_strided_slice %388 {offsets = [0, 256], sizes = [8, 128], strides = [1, 1]} : vector<8x512xf32> to vector<8x128xf32>
    %402 = math.tanh %401 : vector<8x128xf32>
    %403 = vector.extract_strided_slice %388 {offsets = [0, 384], sizes = [8, 128], strides = [1, 1]} : vector<8x512xf32> to vector<8x128xf32>
    %404 = arith.negf %403 : vector<8x128xf32>
    %405 = math.exp %404 : vector<8x128xf32>
    %cst_159 = arith.constant 1.000000e+00 : f32
    %406 = vector.broadcast %cst_159 : f32 to vector<8x128xf32>
    %407 = arith.addf %406, %405 : vector<8x128xf32>
    %408 = arith.divf %406, %407 : vector<8x128xf32>
    %409 = arith.mulf %400, %376 : vector<8x128xf32>
    %410 = arith.mulf %394, %402 : vector<8x128xf32>
    %411 = arith.addf %409, %410 : vector<8x128xf32>
    %412 = math.tanh %411 : vector<8x128xf32>
    %413 = arith.mulf %408, %412 : vector<8x128xf32>
    %414 = arith.truncf %413 : vector<8x128xf32> to vector<8x128xbf16>
    %c2_160 = arith.constant 2 : index
    %c0_161 = arith.constant 0 : index
    %c0_162 = arith.constant 0 : index
    %415 = vector.load %arg11[%c2_160, %c0_161, %c0_162] : memref<8x8x128xbf16, #tpu.memory_space<vmem>>, vector<1x8x128xbf16>
    %416 = vector.shape_cast %415 : vector<1x8x128xbf16> to vector<8x128xbf16>
    %417 = vector.shape_cast %414 : vector<8x128xbf16> to vector<1x8x128xbf16>
    tpu.vector_store %arg11[%c2_160, %c0_161, %c0_162], %417 {strides = array<i32>} : memref<8x8x128xbf16, #tpu.memory_space<vmem>>, vector<1x8x128xbf16>,
    %c3_163 = arith.constant 3 : index
    %c0_164 = arith.constant 0 : index
    %c0_165 = arith.constant 0 : index
    %418 = vector.load %arg18[%c3_163, %c0_164, %c0_165] : memref<8x8x512xf32, #tpu.memory_space<vmem>>, vector<1x8x512xf32>
    %419 = vector.shape_cast %418 : vector<1x8x512xf32> to vector<8x512xf32>
    %420 = arith.truncf %413 : vector<8x128xf32> to vector<8x128xbf16>
    %c0_166 = arith.constant 0 : index
    %c0_167 = arith.constant 0 : index
    %421 = vector.load %arg9[%c0_166, %c0_167] : memref<128x512xbf16, #tpu.memory_space<vmem>>, vector<128x512xbf16>
    %cst_168 = arith.constant dense<0.000000e+00> : vector<8x512xf32>
    %422 = tpu.matmul %420, %421, %cst_168 {dimension_numbers = #tpu.dot_dimension_numbers<[1], [0], [0], [1], [0, 0, 1, 1], [], []>} : vector<8x128xbf16>, vector<128x512xbf16>, vector<8x512xf32> -> vector<8x512xf32>
    %423 = arith.addf %419, %422 : vector<8x512xf32>
    %424 = vector.extract_strided_slice %423 {offsets = [0, 0], sizes = [8, 128], strides = [1, 1]} : vector<8x512xf32> to vector<8x128xf32>
    %425 = arith.negf %424 : vector<8x128xf32>
    %426 = math.exp %425 : vector<8x128xf32>
    %cst_169 = arith.constant 1.000000e+00 : f32
    %427 = vector.broadcast %cst_169 : f32 to vector<8x128xf32>
    %428 = arith.addf %427, %426 : vector<8x128xf32>
    %429 = arith.divf %427, %428 : vector<8x128xf32>
    %430 = vector.extract_strided_slice %423 {offsets = [0, 128], sizes = [8, 128], strides = [1, 1]} : vector<8x512xf32> to vector<8x128xf32>
    %431 = arith.negf %430 : vector<8x128xf32>
    %432 = math.exp %431 : vector<8x128xf32>
    %cst_170 = arith.constant 1.000000e+00 : f32
    %433 = vector.broadcast %cst_170 : f32 to vector<8x128xf32>
    %434 = arith.addf %433, %432 : vector<8x128xf32>
    %435 = arith.divf %433, %434 : vector<8x128xf32>
    %436 = vector.extract_strided_slice %423 {offsets = [0, 256], sizes = [8, 128], strides = [1, 1]} : vector<8x512xf32> to vector<8x128xf32>
    %437 = math.tanh %436 : vector<8x128xf32>
    %438 = vector.extract_strided_slice %423 {offsets = [0, 384], sizes = [8, 128], strides = [1, 1]} : vector<8x512xf32> to vector<8x128xf32>
    %439 = arith.negf %438 : vector<8x128xf32>
    %440 = math.exp %439 : vector<8x128xf32>
    %cst_171 = arith.constant 1.000000e+00 : f32
    %441 = vector.broadcast %cst_171 : f32 to vector<8x128xf32>
    %442 = arith.addf %441, %440 : vector<8x128xf32>
    %443 = arith.divf %441, %442 : vector<8x128xf32>
    %444 = arith.mulf %435, %411 : vector<8x128xf32>
    %445 = arith.mulf %429, %437 : vector<8x128xf32>
    %446 = arith.addf %444, %445 : vector<8x128xf32>
    %447 = math.tanh %446 : vector<8x128xf32>
    %448 = arith.mulf %443, %447 : vector<8x128xf32>
    %449 = arith.truncf %448 : vector<8x128xf32> to vector<8x128xbf16>
    %c3_172 = arith.constant 3 : index
    %c0_173 = arith.constant 0 : index
    %c0_174 = arith.constant 0 : index
    %450 = vector.load %arg11[%c3_172, %c0_173, %c0_174] : memref<8x8x128xbf16, #tpu.memory_space<vmem>>, vector<1x8x128xbf16>
    %451 = vector.shape_cast %450 : vector<1x8x128xbf16> to vector<8x128xbf16>
    %452 = vector.shape_cast %449 : vector<8x128xbf16> to vector<1x8x128xbf16>
    tpu.vector_store %arg11[%c3_172, %c0_173, %c0_174], %452 {strides = array<i32>} : memref<8x8x128xbf16, #tpu.memory_space<vmem>>, vector<1x8x128xbf16>,
    %c4_175 = arith.constant 4 : index
    %c0_176 = arith.constant 0 : index
    %c0_177 = arith.constant 0 : index
    %453 = vector.load %arg18[%c4_175, %c0_176, %c0_177] : memref<8x8x512xf32, #tpu.memory_space<vmem>>, vector<1x8x512xf32>
    %454 = vector.shape_cast %453 : vector<1x8x512xf32> to vector<8x512xf32>
    %455 = arith.truncf %448 : vector<8x128xf32> to vector<8x128xbf16>
    %c0_178 = arith.constant 0 : index
    %c0_179 = arith.constant 0 : index
    %456 = vector.load %arg9[%c0_178, %c0_179] : memref<128x512xbf16, #tpu.memory_space<vmem>>, vector<128x512xbf16>
    %cst_180 = arith.constant dense<0.000000e+00> : vector<8x512xf32>
    %457 = tpu.matmul %455, %456, %cst_180 {dimension_numbers = #tpu.dot_dimension_numbers<[1], [0], [0], [1], [0, 0, 1, 1], [], []>} : vector<8x128xbf16>, vector<128x512xbf16>, vector<8x512xf32> -> vector<8x512xf32>
    %458 = arith.addf %454, %457 : vector<8x512xf32>
    %459 = vector.extract_strided_slice %458 {offsets = [0, 0], sizes = [8, 128], strides = [1, 1]} : vector<8x512xf32> to vector<8x128xf32>
    %460 = arith.negf %459 : vector<8x128xf32>
    %461 = math.exp %460 : vector<8x128xf32>
    %cst_181 = arith.constant 1.000000e+00 : f32
    %462 = vector.broadcast %cst_181 : f32 to vector<8x128xf32>
    %463 = arith.addf %462, %461 : vector<8x128xf32>
    %464 = arith.divf %462, %463 : vector<8x128xf32>
    %465 = vector.extract_strided_slice %458 {offsets = [0, 128], sizes = [8, 128], strides = [1, 1]} : vector<8x512xf32> to vector<8x128xf32>
    %466 = arith.negf %465 : vector<8x128xf32>
    %467 = math.exp %466 : vector<8x128xf32>
    %cst_182 = arith.constant 1.000000e+00 : f32
    %468 = vector.broadcast %cst_182 : f32 to vector<8x128xf32>
    %469 = arith.addf %468, %467 : vector<8x128xf32>
    %470 = arith.divf %468, %469 : vector<8x128xf32>
    %471 = vector.extract_strided_slice %458 {offsets = [0, 256], sizes = [8, 128], strides = [1, 1]} : vector<8x512xf32> to vector<8x128xf32>
    %472 = math.tanh %471 : vector<8x128xf32>
    %473 = vector.extract_strided_slice %458 {offsets = [0, 384], sizes = [8, 128], strides = [1, 1]} : vector<8x512xf32> to vector<8x128xf32>
    %474 = arith.negf %473 : vector<8x128xf32>
    %475 = math.exp %474 : vector<8x128xf32>
    %cst_183 = arith.constant 1.000000e+00 : f32
    %476 = vector.broadcast %cst_183 : f32 to vector<8x128xf32>
    %477 = arith.addf %476, %475 : vector<8x128xf32>
    %478 = arith.divf %476, %477 : vector<8x128xf32>
    %479 = arith.mulf %470, %446 : vector<8x128xf32>
    %480 = arith.mulf %464, %472 : vector<8x128xf32>
    %481 = arith.addf %479, %480 : vector<8x128xf32>
    %482 = math.tanh %481 : vector<8x128xf32>
    %483 = arith.mulf %478, %482 : vector<8x128xf32>
    %484 = arith.truncf %483 : vector<8x128xf32> to vector<8x128xbf16>
    %c4_184 = arith.constant 4 : index
    %c0_185 = arith.constant 0 : index
    %c0_186 = arith.constant 0 : index
    %485 = vector.load %arg11[%c4_184, %c0_185, %c0_186] : memref<8x8x128xbf16, #tpu.memory_space<vmem>>, vector<1x8x128xbf16>
    %486 = vector.shape_cast %485 : vector<1x8x128xbf16> to vector<8x128xbf16>
    %487 = vector.shape_cast %484 : vector<8x128xbf16> to vector<1x8x128xbf16>
    tpu.vector_store %arg11[%c4_184, %c0_185, %c0_186], %487 {strides = array<i32>} : memref<8x8x128xbf16, #tpu.memory_space<vmem>>, vector<1x8x128xbf16>,
    %c5_187 = arith.constant 5 : index
    %c0_188 = arith.constant 0 : index
    %c0_189 = arith.constant 0 : index
    %488 = vector.load %arg18[%c5_187, %c0_188, %c0_189] : memref<8x8x512xf32, #tpu.memory_space<vmem>>, vector<1x8x512xf32>
    %489 = vector.shape_cast %488 : vector<1x8x512xf32> to vector<8x512xf32>
    %490 = arith.truncf %483 : vector<8x128xf32> to vector<8x128xbf16>
    %c0_190 = arith.constant 0 : index
    %c0_191 = arith.constant 0 : index
    %491 = vector.load %arg9[%c0_190, %c0_191] : memref<128x512xbf16, #tpu.memory_space<vmem>>, vector<128x512xbf16>
    %cst_192 = arith.constant dense<0.000000e+00> : vector<8x512xf32>
    %492 = tpu.matmul %490, %491, %cst_192 {dimension_numbers = #tpu.dot_dimension_numbers<[1], [0], [0], [1], [0, 0, 1, 1], [], []>} : vector<8x128xbf16>, vector<128x512xbf16>, vector<8x512xf32> -> vector<8x512xf32>
    %493 = arith.addf %489, %492 : vector<8x512xf32>
    %494 = vector.extract_strided_slice %493 {offsets = [0, 0], sizes = [8, 128], strides = [1, 1]} : vector<8x512xf32> to vector<8x128xf32>
    %495 = arith.negf %494 : vector<8x128xf32>
    %496 = math.exp %495 : vector<8x128xf32>
    %cst_193 = arith.constant 1.000000e+00 : f32
    %497 = vector.broadcast %cst_193 : f32 to vector<8x128xf32>
    %498 = arith.addf %497, %496 : vector<8x128xf32>
    %499 = arith.divf %497, %498 : vector<8x128xf32>
    %500 = vector.extract_strided_slice %493 {offsets = [0, 128], sizes = [8, 128], strides = [1, 1]} : vector<8x512xf32> to vector<8x128xf32>
    %501 = arith.negf %500 : vector<8x128xf32>
    %502 = math.exp %501 : vector<8x128xf32>
    %cst_194 = arith.constant 1.000000e+00 : f32
    %503 = vector.broadcast %cst_194 : f32 to vector<8x128xf32>
    %504 = arith.addf %503, %502 : vector<8x128xf32>
    %505 = arith.divf %503, %504 : vector<8x128xf32>
    %506 = vector.extract_strided_slice %493 {offsets = [0, 256], sizes = [8, 128], strides = [1, 1]} : vector<8x512xf32> to vector<8x128xf32>
    %507 = math.tanh %506 : vector<8x128xf32>
    %508 = vector.extract_strided_slice %493 {offsets = [0, 384], sizes = [8, 128], strides = [1, 1]} : vector<8x512xf32> to vector<8x128xf32>
    %509 = arith.negf %508 : vector<8x128xf32>
    %510 = math.exp %509 : vector<8x128xf32>
    %cst_195 = arith.constant 1.000000e+00 : f32
    %511 = vector.broadcast %cst_195 : f32 to vector<8x128xf32>
    %512 = arith.addf %511, %510 : vector<8x128xf32>
    %513 = arith.divf %511, %512 : vector<8x128xf32>
    %514 = arith.mulf %505, %481 : vector<8x128xf32>
    %515 = arith.mulf %499, %507 : vector<8x128xf32>
    %516 = arith.addf %514, %515 : vector<8x128xf32>
    %517 = math.tanh %516 : vector<8x128xf32>
    %518 = arith.mulf %513, %517 : vector<8x128xf32>
    %519 = arith.truncf %518 : vector<8x128xf32> to vector<8x128xbf16>
    %c5_196 = arith.constant 5 : index
    %c0_197 = arith.constant 0 : index
    %c0_198 = arith.constant 0 : index
    %520 = vector.load %arg11[%c5_196, %c0_197, %c0_198] : memref<8x8x128xbf16, #tpu.memory_space<vmem>>, vector<1x8x128xbf16>
    %521 = vector.shape_cast %520 : vector<1x8x128xbf16> to vector<8x128xbf16>
    %522 = vector.shape_cast %519 : vector<8x128xbf16> to vector<1x8x128xbf16>
    tpu.vector_store %arg11[%c5_196, %c0_197, %c0_198], %522 {strides = array<i32>} : memref<8x8x128xbf16, #tpu.memory_space<vmem>>, vector<1x8x128xbf16>,
    %c6_199 = arith.constant 6 : index
    %c0_200 = arith.constant 0 : index
    %c0_201 = arith.constant 0 : index
    %523 = vector.load %arg18[%c6_199, %c0_200, %c0_201] : memref<8x8x512xf32, #tpu.memory_space<vmem>>, vector<1x8x512xf32>
    %524 = vector.shape_cast %523 : vector<1x8x512xf32> to vector<8x512xf32>
    %525 = arith.truncf %518 : vector<8x128xf32> to vector<8x128xbf16>
    %c0_202 = arith.constant 0 : index
    %c0_203 = arith.constant 0 : index
    %526 = vector.load %arg9[%c0_202, %c0_203] : memref<128x512xbf16, #tpu.memory_space<vmem>>, vector<128x512xbf16>
    %cst_204 = arith.constant dense<0.000000e+00> : vector<8x512xf32>
    %527 = tpu.matmul %525, %526, %cst_204 {dimension_numbers = #tpu.dot_dimension_numbers<[1], [0], [0], [1], [0, 0, 1, 1], [], []>} : vector<8x128xbf16>, vector<128x512xbf16>, vector<8x512xf32> -> vector<8x512xf32>
    %528 = arith.addf %524, %527 : vector<8x512xf32>
    %529 = vector.extract_strided_slice %528 {offsets = [0, 0], sizes = [8, 128], strides = [1, 1]} : vector<8x512xf32> to vector<8x128xf32>
    %530 = arith.negf %529 : vector<8x128xf32>
    %531 = math.exp %530 : vector<8x128xf32>
    %cst_205 = arith.constant 1.000000e+00 : f32
    %532 = vector.broadcast %cst_205 : f32 to vector<8x128xf32>
    %533 = arith.addf %532, %531 : vector<8x128xf32>
    %534 = arith.divf %532, %533 : vector<8x128xf32>
    %535 = vector.extract_strided_slice %528 {offsets = [0, 128], sizes = [8, 128], strides = [1, 1]} : vector<8x512xf32> to vector<8x128xf32>
    %536 = arith.negf %535 : vector<8x128xf32>
    %537 = math.exp %536 : vector<8x128xf32>
    %cst_206 = arith.constant 1.000000e+00 : f32
    %538 = vector.broadcast %cst_206 : f32 to vector<8x128xf32>
    %539 = arith.addf %538, %537 : vector<8x128xf32>
    %540 = arith.divf %538, %539 : vector<8x128xf32>
    %541 = vector.extract_strided_slice %528 {offsets = [0, 256], sizes = [8, 128], strides = [1, 1]} : vector<8x512xf32> to vector<8x128xf32>
    %542 = math.tanh %541 : vector<8x128xf32>
    %543 = vector.extract_strided_slice %528 {offsets = [0, 384], sizes = [8, 128], strides = [1, 1]} : vector<8x512xf32> to vector<8x128xf32>
    %544 = arith.negf %543 : vector<8x128xf32>
    %545 = math.exp %544 : vector<8x128xf32>
    %cst_207 = arith.constant 1.000000e+00 : f32
    %546 = vector.broadcast %cst_207 : f32 to vector<8x128xf32>
    %547 = arith.addf %546, %545 : vector<8x128xf32>
    %548 = arith.divf %546, %547 : vector<8x128xf32>
    %549 = arith.mulf %540, %516 : vector<8x128xf32>
    %550 = arith.mulf %534, %542 : vector<8x128xf32>
    %551 = arith.addf %549, %550 : vector<8x128xf32>
    %552 = math.tanh %551 : vector<8x128xf32>
    %553 = arith.mulf %548, %552 : vector<8x128xf32>
    %554 = arith.truncf %553 : vector<8x128xf32> to vector<8x128xbf16>
    %c6_208 = arith.constant 6 : index
    %c0_209 = arith.constant 0 : index
    %c0_210 = arith.constant 0 : index
    %555 = vector.load %arg11[%c6_208, %c0_209, %c0_210] : memref<8x8x128xbf16, #tpu.memory_space<vmem>>, vector<1x8x128xbf16>
    %556 = vector.shape_cast %555 : vector<1x8x128xbf16> to vector<8x128xbf16>
    %557 = vector.shape_cast %554 : vector<8x128xbf16> to vector<1x8x128xbf16>
    tpu.vector_store %arg11[%c6_208, %c0_209, %c0_210], %557 {strides = array<i32>} : memref<8x8x128xbf16, #tpu.memory_space<vmem>>, vector<1x8x128xbf16>,
    %c7_211 = arith.constant 7 : index
    %c0_212 = arith.constant 0 : index
    %c0_213 = arith.constant 0 : index
    %558 = vector.load %arg18[%c7_211, %c0_212, %c0_213] : memref<8x8x512xf32, #tpu.memory_space<vmem>>, vector<1x8x512xf32>
    %559 = vector.shape_cast %558 : vector<1x8x512xf32> to vector<8x512xf32>
    %560 = arith.truncf %553 : vector<8x128xf32> to vector<8x128xbf16>
    %c0_214 = arith.constant 0 : index
    %c0_215 = arith.constant 0 : index
    %561 = vector.load %arg9[%c0_214, %c0_215] : memref<128x512xbf16, #tpu.memory_space<vmem>>, vector<128x512xbf16>
    %cst_216 = arith.constant dense<0.000000e+00> : vector<8x512xf32>
    %562 = tpu.matmul %560, %561, %cst_216 {dimension_numbers = #tpu.dot_dimension_numbers<[1], [0], [0], [1], [0, 0, 1, 1], [], []>} : vector<8x128xbf16>, vector<128x512xbf16>, vector<8x512xf32> -> vector<8x512xf32>
    %563 = arith.addf %559, %562 : vector<8x512xf32>
    %564 = vector.extract_strided_slice %563 {offsets = [0, 0], sizes = [8, 128], strides = [1, 1]} : vector<8x512xf32> to vector<8x128xf32>
    %565 = arith.negf %564 : vector<8x128xf32>
    %566 = math.exp %565 : vector<8x128xf32>
    %cst_217 = arith.constant 1.000000e+00 : f32
    %567 = vector.broadcast %cst_217 : f32 to vector<8x128xf32>
    %568 = arith.addf %567, %566 : vector<8x128xf32>
    %569 = arith.divf %567, %568 : vector<8x128xf32>
    %570 = vector.extract_strided_slice %563 {offsets = [0, 128], sizes = [8, 128], strides = [1, 1]} : vector<8x512xf32> to vector<8x128xf32>
    %571 = arith.negf %570 : vector<8x128xf32>
    %572 = math.exp %571 : vector<8x128xf32>
    %cst_218 = arith.constant 1.000000e+00 : f32
    %573 = vector.broadcast %cst_218 : f32 to vector<8x128xf32>
    %574 = arith.addf %573, %572 : vector<8x128xf32>
    %575 = arith.divf %573, %574 : vector<8x128xf32>
    %576 = vector.extract_strided_slice %563 {offsets = [0, 256], sizes = [8, 128], strides = [1, 1]} : vector<8x512xf32> to vector<8x128xf32>
    %577 = math.tanh %576 : vector<8x128xf32>
    %578 = vector.extract_strided_slice %563 {offsets = [0, 384], sizes = [8, 128], strides = [1, 1]} : vector<8x512xf32> to vector<8x128xf32>
    %579 = arith.negf %578 : vector<8x128xf32>
    %580 = math.exp %579 : vector<8x128xf32>
    %cst_219 = arith.constant 1.000000e+00 : f32
    %581 = vector.broadcast %cst_219 : f32 to vector<8x128xf32>
    %582 = arith.addf %581, %580 : vector<8x128xf32>
    %583 = arith.divf %581, %582 : vector<8x128xf32>
    %584 = arith.mulf %575, %551 : vector<8x128xf32>
    %585 = arith.mulf %569, %577 : vector<8x128xf32>
    %586 = arith.addf %584, %585 : vector<8x128xf32>
    %587 = math.tanh %586 : vector<8x128xf32>
    %588 = arith.mulf %583, %587 : vector<8x128xf32>
    %589 = arith.truncf %588 : vector<8x128xf32> to vector<8x128xbf16>
    %c7_220 = arith.constant 7 : index
    %c0_221 = arith.constant 0 : index
    %c0_222 = arith.constant 0 : index
    %590 = vector.load %arg11[%c7_220, %c0_221, %c0_222] : memref<8x8x128xbf16, #tpu.memory_space<vmem>>, vector<1x8x128xbf16>
    %591 = vector.shape_cast %590 : vector<1x8x128xbf16> to vector<8x128xbf16>
    %592 = vector.shape_cast %589 : vector<8x128xbf16> to vector<1x8x128xbf16>
    tpu.vector_store %arg11[%c7_220, %c0_221, %c0_222], %592 {strides = array<i32>} : memref<8x8x128xbf16, #tpu.memory_space<vmem>>, vector<1x8x128xbf16>,
    %c0_223 = arith.constant 0 : index
    %c0_224 = arith.constant 0 : index
    %593 = vector.load %arg14[%c0_223, %c0_224] : memref<8x128xf32, #tpu.memory_space<vmem>>, vector<8x128xf32>
    tpu.vector_store %arg14[%c0_223, %c0_224], %588 {strides = array<i32>} : memref<8x128xf32, #tpu.memory_space<vmem>>, vector<8x128xf32>,
    %c0_225 = arith.constant 0 : index
    %c0_226 = arith.constant 0 : index
    %594 = vector.load %arg15[%c0_225, %c0_226] : memref<8x128xf32, #tpu.memory_space<vmem>>, vector<8x128xf32>
    tpu.vector_store %arg15[%c0_225, %c0_226], %586 {strides = array<i32>} : memref<8x128xf32, #tpu.memory_space<vmem>>, vector<8x128xf32>,
    return
  }
  func.func @transform_0(%arg0: i32, %arg1: i32) -> (i32, i32, i32) {
    %c0_i32 = arith.constant 0 : i32
    %c0_i32_0 = arith.constant 0 : i32
    return %arg1, %arg0, %c0_i32 : i32, i32, i32
  }
  func.func @transform_1(%arg0: i32, %arg1: i32) -> (i32, i32) {
    %c0_i32 = arith.constant 0 : i32
    %c0_i32_0 = arith.constant 0 : i32
    %c0_i32_1 = arith.constant 0 : i32
    return %c0_i32, %c0_i32_0 : i32, i32
  }
  func.func @transform_2(%arg0: i32, %arg1: i32) -> (i32, i32) {
    %c0_i32 = arith.constant 0 : i32
    %c0_i32_0 = arith.constant 0 : i32
    %c0_i32_1 = arith.constant 0 : i32
    return %c0_i32, %c0_i32_0 : i32, i32
  }
  func.func @transform_3(%arg0: i32, %arg1: i32) -> (i32, i32) {
    %c0_i32 = arith.constant 0 : i32
    %c0_i32_0 = arith.constant 0 : i32
    %c0_i32_1 = arith.constant 0 : i32
    return %c0_i32, %c0_i32_0 : i32, i32
  }
  func.func @transform_4(%arg0: i32, %arg1: i32) -> (i32, i32) {
    %c0_i32 = arith.constant 0 : i32
    %c0_i32_0 = arith.constant 0 : i32
    %c0_i32_1 = arith.constant 0 : i32
    return %c0_i32, %c0_i32_0 : i32, i32
  }
  func.func @transform_5(%arg0: i32, %arg1: i32) -> (i32, i32) {
    %c0_i32 = arith.constant 0 : i32
    %c0_i32_0 = arith.constant 0 : i32
    %c0_i32_1 = arith.constant 0 : i32
    return %c0_i32, %c0_i32_0 : i32, i32
  }
  func.func @transform_6(%arg0: i32, %arg1: i32) -> (i32, i32) {
    %c0_i32 = arith.constant 0 : i32
    %c0_i32_0 = arith.constant 0 : i32
    %c0_i32_1 = arith.constant 0 : i32
    return %c0_i32, %c0_i32_0 : i32, i32
  }
  func.func @transform_7(%arg0: i32, %arg1: i32) -> (i32, i32) {
    %c0_i32 = arith.constant 0 : i32
    %c0_i32_0 = arith.constant 0 : i32
    %c0_i32_1 = arith.constant 0 : i32
    return %c0_i32, %c0_i32_0 : i32, i32
  }
  func.func @transform_8(%arg0: i32, %arg1: i32) -> (i32, i32) {
    %c0_i32 = arith.constant 0 : i32
    %c0_i32_0 = arith.constant 0 : i32
    %c0_i32_1 = arith.constant 0 : i32
    return %c0_i32, %c0_i32_0 : i32, i32
  }
  func.func @transform_9(%arg0: i32, %arg1: i32) -> (i32, i32, i32) {
    %c0_i32 = arith.constant 0 : i32
    %c0_i32_0 = arith.constant 0 : i32
    return %arg1, %arg0, %c0_i32 : i32, i32, i32
  }
}

module attributes {stable_mosaic.version = 11 : i64} {
  func.func @_mlp_head_kernel(%arg0: i32, %arg1: memref<16x128xbf16, #tpu.memory_space<vmem>>, %arg2: memref<16x256xf32, #tpu.memory_space<vmem>>, %arg3: memref<1x128xf32, #tpu.memory_space<vmem>>, %arg4: memref<1x128xf32, #tpu.memory_space<vmem>>, %arg5: memref<128x1024xbf16, #tpu.memory_space<vmem>>, %arg6: memref<1x1024xf32, #tpu.memory_space<vmem>>, %arg7: memref<1024x256xbf16, #tpu.memory_space<vmem>>, %arg8: memref<1x256xf32, #tpu.memory_space<vmem>>, %arg9: memref<1x256xf32, #tpu.memory_space<vmem>>, %arg10: memref<1x256xf32, #tpu.memory_space<vmem>>, %arg11: memref<256x128xbf16, #tpu.memory_space<vmem>>, %arg12: memref<1x128xf32, #tpu.memory_space<vmem>>, %arg13: memref<16x128xf32, #tpu.memory_space<vmem>>) attributes {dimension_semantics = [#tpu.dimension_semantics<parallel>], iteration_bounds = array<i64: 1>, scalar_prefetch = 0 : i64, scratch_operands = 0 : i64, tpu.core_type = #tpu.core_type<tc>, window_params = [{transform_indices = @transform_0, window_bounds = array<i64: 16, 128>}, {transform_indices = @transform_1, window_bounds = array<i64: 16, 256>}, {pipeline_mode = #tpu.pipeline_mode<synchronous>, transform_indices = @transform_2, window_bounds = array<i64: 1, 128>}, {pipeline_mode = #tpu.pipeline_mode<synchronous>, transform_indices = @transform_3, window_bounds = array<i64: 1, 128>}, {pipeline_mode = #tpu.pipeline_mode<synchronous>, transform_indices = @transform_4, window_bounds = array<i64: 128, 1024>}, {pipeline_mode = #tpu.pipeline_mode<synchronous>, transform_indices = @transform_5, window_bounds = array<i64: 1, 1024>}, {pipeline_mode = #tpu.pipeline_mode<synchronous>, transform_indices = @transform_6, window_bounds = array<i64: 1024, 256>}, {pipeline_mode = #tpu.pipeline_mode<synchronous>, transform_indices = @transform_7, window_bounds = array<i64: 1, 256>}, {pipeline_mode = #tpu.pipeline_mode<synchronous>, transform_indices = @transform_8, window_bounds = array<i64: 1, 256>}, {pipeline_mode = #tpu.pipeline_mode<synchronous>, transform_indices = @transform_9, window_bounds = array<i64: 1, 256>}, {pipeline_mode = #tpu.pipeline_mode<synchronous>, transform_indices = @transform_10, window_bounds = array<i64: 256, 128>}, {pipeline_mode = #tpu.pipeline_mode<synchronous>, transform_indices = @transform_11, window_bounds = array<i64: 1, 128>}, {transform_indices = @transform_12, window_bounds = array<i64: 16, 128>}]} {
    %c0 = arith.constant 0 : index
    %c0_0 = arith.constant 0 : index
    %0 = vector.load %arg1[%c0, %c0_0] : memref<16x128xbf16, #tpu.memory_space<vmem>>, vector<16x128xbf16>
    %1 = arith.extf %0 : vector<16x128xbf16> to vector<16x128xf32>
    %c0_1 = arith.constant 0 : index
    %c0_2 = arith.constant 0 : index
    %2 = vector.load %arg3[%c0_1, %c0_2] : memref<1x128xf32, #tpu.memory_space<vmem>>, vector<1x128xf32>
    %c0_3 = arith.constant 0 : index
    %c0_4 = arith.constant 0 : index
    %3 = vector.load %arg4[%c0_3, %c0_4] : memref<1x128xf32, #tpu.memory_space<vmem>>, vector<1x128xf32>
    %cst = arith.constant dense<0.000000e+00> : vector<16xf32>
    %4 = vector.multi_reduction <add>, %1, %cst [1] : vector<16x128xf32> to vector<16xf32>
    %5 = vector.shape_cast %4 : vector<16xf32> to vector<16x1xf32>
    %cst_5 = arith.constant 1.280000e+02 : f32
    %6 = vector.broadcast %cst_5 : f32 to vector<16x1xf32>
    %7 = arith.divf %5, %6 : vector<16x1xf32>
    %8 = vector.broadcast %7 : vector<16x1xf32> to vector<16x128xf32>
    %9 = arith.subf %1, %8 : vector<16x128xf32>
    %10 = arith.mulf %9, %9 : vector<16x128xf32>
    %cst_6 = arith.constant dense<0.000000e+00> : vector<16xf32>
    %11 = vector.multi_reduction <add>, %10, %cst_6 [1] : vector<16x128xf32> to vector<16xf32>
    %12 = vector.shape_cast %11 : vector<16xf32> to vector<16x1xf32>
    %cst_7 = arith.constant 1.280000e+02 : f32
    %13 = vector.broadcast %cst_7 : f32 to vector<16x1xf32>
    %14 = arith.divf %12, %13 : vector<16x1xf32>
    %15 = vector.broadcast %7 : vector<16x1xf32> to vector<16x128xf32>
    %16 = arith.subf %1, %15 : vector<16x128xf32>
    %cst_8 = arith.constant 9.99999974E-6 : f32
    %17 = vector.broadcast %cst_8 : f32 to vector<16x1xf32>
    %18 = arith.addf %14, %17 : vector<16x1xf32>
    %19 = math.rsqrt %18 : vector<16x1xf32>
    %20 = vector.broadcast %19 : vector<16x1xf32> to vector<16x128xf32>
    %21 = arith.mulf %16, %20 : vector<16x128xf32>
    %22 = vector.broadcast %2 : vector<1x128xf32> to vector<16x128xf32>
    %23 = arith.mulf %21, %22 : vector<16x128xf32>
    %24 = vector.broadcast %3 : vector<1x128xf32> to vector<16x128xf32>
    %25 = arith.addf %23, %24 : vector<16x128xf32>
    %26 = arith.truncf %25 : vector<16x128xf32> to vector<16x128xbf16>
    %c0_9 = arith.constant 0 : index
    %c0_10 = arith.constant 0 : index
    %27 = vector.load %arg5[%c0_9, %c0_10] : memref<128x1024xbf16, #tpu.memory_space<vmem>>, vector<128x1024xbf16>
    %cst_11 = arith.constant dense<0.000000e+00> : vector<16x1024xf32>
    %28 = tpu.matmul %26, %27, %cst_11 {dimension_numbers = #tpu.dot_dimension_numbers<[1], [0], [0], [1], [0, 0, 1, 1], [], []>} : vector<16x128xbf16>, vector<128x1024xbf16>, vector<16x1024xf32> -> vector<16x1024xf32>
    %c0_12 = arith.constant 0 : index
    %c0_13 = arith.constant 0 : index
    %29 = vector.load %arg6[%c0_12, %c0_13] : memref<1x1024xf32, #tpu.memory_space<vmem>>, vector<1x1024xf32>
    %30 = vector.broadcast %29 : vector<1x1024xf32> to vector<16x1024xf32>
    %31 = arith.addf %28, %30 : vector<16x1024xf32>
    %cst_14 = arith.constant 0.000000e+00 : f32
    %32 = vector.broadcast %cst_14 : f32 to vector<16x1024xf32>
    %33 = arith.maximumf %31, %32 : vector<16x1024xf32>
    %34 = arith.truncf %33 : vector<16x1024xf32> to vector<16x1024xbf16>
    %c0_15 = arith.constant 0 : index
    %c0_16 = arith.constant 0 : index
    %35 = vector.load %arg7[%c0_15, %c0_16] : memref<1024x256xbf16, #tpu.memory_space<vmem>>, vector<1024x256xbf16>
    %cst_17 = arith.constant dense<0.000000e+00> : vector<16x256xf32>
    %36 = tpu.matmul %34, %35, %cst_17 {dimension_numbers = #tpu.dot_dimension_numbers<[1], [0], [0], [1], [0, 0, 1, 1], [], []>} : vector<16x1024xbf16>, vector<1024x256xbf16>, vector<16x256xf32> -> vector<16x256xf32>
    %c0_18 = arith.constant 0 : index
    %c0_19 = arith.constant 0 : index
    %37 = vector.load %arg8[%c0_18, %c0_19] : memref<1x256xf32, #tpu.memory_space<vmem>>, vector<1x256xf32>
    %38 = vector.broadcast %37 : vector<1x256xf32> to vector<16x256xf32>
    %39 = arith.addf %36, %38 : vector<16x256xf32>
    %c0_20 = arith.constant 0 : index
    %c0_21 = arith.constant 0 : index
    %40 = vector.load %arg2[%c0_20, %c0_21] : memref<16x256xf32, #tpu.memory_space<vmem>>, vector<16x256xf32>
    %41 = arith.addf %40, %39 : vector<16x256xf32>
    %c0_22 = arith.constant 0 : index
    %c0_23 = arith.constant 0 : index
    %42 = vector.load %arg9[%c0_22, %c0_23] : memref<1x256xf32, #tpu.memory_space<vmem>>, vector<1x256xf32>
    %c0_24 = arith.constant 0 : index
    %c0_25 = arith.constant 0 : index
    %43 = vector.load %arg10[%c0_24, %c0_25] : memref<1x256xf32, #tpu.memory_space<vmem>>, vector<1x256xf32>
    %cst_26 = arith.constant dense<0.000000e+00> : vector<16xf32>
    %44 = vector.multi_reduction <add>, %41, %cst_26 [1] : vector<16x256xf32> to vector<16xf32>
    %45 = vector.shape_cast %44 : vector<16xf32> to vector<16x1xf32>
    %cst_27 = arith.constant 2.560000e+02 : f32
    %46 = vector.broadcast %cst_27 : f32 to vector<16x1xf32>
    %47 = arith.divf %45, %46 : vector<16x1xf32>
    %48 = vector.broadcast %47 : vector<16x1xf32> to vector<16x256xf32>
    %49 = arith.subf %41, %48 : vector<16x256xf32>
    %50 = arith.mulf %49, %49 : vector<16x256xf32>
    %cst_28 = arith.constant dense<0.000000e+00> : vector<16xf32>
    %51 = vector.multi_reduction <add>, %50, %cst_28 [1] : vector<16x256xf32> to vector<16xf32>
    %52 = vector.shape_cast %51 : vector<16xf32> to vector<16x1xf32>
    %cst_29 = arith.constant 2.560000e+02 : f32
    %53 = vector.broadcast %cst_29 : f32 to vector<16x1xf32>
    %54 = arith.divf %52, %53 : vector<16x1xf32>
    %55 = vector.broadcast %47 : vector<16x1xf32> to vector<16x256xf32>
    %56 = arith.subf %41, %55 : vector<16x256xf32>
    %cst_30 = arith.constant 9.99999974E-6 : f32
    %57 = vector.broadcast %cst_30 : f32 to vector<16x1xf32>
    %58 = arith.addf %54, %57 : vector<16x1xf32>
    %59 = math.rsqrt %58 : vector<16x1xf32>
    %60 = vector.broadcast %59 : vector<16x1xf32> to vector<16x256xf32>
    %61 = arith.mulf %56, %60 : vector<16x256xf32>
    %62 = vector.broadcast %42 : vector<1x256xf32> to vector<16x256xf32>
    %63 = arith.mulf %61, %62 : vector<16x256xf32>
    %64 = vector.broadcast %43 : vector<1x256xf32> to vector<16x256xf32>
    %65 = arith.addf %63, %64 : vector<16x256xf32>
    %66 = arith.truncf %65 : vector<16x256xf32> to vector<16x256xbf16>
    %c0_31 = arith.constant 0 : index
    %c0_32 = arith.constant 0 : index
    %67 = vector.load %arg11[%c0_31, %c0_32] : memref<256x128xbf16, #tpu.memory_space<vmem>>, vector<256x128xbf16>
    %cst_33 = arith.constant dense<0.000000e+00> : vector<16x128xf32>
    %68 = tpu.matmul %66, %67, %cst_33 {dimension_numbers = #tpu.dot_dimension_numbers<[1], [0], [0], [1], [0, 0, 1, 1], [], []>} : vector<16x256xbf16>, vector<256x128xbf16>, vector<16x128xf32> -> vector<16x128xf32>
    %c0_34 = arith.constant 0 : index
    %c0_35 = arith.constant 0 : index
    %69 = vector.load %arg12[%c0_34, %c0_35] : memref<1x128xf32, #tpu.memory_space<vmem>>, vector<1x128xf32>
    %70 = vector.broadcast %69 : vector<1x128xf32> to vector<16x128xf32>
    %71 = arith.addf %68, %70 : vector<16x128xf32>
    %cst_36 = arith.constant dense<0xFF800000> : vector<16xf32>
    %72 = vector.multi_reduction <maximumf>, %71, %cst_36 [1] : vector<16x128xf32> to vector<16xf32>
    %73 = vector.shape_cast %72 : vector<16xf32> to vector<16x1xf32>
    %74 = vector.broadcast %73 : vector<16x1xf32> to vector<16x128xf32>
    %75 = arith.subf %71, %74 : vector<16x128xf32>
    %76 = math.exp %75 : vector<16x128xf32>
    %cst_37 = arith.constant dense<0.000000e+00> : vector<16xf32>
    %77 = vector.multi_reduction <add>, %76, %cst_37 [1] : vector<16x128xf32> to vector<16xf32>
    %78 = vector.shape_cast %77 : vector<16xf32> to vector<16x1xf32>
    %79 = vector.broadcast %78 : vector<16x1xf32> to vector<16x128xf32>
    %80 = arith.divf %76, %79 : vector<16x128xf32>
    %c0_38 = arith.constant 0 : index
    %c0_39 = arith.constant 0 : index
    %81 = vector.load %arg13[%c0_38, %c0_39] : memref<16x128xf32, #tpu.memory_space<vmem>>, vector<16x128xf32>
    tpu.vector_store %arg13[%c0_38, %c0_39], %80 {strides = array<i32>} : memref<16x128xf32, #tpu.memory_space<vmem>>, vector<16x128xf32>,
    return
  }
  func.func @transform_0(%arg0: i32) -> (i32, i32) {
    %c0_i32 = arith.constant 0 : i32
    %c0_i32_0 = arith.constant 0 : i32
    return %arg0, %c0_i32 : i32, i32
  }
  func.func @transform_1(%arg0: i32) -> (i32, i32) {
    %c0_i32 = arith.constant 0 : i32
    %c0_i32_0 = arith.constant 0 : i32
    return %arg0, %c0_i32 : i32, i32
  }
  func.func @transform_2(%arg0: i32) -> (i32, i32) {
    %c0_i32 = arith.constant 0 : i32
    %c0_i32_0 = arith.constant 0 : i32
    %c0_i32_1 = arith.constant 0 : i32
    return %c0_i32, %c0_i32_0 : i32, i32
  }
  func.func @transform_3(%arg0: i32) -> (i32, i32) {
    %c0_i32 = arith.constant 0 : i32
    %c0_i32_0 = arith.constant 0 : i32
    %c0_i32_1 = arith.constant 0 : i32
    return %c0_i32, %c0_i32_0 : i32, i32
  }
  func.func @transform_4(%arg0: i32) -> (i32, i32) {
    %c0_i32 = arith.constant 0 : i32
    %c0_i32_0 = arith.constant 0 : i32
    %c0_i32_1 = arith.constant 0 : i32
    return %c0_i32, %c0_i32_0 : i32, i32
  }
  func.func @transform_5(%arg0: i32) -> (i32, i32) {
    %c0_i32 = arith.constant 0 : i32
    %c0_i32_0 = arith.constant 0 : i32
    %c0_i32_1 = arith.constant 0 : i32
    return %c0_i32, %c0_i32_0 : i32, i32
  }
  func.func @transform_6(%arg0: i32) -> (i32, i32) {
    %c0_i32 = arith.constant 0 : i32
    %c0_i32_0 = arith.constant 0 : i32
    %c0_i32_1 = arith.constant 0 : i32
    return %c0_i32, %c0_i32_0 : i32, i32
  }
  func.func @transform_7(%arg0: i32) -> (i32, i32) {
    %c0_i32 = arith.constant 0 : i32
    %c0_i32_0 = arith.constant 0 : i32
    %c0_i32_1 = arith.constant 0 : i32
    return %c0_i32, %c0_i32_0 : i32, i32
  }
  func.func @transform_8(%arg0: i32) -> (i32, i32) {
    %c0_i32 = arith.constant 0 : i32
    %c0_i32_0 = arith.constant 0 : i32
    %c0_i32_1 = arith.constant 0 : i32
    return %c0_i32, %c0_i32_0 : i32, i32
  }
  func.func @transform_9(%arg0: i32) -> (i32, i32) {
    %c0_i32 = arith.constant 0 : i32
    %c0_i32_0 = arith.constant 0 : i32
    %c0_i32_1 = arith.constant 0 : i32
    return %c0_i32, %c0_i32_0 : i32, i32
  }
  func.func @transform_10(%arg0: i32) -> (i32, i32) {
    %c0_i32 = arith.constant 0 : i32
    %c0_i32_0 = arith.constant 0 : i32
    %c0_i32_1 = arith.constant 0 : i32
    return %c0_i32, %c0_i32_0 : i32, i32
  }
  func.func @transform_11(%arg0: i32) -> (i32, i32) {
    %c0_i32 = arith.constant 0 : i32
    %c0_i32_0 = arith.constant 0 : i32
    %c0_i32_1 = arith.constant 0 : i32
    return %c0_i32, %c0_i32_0 : i32, i32
  }
  func.func @transform_12(%arg0: i32) -> (i32, i32) {
    %c0_i32 = arith.constant 0 : i32
    %c0_i32_0 = arith.constant 0 : i32
    return %arg0, %c0_i32 : i32, i32
  }
}

</mosaic_0001>

<bundles_post_ra>
// kernel: feedback_forward.3
= control target key start
LH: loop header
LB: loop body
LE: loop exit
PB: predicated region body
PF: predicated region fallthrough
CT: control target
= control target key end

     0   :  { %v2399_v50 = vmov 0   ;;  %s3214_s0 = inlined_call_operand.vmem [shape: bf16[16,128], index: 0, kind: input, shape index: {}]   ;;  %s3215_s4 = inlined_call_operand.vmem [shape: bf16[128,1024], index: 4, kind: input, shape index: {}]   ;;  %s3216_s6 = inlined_call_operand.vmem [shape: bf16[1024,256], index: 6, kind: input, shape index: {}]   ;;  %s3217_s2 = inlined_call_operand.vmem [shape: f32[1,128], index: 2, kind: input, shape index: {}]   ;;  %s3218_s3 = inlined_call_operand.vmem [shape: f32[1,128], index: 3, kind: input, shape index: {}]   ;;  %s3219_s5 = inlined_call_operand.vmem [shape: f32[1,1024], index: 5, kind: input, shape index: {}]   ;;  %s3220_s7 = inlined_call_operand.vmem [shape: f32[1,256], index: 7, kind: input, shape index: {}]   ;;  %s3221_s1 = inlined_call_operand.vmem [shape: f32[16,256], index: 1, kind: input, shape index: {}]   ;;  %s3222_s10 = inlined_call_operand.vmem [shape: bf16[256,128], index: 10, kind: input, shape index: {}]   ;;  %s3223_s8 = inlined_call_operand.vmem [shape: f32[1,256], index: 8, kind: input, shape index: {}]   ;;  %s3224_s9 = inlined_call_operand.vmem [shape: f32[1,256], index: 9, kind: input, shape index: {}]   ;;  %s3225_s11 = inlined_call_operand.vmem [shape: f32[1,128], index: 11, kind: input, shape index: {}]   ;;  %s3226_s12 = inlined_call_operand.vmem [shape: f32[16,128], index: 12, kind: output, shape index: {}]  }
   0x1   :  { %v2149_v0 = vld [vmem:[%s3214_s0] sm:$0xff]   ;;  %v145_v5 = vld [vmem:[%s3215_s4 + $0x1c8] sm:$0xff]  ;;  %546 = vmatprep.mubr.bf16.mxu0 %v2399_v50  ;;  %589 = vmatprep.mubr.bf16.mxu1 %v2399_v50  ;;  %v2565_v62 = vld [vmem:[%s3215_s4 + $0x1d0] sm:$0xff] }
   0x2   :  { %v2150_v1 = vunpack.c.l.bf16 %v2149_v0  ;;  %v2151_v2 = vunpack.c.h.bf16 %v2149_v0  ;;  %v144_v3 = vld [vmem:[%s3215_s4 + $0x1c0] sm:$0xff]  ;;  %v149_v7 = vld [vmem:[%s3215_s4 + $0x1e8] sm:$0xff]  ;;  %v2570_v63 = vld [vmem:[%s3215_s4 + $0x1f0] sm:$0xff] }
   0x3   :  { %v148_v4 = vld [vmem:[%s3215_s4 + $0x1e0] sm:$0xff]  ;;  %v1998_v9 = vcombine.high %v145_v5, %v149_v7  ;;  %v1997_v10 = vcombine.low %v145_v5, %v149_v7  ;;  %v137_v21 = vld [vmem:[%s3215_s4 + $0x188] sm:$0xff] }
   0x4   :  { %48 = vadd.xlane.f32.xlu0 %v2150_v1  ;;  %v1996_v6 = vcombine.high %v144_v3, %v148_v4  ;;  %v1995_v8 = vcombine.low %v144_v3, %v148_v4  ;;  %v136_v19 = vld [vmem:[%s3215_s4 + $0x180] sm:$0xff]  ;;  %v141_v23 = vld [vmem:[%s3215_s4 + $0x1a8] sm:$0xff]  ;;  %v2582_v3 = vld [vmem:[%s3215_s4 + $0x1f8] sm:$0xff] }
   0x5   :  { %557 = vmatprep.subr.bf16.mxu1 %v1998_v9  ;;  %v140_v20 = vld [vmem:[%s3215_s4 + $0x1a0] sm:$0xff]  ;;  %v1990_v24 = vcombine.high %v137_v21, %v141_v23  ;;  %v1989_v26 = vcombine.low %v137_v21, %v141_v23  ;;  %v129_v29 = vld [vmem:[%s3215_s4 + $0x148] sm:$0xff] }
   0x6   :  { %514 = vmatprep.subr.bf16.mxu0 %v1996_v6  ;;  %558 = vmatpush1.bf16.msra.mxu1 %v1997_v10  ;;  %v1988_v22 = vcombine.high %v136_v19, %v140_v20  ;;  %v1987_v25 = vcombine.low %v136_v19, %v140_v20  ;;  %v128_v27 = vld [vmem:[%s3215_s4 + $0x140] sm:$0xff]  ;;  %v133_v31 = vld [vmem:[%s3215_s4 + $0x168] sm:$0xff]  ;;  %v2000_v20 = vcombine.high %v2565_v62, %v2570_v63 }
   0x7   :  { %515 = vmatpush1.bf16.msra.mxu0 %v1995_v8  ;;  %559 = vmatprep.subr.bf16.mxu1 %v1990_v24  ;;  %v132_v28 = vld [vmem:[%s3215_s4 + $0x160] sm:$0xff]  ;;  %v1982_v32 = vcombine.high %v129_v29, %v133_v31  ;;  %v1981_v34 = vcombine.low %v129_v29, %v133_v31  ;;  %v121_v37 = vld [vmem:[%s3215_s4 + $0x108] sm:$0xff] }
   0x8   :  { %50 = vadd.xlane.f32.xlu0 %v2151_v2  ;;  %516 = vmatprep.subr.bf16.mxu0 %v1988_v22  ;;  %v1980_v30 = vcombine.high %v128_v27, %v132_v28  ;;  %v1979_v33 = vcombine.low %v128_v27, %v132_v28  ;;  %v120_v35 = vld [vmem:[%s3215_s4 + $0x100] sm:$0xff]  ;;  %v125_v39 = vld [vmem:[%s3215_s4 + $0x128] sm:$0xff] }
   0x9   :  { %v124_v36 = vld [vmem:[%s3215_s4 + $0x120] sm:$0xff]  ;;  %v1974_v40 = vcombine.high %v121_v37, %v125_v39  ;;  %v1973_v42 = vcombine.low %v121_v37, %v125_v39  ;;  %v113_v45 = vld [vmem:[%s3215_s4 + $0xc8] sm:$0xff]  ;;  %v139_v37 = vld [vmem:[%s3215_s4 + $0x198] sm:$0xff] }
   0xa   :  { %560 = vmatpush1.bf16.msra.mxu1 %v1989_v26  ;;  %v1972_v38 = vcombine.high %v120_v35, %v124_v36  ;;  %v1971_v41 = vcombine.low %v120_v35, %v124_v36  ;;  %v112_v43 = vld [vmem:[%s3215_s4 + $0xc0] sm:$0xff]  ;;  %v117_v47 = vld [vmem:[%s3215_s4 + $0xe8] sm:$0xff]  ;;  %v138_v36 = vld [vmem:[%s3215_s4 + $0x190] sm:$0xff] }
   0xb   :  { %517 = vmatpush1.bf16.msra.mxu0 %v1987_v25  ;;  %561 = vmatprep.subr.bf16.mxu1 %v1982_v32  ;;  %v116_v44 = vld [vmem:[%s3215_s4 + $0xe0] sm:$0xff]  ;;  %v1966_v51 = vcombine.high %v113_v45, %v117_v47  ;;  %v105_v53 = vld [vmem:[%s3215_s4 + $0x88] sm:$0xff]  ;;  %v1965_v55 = vcombine.low %v113_v45, %v117_v47  ;;  %v131_v45 = vld [vmem:[%s3215_s4 + $0x158] sm:$0xff] }
   0xc   :  { %518 = vmatprep.subr.bf16.mxu0 %v1980_v30  ;;  %v1964_v46 = vcombine.high %v112_v43, %v116_v44  ;;  %v104_v48 = vld [vmem:[%s3215_s4 + $0x80] sm:$0xff]  ;;  %v1963_v52 = vcombine.low %v112_v43, %v116_v44  ;;  %v109_v54 = vld [vmem:[%s3215_s4 + $0xa8] sm:$0xff]  ;;  %v130_v43 = vld [vmem:[%s3215_s4 + $0x150] sm:$0xff] }
   0xd   :  { %v108_v49 = vld [vmem:[%s3215_s4 + $0xa0] sm:$0xff]  ;;  %v1958_v57 = vcombine.high %v105_v53, %v109_v54  ;;  %v97_v60 = vld [vmem:[%s3215_s4 + $0x48] sm:$0xff]  ;;  %v1957_v4 = vcombine.low %v105_v53, %v109_v54  ;;  %v134_v44 = vld [vmem:[%s3215_s4 + $0x170] sm:$0xff] }
   0xe   :  { %562 = vmatpush1.bf16.msra.mxu1 %v1981_v34  ;;  %v1956_v56 = vcombine.high %v104_v48, %v108_v49  ;;  %v96_v58 = vld [vmem:[%s3215_s4 + $0x40] sm:$0xff]  ;;  %v101_v61 = vld [vmem:[%s3215_s4 + $0x68] sm:$0xff]  ;;  %v1955_v0 = vcombine.low %v104_v48, %v108_v49  ;;  %v1984_v49 = vcombine.high %v130_v43, %v134_v44  ;;  %v126_v53 = vld [vmem:[%s3215_s4 + $0x130] sm:$0xff] }
   0xf   :  { %519 = vmatpush1.bf16.msra.mxu0 %v1979_v33  ;;  %563 = vmatprep.subr.bf16.mxu1 %v1974_v40  ;;  %v100_v59 = vld [vmem:[%s3215_s4 + $0x60] sm:$0xff]  ;;  %v1950_v7 = vcombine.high %v97_v60, %v101_v61  ;;  %v89_v10 = vld [vmem:[%s3215_s4 + $0x8] sm:$0xff]  ;;  %v123_v54 = vld [vmem:[%s3215_s4 + $0x118] sm:$0xff] }
  0x10   :  { %520 = vmatprep.subr.bf16.mxu0 %v1972_v38  ;;  %v1948_v5 = vcombine.high %v96_v58, %v100_v59  ;;  %v88_v8 = vld [vmem:[%s3215_s4] sm:$0xff] }
  0x11   :  { %v92_v9 = vld [vmem:[%s3215_s4 + $0x20] sm:$0xff] }
  0x12   :  { %564 = vmatpush1.bf16.msra.mxu1 %v1973_v42  ;;  %v1937_v30 = vld [vmem:[%s3217_s2] ss:$0 sm:$0xff] }
  0x13   :  { %521 = vmatpush1.bf16.msra.mxu0 %v1971_v41  ;;  %565 = vmatprep.subr.bf16.mxu1 %v1966_v51  ;;  %v1938_v34 = vld [vmem:[%s3218_s3] ss:$0 sm:$0xff] }
  0x14   :  { %522 = vmatprep.subr.bf16.mxu0 %v1964_v46  ;;  %v135_v46 = vld [vmem:[%s3215_s4 + $0x178] sm:$0xff] }
  0x15   :  { %v1986_v51 = vcombine.high %v131_v45, %v135_v46 }
  0x16   :  { %566 = vmatpush1.bf16.msra.mxu1 %v1965_v55  ;;  %v127_v55 = vld [vmem:[%s3215_s4 + $0x138] sm:$0xff] }
  0x17   :  { %523 = vmatpush1.bf16.msra.mxu0 %v1963_v52  ;;  %567 = vmatprep.subr.bf16.mxu1 %v1958_v57  ;;  %v122_v52 = vld [vmem:[%s3215_s4 + $0x110] sm:$0xff]  ;;  %v1985_v57 = vcombine.low %v131_v45, %v135_v46 }
  0x18   :  { %524 = vmatprep.subr.bf16.mxu0 %v1956_v56  ;;  %v1983_v56 = vcombine.low %v130_v43, %v134_v44  ;;  %v2193_v43 = vld [vmem:[%s3216_s6 + $0x40] ss:$8 sps:$4 sm:$0xff]   ;;  %v2201_v45 = vld [vmem:[%s3216_s6 + $0x34] ss:$8 sps:$4 sm:$0xff]  }
  0x19   :  { %v2196_v44 = vld [vmem:[%s3216_s6 + $0x140] ss:$8 sps:$4 sm:$0xff]   ;;  %v2204_v46 = vld [vmem:[%s3216_s6 + $0x134] ss:$8 sps:$4 sm:$0xff]  }
  0x1a   :  { %568 = vmatpush1.bf16.msra.mxu1 %v1957_v4  ;;  %v110_v4 = vld [vmem:[%s3215_s4 + $0xb0] sm:$0xff] }
  0x1b   :  { %525 = vmatpush1.bf16.msra.mxu0 %v1955_v0  ;;  %569 = vmatprep.subr.bf16.mxu1 %v1950_v7  ;;  %v1977_v0 = vcombine.low %v123_v54, %v127_v55 }
  0x1c   :  { %526 = vmatprep.subr.bf16.mxu0 %v1948_v5  ;;  %v107_v5 = vld [vmem:[%s3215_s4 + $0x98] sm:$0xff] }
  0x8d   :  { %v49_v11 = vpop.xlane.xlu0 %48 }
  0x8e   :  { %v53_v12 = vmul.f32 0.0078125, %v49_v11  ;;  %v93_v11 = vld [vmem:[%s3215_s4 + $0x28] sm:$0xff] }
  0x8f   :  { %v1941_v19 = vcombine.low %v89_v10, %v93_v11 }
  0x90   :  { %v2480_v13 = vsub.f32 %v2150_v1, %v53_v12  ;;  %v1999_v1 = vcombine.low %v2565_v62, %v2570_v63  ;;  %v1947_v12 = vcombine.low %v96_v58, %v100_v59  ;;  %v1976_v58 = vcombine.high %v122_v52, %v126_v53  ;;  %v119_v62 = vld [vmem:[%s3215_s4 + $0xf8] sm:$0xff] }
  0x91   :  { %v51_v14 = vpop.xlane.xlu0 %50  ;;  %v1978_v59 = vcombine.high %v123_v54, %v127_v55  ;;  %v1975_v63 = vcombine.low %v122_v52, %v126_v53  ;;  %v2205_v52 = vld [vmem:[%s3216_s6 + $0x20] ss:$8 sps:$4 sm:$0xff]   ;;  %v2213_v54 = vld [vmem:[%s3216_s6 + $0x14] ss:$8 sps:$4 sm:$0xff]  }
  0x92   :  { %v54_v15 = vmul.f32 0.0078125, %v51_v14  ;;  %v57_v16 = vmul.f32 %v2480_v13, %v2480_v13  ;;  %v1949_v14 = vcombine.low %v97_v60, %v101_v61  ;;  %527 = vmatpush1.bf16.msra.mxu0 %v1947_v12  ;;  %v114_v60 = vld [vmem:[%s3215_s4 + $0xd0] sm:$0xff]  ;;  %v2208_v53 = vld [vmem:[%s3216_s6 + $0x120] ss:$8 sps:$4 sm:$0xff]  }
  0x93   :  { %v118_v61 = vld [vmem:[%s3215_s4 + $0xf0] sm:$0xff] }
  0x94   :  { %v2484_v17 = vsub.f32 %v2151_v2, %v54_v15  ;;  %59 = vadd.xlane.f32.xlu1 %v57_v16  ;;  %v2577_v2 = vld [vmem:[%s3215_s4 + $0x1d8] sm:$0xff]  ;;  %v1940_v15 = vcombine.high %v88_v8, %v92_v9  ;;  %v1942_v16 = vcombine.high %v89_v10, %v93_v11  ;;  %570 = vmatpush1.bf16.msra.mxu1 %v1949_v14  ;;  %v98_v11 = vld [vmem:[%s3215_s4 + $0x50] sm:$0xff] }
  0x95   :  { %v2001_v6 = vcombine.low %v2577_v2, %v2582_v3  ;;  %v2002_v21 = vcombine.high %v2577_v2, %v2582_v3  ;;  %v106_v3 = vld [vmem:[%s3215_s4 + $0x90] sm:$0xff]  ;;  %v1967_v7 = vcombine.low %v114_v60, %v118_v61  ;;  %v99_v14 = vld [vmem:[%s3215_s4 + $0x58] sm:$0xff] }
  0x96   :  { %v58_v18 = vmul.f32 %v2484_v17, %v2484_v17  ;;  %528 = vmatprep.subr.bf16.mxu0 %v1940_v15  ;;  %571 = vmatprep.subr.bf16.mxu1 %v1942_v16  ;;  %v102_v12 = vld [vmem:[%s3215_s4 + $0x70] sm:$0xff]  ;;  %v103_v15 = vld [vmem:[%s3215_s4 + $0x78] sm:$0xff]  ;;  %v1959_v16 = vcombine.low %v106_v3, %v110_v4 }
  0x97   :  { %v2216_v55 = vld [vmem:[%s3216_s6 + $0x114] ss:$8 sps:$4 sm:$0xff]  }
  0x98   :  { %61 = vadd.xlane.f32.xlu1 %v58_v18  ;;  %v1939_v18 = vcombine.low %v88_v8, %v92_v9  ;;  %572 = vmatpush1.bf16.msra.mxu1 %v1941_v19  ;;  %v1960_v9 = vcombine.high %v106_v3, %v110_v4  ;;  %v1952_v19 = vcombine.high %v98_v11, %v102_v12  ;;  %v2229_v3 = vld [vmem:[%s3216_s6 + $0xe0] ss:$8 sps:$4 sm:$0xff]  }
  0x99   :  { %643 = vmatprep.subr.bf16.mxu1 %v2002_v21  ;;  %v90_v21 = vld [vmem:[%s3215_s4 + $0x10] sm:$0xff]  ;;  %v2232_v4 = vld [vmem:[%s3216_s6 + $0x1e0] ss:$8 sps:$4 sm:$0xff]  }
  0x9a   :  { %529 = vmatpush1.bf16.msra.mxu0 %v1939_v18 }
  0x9b   :  { %600 = vmatprep.subr.bf16.mxu0 %v2000_v20  ;;  %v1954_v20 = vcombine.high %v99_v14, %v103_v15 }
 0x11d   :  { %v60_v22 = vpop.xlane.xlu1 %59 }
 0x11e   :  { %v63_v23 = vmul.f32 0.0078125, %v60_v22  ;;  %v94_v22 = vld [vmem:[%s3215_s4 + $0x30] sm:$0xff] }
 0x120   :  { %v65_v24 = vadd.f32 1e-05, %v63_v23  ;;  %v91_v23 = vld [vmem:[%s3215_s4 + $0x18] sm:$0xff] }
 0x121   :  { %v62_v25 = vpop.xlane.xlu1 %61 }
 0x122   :  { %2383 = vrsqrt.f32 %v65_v24  ;;  %v64_v26 = vmul.f32 0.0078125, %v62_v25  ;;  %v95_v24 = vld [vmem:[%s3215_s4 + $0x38] sm:$0xff]  ;;  %v1951_v25 = vcombine.low %v98_v11, %v102_v12  ;;  %v2241_v11 = vld [vmem:[%s3216_s6 + $0xc0] ss:$8 sps:$4 sm:$0xff]  }
 0x123   :  { %v2244_v12 = vld [vmem:[%s3216_s6 + $0x1c0] ss:$8 sps:$4 sm:$0xff]  }
 0x124   :  { %v66_v27 = vadd.f32 1e-05, %v64_v26  ;;  %v1953_v26 = vcombine.low %v99_v14, %v103_v15  ;;  %v2249_v14 = vld [vmem:[%s3216_s6 + $0xb4] ss:$8 sps:$4 sm:$0xff]  }
 0x125   :  { %v2252_v15 = vld [vmem:[%s3216_s6 + $0x1b4] ss:$8 sps:$4 sm:$0xff]  }
 0x126   :  { %2385 = vrsqrt.f32 %v66_v27  ;;  %v1944_v27 = vcombine.high %v90_v21, %v94_v22 }
 0x12f   :  { %v2384_v28 = vpop.eup %2383 }
 0x130   :  { %v69_v29 = vmul.f32 %v2384_v28, %v2480_v13  ;;  %v142_v13 = vld [vmem:[%s3215_s4 + $0x1b0] sm:$0xff]  ;;  %v1946_v28 = vcombine.high %v91_v23, %v95_v24 }
 0x131   :  { %v1992_v41 = vcombine.high %v138_v36, %v142_v13  ;;  %v1991_v47 = vcombine.low %v138_v36, %v142_v13  ;;  %v2186_v36 = vld [vmem:[%s3216_s6 + $0x164] ss:$8 sps:$4 sm:$0xff]   ;;  %v2181_v13 = vld [vmem:[%s3216_s6 + $0x60] ss:$8 sps:$4 sm:$0xff]  }
 0x132   :  { %v77_v33 = vmul.f32 %v1937_v30, %v69_v29  ;;  %v1943_v29 = vcombine.low %v90_v21, %v94_v22  ;;  %v2253_v21 = vld [vmem:[%s3216_s6 + $0xa0] ss:$8 sps:$4 sm:$0xff]  }
 0x133   :  { %v2386_v31 = vpop.eup %2385  ;;  %v2256_v22 = vld [vmem:[%s3216_s6 + $0x1a0] ss:$8 sps:$4 sm:$0xff]  }
 0x134   :  { %v70_v32 = vmul.f32 %v2386_v31, %v2484_v17  ;;  %v143_v17 = vld [vmem:[%s3215_s4 + $0x1b8] sm:$0xff]  ;;  %v85_v38 = vadd.f32 %v1938_v34, %v77_v33 }
 0x135   :  { %v1994_v42 = vcombine.high %v139_v37, %v143_v17  ;;  %v1993_v48 = vcombine.low %v139_v37, %v143_v17  ;;  %v2177_v31 = vld [vmem:[%s3216_s6 + $0x74] ss:$8 sps:$4 sm:$0xff]   ;;  %v2175_v33 = vld [vmem:[%s3216_s6 + $0x70] ss:$8 sps:$4 sm:$0xff]   ;;  %v2184_v37 = vld [vmem:[%s3216_s6 + $0x160] ss:$8 sps:$4 sm:$0xff]  }
 0x136   :  { %v78_v35 = vmul.f32 %v1937_v30, %v70_v32  ;;  %v1945_v30 = vcombine.low %v91_v23, %v95_v24  ;;  %v2180_v32 = vld [vmem:[%s3216_s6 + $0x174] ss:$8 sps:$4 sm:$0xff]  }
 0x137   :  { %v2189_v17 = vld [vmem:[%s3216_s6 + $0x54] ss:$8 sps:$4 sm:$0xff]  }
 0x138   :  { %v86_v39 = vadd.f32 %v1938_v34, %v78_v35  ;;  %v2178_v34 = vld [vmem:[%s3216_s6 + $0x170] ss:$8 sps:$4 sm:$0xff]   ;;  %v2183_v35 = vld [vmem:[%s3216_s6 + $0x64] ss:$8 sps:$4 sm:$0xff]   ;;  %v2261_v23 = vld [vmem:[%s3216_s6 + $0x94] ss:$8 sps:$4 sm:$0xff]  }
 0x139   :  { %v2264_v24 = vld [vmem:[%s3216_s6 + $0x194] ss:$8 sps:$4 sm:$0xff]  }
 0x13a   :  { %v2622_v40 = vpack.c.bf16 %v86_v39, %v85_v38  ;;  %v2192_v38 = vld [vmem:[%s3216_s6 + $0x154] ss:$8 sps:$4 sm:$0xff]   ;;  %v2187_v39 = vld [vmem:[%s3216_s6 + $0x50] ss:$8 sps:$4 sm:$0xff]  }
 0x13c   :  { %547 = vmatmul.mubr.bf16.vlgmr.msra.gmra.mxu0 %v2622_v40  ;;  %590 = vmatmul.mubr.bf16.vlgmr.msra.gmra.mxu1 %v2622_v40 }
 0x13d   :  { %601 = vmatpush1.bf16.msra.mxu0 %v1999_v1  ;;  %644 = vmatpush1.bf16.msra.mxu1 %v2001_v6  ;;  %v1968_v1 = vcombine.high %v114_v60, %v118_v61  ;;  %v111_v6 = vld [vmem:[%s3215_s4 + $0xb8] sm:$0xff]  ;;  %v2217_v60 = vld [vmem:[%s3216_s6] ss:$8 sps:$4 sm:$0xff]  }
 0x13e   :  { %602 = vmatprep.subr.bf16.mxu0 %v1992_v41  ;;  %645 = vmatprep.subr.bf16.mxu1 %v1994_v42  ;;  %v1962_v10 = vcombine.high %v107_v5, %v111_v6  ;;  %v1961_v18 = vcombine.low %v107_v5, %v111_v6  ;;  %v2195_v41 = vld [vmem:[%s3216_s6 + $0x44] ss:$8 sps:$4 sm:$0xff]   ;;  %v2220_v61 = vld [vmem:[%s3216_s6 + $0x100] ss:$8 sps:$4 sm:$0xff]   ;;  %v2237_v5 = vld [vmem:[%s3216_s6 + $0xd4] ss:$8 sps:$4 sm:$0xff]  }
 0x13f   :  { %632 = vmatprep.mubr.bf16.mxu0 %v2399_v50  ;;  %675 = vmatprep.mubr.bf16.mxu1 %v2399_v50  ;;  %v115_v50 = vld [vmem:[%s3215_s4 + $0xd8] sm:$0xff]  ;;  %v2198_v42 = vld [vmem:[%s3216_s6 + $0x144] ss:$8 sps:$4 sm:$0xff]  }
 0x140   :  { %v1970_v2 = vcombine.high %v115_v50, %v119_v62  ;;  %v1969_v8 = vcombine.low %v115_v50, %v119_v62  ;;  %v2225_v50 = vld [vmem:[%s3216_s6 + $0xf4] ss:$8 sps:$4 sm:$0xff]  }
 0x141   :  { %603 = vmatpush1.bf16.msra.mxu0 %v1991_v47  ;;  %646 = vmatpush1.bf16.msra.mxu1 %v1993_v48  ;;  %v2199_v47 = vld [vmem:[%s3216_s6 + $0x30] ss:$8 sps:$4 sm:$0xff]   ;;  %v2228_v62 = vld [vmem:[%s3216_s6 + $0x1f4] ss:$8 sps:$4 sm:$0xff]  }
 0x142   :  { %604 = vmatprep.subr.bf16.mxu0 %v1984_v49  ;;  %647 = vmatprep.subr.bf16.mxu1 %v1986_v51  ;;  %v2202_v48 = vld [vmem:[%s3216_s6 + $0x130] ss:$8 sps:$4 sm:$0xff]   ;;  %v2207_v49 = vld [vmem:[%s3216_s6 + $0x24] ss:$8 sps:$4 sm:$0xff]   ;;  %v2240_v6 = vld [vmem:[%s3216_s6 + $0x1d4] ss:$8 sps:$4 sm:$0xff]  }
 0x143   :  { %v2210_v51 = vld [vmem:[%s3216_s6 + $0x124] ss:$8 sps:$4 sm:$0xff]  }
 0x145   :  { %605 = vmatpush1.bf16.msra.mxu0 %v1983_v56  ;;  %648 = vmatpush1.bf16.msra.mxu1 %v1985_v57  ;;  %v2211_v56 = vld [vmem:[%s3216_s6 + $0x10] ss:$8 sps:$4 sm:$0xff]  }
 0x146   :  { %606 = vmatprep.subr.bf16.mxu0 %v1976_v58  ;;  %649 = vmatprep.subr.bf16.mxu1 %v1978_v59  ;;  %v2214_v57 = vld [vmem:[%s3216_s6 + $0x110] ss:$8 sps:$4 sm:$0xff]   ;;  %v2219_v58 = vld [vmem:[%s3216_s6 + $0x4] ss:$8 sps:$4 sm:$0xff]  }
 0x147   :  { %v2222_v59 = vld [vmem:[%s3216_s6 + $0x104] ss:$8 sps:$4 sm:$0xff]  }
 0x149   :  { %607 = vmatpush1.bf16.msra.mxu0 %v1975_v63  ;;  %650 = vmatpush1.bf16.msra.mxu1 %v1977_v0  ;;  %v2223_v63 = vld [vmem:[%s3216_s6 + $0xf0] ss:$8 sps:$4 sm:$0xff]  }
 0x14a   :  { %608 = vmatprep.subr.bf16.mxu0 %v1968_v1  ;;  %651 = vmatprep.subr.bf16.mxu1 %v1970_v2  ;;  %v2226_v0 = vld [vmem:[%s3216_s6 + $0x1f0] ss:$8 sps:$4 sm:$0xff]   ;;  %v2231_v1 = vld [vmem:[%s3216_s6 + $0xe4] ss:$8 sps:$4 sm:$0xff]  }
 0x14b   :  { %v2234_v2 = vld [vmem:[%s3216_s6 + $0x1e4] ss:$8 sps:$4 sm:$0xff]  }
 0x14d   :  { %609 = vmatpush1.bf16.msra.mxu0 %v1967_v7  ;;  %652 = vmatpush1.bf16.msra.mxu1 %v1969_v8  ;;  %v2235_v7 = vld [vmem:[%s3216_s6 + $0xd0] ss:$8 sps:$4 sm:$0xff]  }
 0x14e   :  { %610 = vmatprep.subr.bf16.mxu0 %v1960_v9  ;;  %653 = vmatprep.subr.bf16.mxu1 %v1962_v10  ;;  %v2238_v8 = vld [vmem:[%s3216_s6 + $0x1d0] ss:$8 sps:$4 sm:$0xff]   ;;  %v2243_v9 = vld [vmem:[%s3216_s6 + $0xc4] ss:$8 sps:$4 sm:$0xff]  }
 0x14f   :  { %v2246_v10 = vld [vmem:[%s3216_s6 + $0x1c4] ss:$8 sps:$4 sm:$0xff]  }
 0x151   :  { %611 = vmatpush1.bf16.msra.mxu0 %v1959_v16  ;;  %654 = vmatpush1.bf16.msra.mxu1 %v1961_v18  ;;  %v2247_v16 = vld [vmem:[%s3216_s6 + $0xb0] ss:$8 sps:$4 sm:$0xff]  }
 0x152   :  { %612 = vmatprep.subr.bf16.mxu0 %v1952_v19  ;;  %655 = vmatprep.subr.bf16.mxu1 %v1954_v20  ;;  %v2250_v18 = vld [vmem:[%s3216_s6 + $0x1b0] ss:$8 sps:$4 sm:$0xff]   ;;  %v2255_v19 = vld [vmem:[%s3216_s6 + $0xa4] ss:$8 sps:$4 sm:$0xff]  }
 0x153   :  { %v2258_v20 = vld [vmem:[%s3216_s6 + $0x1a4] ss:$8 sps:$4 sm:$0xff]  }
 0x155   :  { %613 = vmatpush1.bf16.msra.mxu0 %v1951_v25  ;;  %656 = vmatpush1.bf16.msra.mxu1 %v1953_v26  ;;  %v2259_v25 = vld [vmem:[%s3216_s6 + $0x90] ss:$8 sps:$4 sm:$0xff]  }
 0x156   :  { %614 = vmatprep.subr.bf16.mxu0 %v1944_v27  ;;  %657 = vmatprep.subr.bf16.mxu1 %v1946_v28  ;;  %v2262_v26 = vld [vmem:[%s3216_s6 + $0x190] ss:$8 sps:$4 sm:$0xff]   ;;  %v2267_v27 = vld [vmem:[%s3216_s6 + $0x84] ss:$8 sps:$4 sm:$0xff]  }
 0x157   :  { %v2270_v28 = vld [vmem:[%s3216_s6 + $0x184] ss:$8 sps:$4 sm:$0xff]  }
 0x159   :  { %615 = vmatpush1.bf16.msra.mxu0 %v1943_v29  ;;  %658 = vmatpush1.bf16.msra.mxu1 %v1945_v30  ;;  %v2265_v29 = vld [vmem:[%s3216_s6 + $0x80] ss:$8 sps:$4 sm:$0xff]  }
 0x15a   :  { %1490 = vmatprep.subr.bf16.mxu0 %v2177_v31  ;;  %1533 = vmatprep.subr.bf16.mxu1 %v2180_v32  ;;  %v2268_v30 = vld [vmem:[%s3216_s6 + $0x180] ss:$8 sps:$4 sm:$0xff]   ;;  %v2273_v31 = vld [vmem:[%s3216_s6 + $0x274] ss:$8 sps:$4 sm:$0xff]  }
 0x15b   :  { %v2276_v32 = vld [vmem:[%s3216_s6 + $0x374] ss:$8 sps:$4 sm:$0xff]  }
 0x15c   :  { %633 = vmatmul.mubr.bf16.vlgmr.msra.gmra.mxu0 %v2622_v40  ;;  %676 = vmatmul.mubr.bf16.vlgmr.msra.gmra.mxu1 %v2622_v40  ;;  %v2190_v40 = vld [vmem:[%s3216_s6 + $0x150] ss:$8 sps:$4 sm:$0xff]  }
 0x15d   :  { %1491 = vmatpush1.bf16.msra.mxu0 %v2175_v33  ;;  %1534 = vmatpush1.bf16.msra.mxu1 %v2178_v34  ;;  %v154_v33 = vlaneseq }
 0x15e   :  { %1492 = vmatprep.subr.bf16.mxu0 %v2183_v35  ;;  %1535 = vmatprep.subr.bf16.mxu1 %v2186_v36 }
 0x15f   :  { %v2903_v34 = vshrl.u32 %v154_v33, 7 }
 0x161   :  { %1493 = vmatpush1.bf16.msra.mxu0 %v2181_v13  ;;  %1536 = vmatpush1.bf16.msra.mxu1 %v2184_v37  ;;  %v2906_v35 = vsub.s32 1, %v2903_v34  ;;  %v168_v36 = vsub.s32 3, %v2903_v34  ;;  %v2910_v13 = vsub.s32 0, %v2903_v34  ;;  %v164_v37 = vsub.s32 2, %v2903_v34 }
 0x162   :  { %1494 = vmatprep.subr.bf16.mxu0 %v2189_v17  ;;  %1537 = vmatprep.subr.bf16.mxu1 %v2192_v38  ;;  %v2916_v17 = vld [vmem:[%s3219_s5] sm:$0xff] }
 0x165   :  { %1495 = vmatpush1.bf16.msra.mxu0 %v2187_v39  ;;  %1538 = vmatpush1.bf16.msra.mxu1 %v2190_v40  ;;  %v161_v40 = vrot.slane %v2916_v17, %v2906_v35 }
 0x166   :  { %1496 = vmatprep.subr.bf16.mxu0 %v2195_v41  ;;  %1539 = vmatprep.subr.bf16.mxu1 %v2198_v42  ;;  %v169_v41 = vrot.slane %v2916_v17, %v168_v36  ;;  %v157_v42 = vrot.slane %v2916_v17, %v2910_v13  ;;  %v2309_v36 = vld [vmem:[%s3216_s6 + $0x214] ss:$8 sps:$4 sm:$0xff]  }
 0x169   :  { %1497 = vmatpush1.bf16.msra.mxu0 %v2193_v43  ;;  %1540 = vmatpush1.bf16.msra.mxu1 %v2196_v44  ;;  %v165_v43 = vrot.slane %v2916_v17, %v164_v37  ;;  %v2312_v37 = vld [vmem:[%s3216_s6 + $0x314] ss:$8 sps:$4 sm:$0xff]  }
 0x16a   :  { %1498 = vmatprep.subr.bf16.mxu0 %v2201_v45  ;;  %1541 = vmatprep.subr.bf16.mxu1 %v2204_v46 }
 0x16d   :  { %1499 = vmatpush1.bf16.msra.mxu0 %v2199_v47  ;;  %1542 = vmatpush1.bf16.msra.mxu1 %v2202_v48 }
 0x16e   :  { %1500 = vmatprep.subr.bf16.mxu0 %v2207_v49  ;;  %1543 = vmatprep.subr.bf16.mxu1 %v2210_v51 }
 0x171   :  { %1501 = vmatpush1.bf16.msra.mxu0 %v2205_v52  ;;  %1544 = vmatpush1.bf16.msra.mxu1 %v2208_v53 }
 0x172   :  { %1502 = vmatprep.subr.bf16.mxu0 %v2213_v54  ;;  %1545 = vmatprep.subr.bf16.mxu1 %v2216_v55 }
 0x175   :  { %1503 = vmatpush1.bf16.msra.mxu0 %v2211_v56  ;;  %1546 = vmatpush1.bf16.msra.mxu1 %v2214_v57 }
 0x176   :  { %1504 = vmatprep.subr.bf16.mxu0 %v2219_v58  ;;  %1547 = vmatprep.subr.bf16.mxu1 %v2222_v59 }
 0x179   :  { %1505 = vmatpush1.bf16.msra.mxu0 %v2217_v60  ;;  %1548 = vmatpush1.bf16.msra.mxu1 %v2220_v61 }
 0x17a   :  { %1506 = vmatprep.subr.bf16.mxu0 %v2225_v50  ;;  %1549 = vmatprep.subr.bf16.mxu1 %v2228_v62 }
 0x17d   :  { %1507 = vmatpush2.bf16.msra.mxu0 %v2223_v63  ;;  %1550 = vmatpush2.bf16.msra.mxu1 %v2226_v0 }
 0x17e   :  { %1508 = vmatprep.subr.bf16.mxu0 %v2231_v1  ;;  %1551 = vmatprep.subr.bf16.mxu1 %v2234_v2 }
 0x181   :  { %1509 = vmatpush2.bf16.msra.mxu0 %v2229_v3  ;;  %1552 = vmatpush2.bf16.msra.mxu1 %v2232_v4  ;;  %v2271_v4 = vld [vmem:[%s3216_s6 + $0x270] ss:$8 sps:$4 sm:$0xff]  }
 0x182   :  { %1510 = vmatprep.subr.bf16.mxu0 %v2237_v5  ;;  %1553 = vmatprep.subr.bf16.mxu1 %v2240_v6  ;;  %v2274_v5 = vld [vmem:[%s3216_s6 + $0x370] ss:$8 sps:$4 sm:$0xff]  }
 0x185   :  { %1511 = vmatpush2.bf16.msra.mxu0 %v2235_v7  ;;  %1554 = vmatpush2.bf16.msra.mxu1 %v2238_v8  ;;  %v2279_v8 = vld [vmem:[%s3216_s6 + $0x264] ss:$8 sps:$4 sm:$0xff]  }
 0x186   :  { %1512 = vmatprep.subr.bf16.mxu0 %v2243_v9  ;;  %1555 = vmatprep.subr.bf16.mxu1 %v2246_v10  ;;  %v2282_v9 = vld [vmem:[%s3216_s6 + $0x364] ss:$8 sps:$4 sm:$0xff]   ;;  %v2277_v10 = vld [vmem:[%s3216_s6 + $0x260] ss:$8 sps:$4 sm:$0xff]  }
 0x189   :  { %1513 = vmatpush2.bf16.msra.mxu0 %v2241_v11  ;;  %1556 = vmatpush2.bf16.msra.mxu1 %v2244_v12  ;;  %v2280_v11 = vld [vmem:[%s3216_s6 + $0x360] ss:$8 sps:$4 sm:$0xff]   ;;  %v2285_v12 = vld [vmem:[%s3216_s6 + $0x254] ss:$8 sps:$4 sm:$0xff]  }
 0x18a   :  { %1514 = vmatprep.subr.bf16.mxu0 %v2249_v14  ;;  %1557 = vmatprep.subr.bf16.mxu1 %v2252_v15  ;;  %v2288_v14 = vld [vmem:[%s3216_s6 + $0x354] ss:$8 sps:$4 sm:$0xff]   ;;  %v2283_v15 = vld [vmem:[%s3216_s6 + $0x250] ss:$8 sps:$4 sm:$0xff]  }
 0x18d   :  { %1515 = vmatpush2.bf16.msra.mxu0 %v2247_v16  ;;  %1558 = vmatpush2.bf16.msra.mxu1 %v2250_v18  ;;  %v2286_v16 = vld [vmem:[%s3216_s6 + $0x350] ss:$8 sps:$4 sm:$0xff]   ;;  %v2291_v18 = vld [vmem:[%s3216_s6 + $0x244] ss:$8 sps:$4 sm:$0xff]  }
 0x18e   :  { %1516 = vmatprep.subr.bf16.mxu0 %v2255_v19  ;;  %1559 = vmatprep.subr.bf16.mxu1 %v2258_v20  ;;  %v2294_v19 = vld [vmem:[%s3216_s6 + $0x344] ss:$8 sps:$4 sm:$0xff]   ;;  %v2289_v20 = vld [vmem:[%s3216_s6 + $0x240] ss:$8 sps:$4 sm:$0xff]  }
 0x191   :  { %1517 = vmatpush2.bf16.msra.mxu0 %v2253_v21  ;;  %1560 = vmatpush2.bf16.msra.mxu1 %v2256_v22  ;;  %v2292_v21 = vld [vmem:[%s3216_s6 + $0x340] ss:$8 sps:$4 sm:$0xff]   ;;  %v2297_v22 = vld [vmem:[%s3216_s6 + $0x234] ss:$8 sps:$4 sm:$0xff]  }
 0x192   :  { %1518 = vmatprep.subr.bf16.mxu0 %v2261_v23  ;;  %1561 = vmatprep.subr.bf16.mxu1 %v2264_v24  ;;  %v2300_v23 = vld [vmem:[%s3216_s6 + $0x334] ss:$8 sps:$4 sm:$0xff]   ;;  %v2295_v24 = vld [vmem:[%s3216_s6 + $0x230] ss:$8 sps:$4 sm:$0xff]  }
 0x195   :  { %1519 = vmatpush2.bf16.msra.mxu0 %v2259_v25  ;;  %1562 = vmatpush2.bf16.msra.mxu1 %v2262_v26  ;;  %v2298_v25 = vld [vmem:[%s3216_s6 + $0x330] ss:$8 sps:$4 sm:$0xff]   ;;  %v2303_v26 = vld [vmem:[%s3216_s6 + $0x224] ss:$8 sps:$4 sm:$0xff]  }
 0x196   :  { %1520 = vmatprep.subr.bf16.mxu0 %v2267_v27  ;;  %1563 = vmatprep.subr.bf16.mxu1 %v2270_v28  ;;  %v2306_v27 = vld [vmem:[%s3216_s6 + $0x324] ss:$8 sps:$4 sm:$0xff]   ;;  %v176_v28 = vsub.s32 5, %v2903_v34 }
 0x199   :  { %1521 = vmatpush2.bf16.msra.mxu0 %v2265_v29  ;;  %1564 = vmatpush2.bf16.msra.mxu1 %v2268_v30  ;;  %v184_v29 = vsub.s32 7, %v2903_v34  ;;  %v2301_v30 = vld [vmem:[%s3216_s6 + $0x220] ss:$8 sps:$4 sm:$0xff]  }
 0x19a   :  { %1576 = vmatprep.subr.bf16.mxu0 %v2273_v31  ;;  %1619 = vmatprep.subr.bf16.mxu1 %v2276_v32  ;;  %v2304_v31 = vld [vmem:[%s3216_s6 + $0x320] ss:$8 sps:$4 sm:$0xff]  }
 0x1fc   :  { %v548_v38 = vpop.f32.mrf.mxu0  ;;  %v591_v39 = vpop.f32.mrf.mxu1 }
 0x1fd   :  { %v549_v53 = vadd.f32 %v548_v38, %v157_v42  ;;  %v592_v54 = vadd.f32 %v591_v39, %v165_v43  ;;  %v177_v38 = vrot.slane %v2916_v17, %v176_v28  ;;  %v185_v39 = vrot.slane %v2916_v17, %v184_v29  ;;  %v2355_v29 = vld [vmem:[%s3216_s6 + $0x290] ss:$8 sps:$4 sm:$0xff]  }
 0x1fe   :  { %v550_v44 = vpop.f32.mrf.mxu0  ;;  %v593_v45 = vpop.f32.mrf.mxu1 }
 0x1ff   :  { %v551_v48 = vadd.f32 %v550_v44, %v161_v40  ;;  %v594_v49 = vadd.f32 %v593_v45, %v169_v41  ;;  %v686_v0 = vmax.f32 %v549_v53, 0.0  ;;  %v688_v1 = vmax.f32 %v592_v54, 0.0 }
 0x200   :  { %v552_v46 = vpop.f32.mrf.mxu0  ;;  %v595_v47 = vpop.f32.mrf.mxu1 }
 0x201   :  { %v553_v51 = vadd.f32 %v552_v46, %v157_v42  ;;  %v596_v52 = vadd.f32 %v595_v47, %v165_v43  ;;  %v687_v61 = vmax.f32 %v551_v48, 0.0  ;;  %v689_v50 = vmax.f32 %v594_v49, 0.0  ;;  %v2307_v42 = vld [vmem:[%s3216_s6 + $0x210] ss:$8 sps:$4 sm:$0xff]   ;;  %v2315_v46 = vld [vmem:[%s3216_s6 + $0x204] ss:$8 sps:$4 sm:$0xff]  }
 0x202   :  { %v554_v55 = vpop.f32.mrf.mxu0  ;;  %v597_v56 = vpop.f32.mrf.mxu1  ;;  %v2310_v43 = vld [vmem:[%s3216_s6 + $0x310] ss:$8 sps:$4 sm:$0xff]   ;;  %v2318_v47 = vld [vmem:[%s3216_s6 + $0x304] ss:$8 sps:$4 sm:$0xff]  }
 0x203   :  { %v555_v57 = vadd.f32 %v554_v55, %v161_v40  ;;  %v598_v58 = vadd.f32 %v597_v56, %v169_v41  ;;  %v694_v59 = vmax.f32 %v553_v51, 0.0  ;;  %v696_v60 = vmax.f32 %v596_v52, 0.0  ;;  %v2313_v55 = vld [vmem:[%s3216_s6 + $0x200] ss:$8 sps:$4 sm:$0xff]  }
 0x204   :  { %v2316_v56 = vld [vmem:[%s3216_s6 + $0x300] ss:$8 sps:$4 sm:$0xff]  }
 0x205   :  { %v695_v62 = vmax.f32 %v555_v57, 0.0  ;;  %v697_v63 = vmax.f32 %v598_v58, 0.0  ;;  %v702_v6 = vpack.c.bf16 %v694_v59, %v686_v0  ;;  %v704_v7 = vpack.c.bf16 %v696_v60, %v688_v1  ;;  %v2321_v57 = vld [vmem:[%s3216_s6 + $0x2f4] ss:$8 sps:$4 sm:$0xff]   ;;  %v2319_v0 = vld [vmem:[%s3216_s6 + $0x2f0] ss:$8 sps:$4 sm:$0xff]  }
 0x206   :  { %v2324_v58 = vld [vmem:[%s3216_s6 + $0x3f4] ss:$8 sps:$4 sm:$0xff]   ;;  %v2322_v1 = vld [vmem:[%s3216_s6 + $0x3f0] ss:$8 sps:$4 sm:$0xff]  }
 0x207   :  { %v703_v2 = vpack.c.bf16 %v695_v62, %v687_v61  ;;  %v705_v3 = vpack.c.bf16 %v697_v63, %v689_v50 }
 0x209   :  { %1522 = vmatprep.mubr.bf16.mxu0 %v703_v2  ;;  %1565 = vmatprep.mubr.bf16.mxu1 %v705_v3  ;;  %v2327_v2 = vld [vmem:[%s3216_s6 + $0x2e4] ss:$8 sps:$4 sm:$0xff]  }
 0x20a   :  { %1523 = vmatmul.mubr.bf16.vlgmr.msra.gmra.mxu0 %v702_v6  ;;  %1566 = vmatmul.mubr.bf16.vlgmr.msra.gmra.mxu1 %v704_v7  ;;  %v2330_v3 = vld [vmem:[%s3216_s6 + $0x3e4] ss:$8 sps:$4 sm:$0xff]   ;;  %v2333_v6 = vld [vmem:[%s3216_s6 + $0x2d4] ss:$8 sps:$4 sm:$0xff]  }
 0x20b   :  { %1577 = vmatpush1.bf16.msra.mxu0 %v2271_v4  ;;  %1620 = vmatpush1.bf16.msra.mxu1 %v2274_v5  ;;  %v2325_v4 = vld [vmem:[%s3216_s6 + $0x2e0] ss:$8 sps:$4 sm:$0xff]   ;;  %v2336_v7 = vld [vmem:[%s3216_s6 + $0x3d4] ss:$8 sps:$4 sm:$0xff]  }
 0x20c   :  { %1578 = vmatprep.subr.bf16.mxu0 %v2279_v8  ;;  %1621 = vmatprep.subr.bf16.mxu1 %v2282_v9  ;;  %v2328_v5 = vld [vmem:[%s3216_s6 + $0x3e0] ss:$8 sps:$4 sm:$0xff]   ;;  %v2331_v8 = vld [vmem:[%s3216_s6 + $0x2d0] ss:$8 sps:$4 sm:$0xff]  }
 0x20d   :  { %v2334_v9 = vld [vmem:[%s3216_s6 + $0x3d0] ss:$8 sps:$4 sm:$0xff]  }
 0x20f   :  { %1579 = vmatpush1.bf16.msra.mxu0 %v2277_v10  ;;  %1622 = vmatpush1.bf16.msra.mxu1 %v2280_v11  ;;  %v2339_v10 = vld [vmem:[%s3216_s6 + $0x2c4] ss:$8 sps:$4 sm:$0xff]  }
 0x210   :  { %1580 = vmatprep.subr.bf16.mxu0 %v2285_v12  ;;  %1623 = vmatprep.subr.bf16.mxu1 %v2288_v14  ;;  %v2342_v11 = vld [vmem:[%s3216_s6 + $0x3c4] ss:$8 sps:$4 sm:$0xff]   ;;  %v2337_v12 = vld [vmem:[%s3216_s6 + $0x2c0] ss:$8 sps:$4 sm:$0xff]  }
 0x211   :  { %v2340_v14 = vld [vmem:[%s3216_s6 + $0x3c0] ss:$8 sps:$4 sm:$0xff]  }
 0x213   :  { %1581 = vmatpush1.bf16.msra.mxu0 %v2283_v15  ;;  %1624 = vmatpush1.bf16.msra.mxu1 %v2286_v16  ;;  %v2345_v15 = vld [vmem:[%s3216_s6 + $0x2b4] ss:$8 sps:$4 sm:$0xff]  }
 0x214   :  { %1582 = vmatprep.subr.bf16.mxu0 %v2291_v18  ;;  %1625 = vmatprep.subr.bf16.mxu1 %v2294_v19  ;;  %v2348_v16 = vld [vmem:[%s3216_s6 + $0x3b4] ss:$8 sps:$4 sm:$0xff]   ;;  %v2343_v18 = vld [vmem:[%s3216_s6 + $0x2b0] ss:$8 sps:$4 sm:$0xff]  }
 0x215   :  { %v2346_v19 = vld [vmem:[%s3216_s6 + $0x3b0] ss:$8 sps:$4 sm:$0xff]  }
 0x217   :  { %1583 = vmatpush1.bf16.msra.mxu0 %v2289_v20  ;;  %1626 = vmatpush1.bf16.msra.mxu1 %v2292_v21  ;;  %v2351_v20 = vld [vmem:[%s3216_s6 + $0x2a4] ss:$8 sps:$4 sm:$0xff]  }
 0x218   :  { %1584 = vmatprep.subr.bf16.mxu0 %v2297_v22  ;;  %1627 = vmatprep.subr.bf16.mxu1 %v2300_v23  ;;  %v2354_v21 = vld [vmem:[%s3216_s6 + $0x3a4] ss:$8 sps:$4 sm:$0xff]   ;;  %v172_v22 = vsub.s32 4, %v2903_v34  ;;  %v180_v23 = vsub.s32 6, %v2903_v34  ;;  %v2360_v34 = vld [vmem:[%s3216_s6 + $0x394] ss:$8 sps:$4 sm:$0xff]  }
 0x21a   :  { %v181_v28 = vrot.slane %v2916_v17, %v180_v23  ;;  %v1665_v23 = vld [vmem:[%s3221_s1 + $0x18] sm:$0xff] }
 0x21b   :  { %1585 = vmatpush1.bf16.msra.mxu0 %v2295_v24  ;;  %1628 = vmatpush1.bf16.msra.mxu1 %v2298_v25  ;;  %v2349_v24 = vld [vmem:[%s3216_s6 + $0x2a0] ss:$8 sps:$4 sm:$0xff]  }
 0x21c   :  { %v2992_v32 = vpop.f32.mrf.mxu0  ;;  %v2994_v33 = vpop.f32.mrf.mxu1  ;;  %1586 = vmatprep.subr.bf16.mxu0 %v2303_v26  ;;  %1629 = vmatprep.subr.bf16.mxu1 %v2306_v27  ;;  %v2352_v25 = vld [vmem:[%s3216_s6 + $0x3a0] ss:$8 sps:$4 sm:$0xff]   ;;  %v2357_v26 = vld [vmem:[%s3216_s6 + $0x294] ss:$8 sps:$4 sm:$0xff]   ;;  %v173_v27 = vrot.slane %v2916_v17, %v172_v22  ;;  %v2363_v17 = vld [vmem:[%s3216_s6 + $0x284] ss:$8 sps:$4 sm:$0xff]  }
 0x21e   :  { %v636_v40 = vpop.f32.mrf.mxu0  ;;  %v679_v41 = vpop.f32.mrf.mxu1 }
 0x21f   :  { %1587 = vmatpush1.bf16.msra.mxu0 %v2301_v30  ;;  %1630 = vmatpush1.bf16.msra.mxu1 %v2304_v31  ;;  %v637_v48 = vadd.f32 %v636_v40, %v177_v38  ;;  %v680_v49 = vadd.f32 %v679_v41, %v185_v39  ;;  %v2358_v30 = vld [vmem:[%s3216_s6 + $0x390] ss:$8 sps:$4 sm:$0xff]   ;;  %v2361_v40 = vld [vmem:[%s3216_s6 + $0x280] ss:$8 sps:$4 sm:$0xff]  }
 0x220   :  { %v3010_v44 = vpop.f32.mrf.mxu0  ;;  %v3012_v45 = vpop.f32.mrf.mxu1  ;;  %1588 = vmatprep.subr.bf16.mxu0 %v2309_v36  ;;  %1631 = vmatprep.subr.bf16.mxu1 %v2312_v37  ;;  %v2366_v37 = vld [vmem:[%s3216_s6 + $0x384] ss:$8 sps:$4 sm:$0xff]   ;;  %v2364_v41 = vld [vmem:[%s3216_s6 + $0x380] ss:$8 sps:$4 sm:$0xff]  }
 0x221   :  { %v691_v59 = vmax.f32 %v637_v48, 0.0  ;;  %v693_v60 = vmax.f32 %v680_v49, 0.0  ;;  %v639_v31 = vadd.f32 %v3010_v44, %v173_v27  ;;  %v682_v36 = vadd.f32 %v3012_v45, %v181_v28  ;;  %v838_v48 = vld [vmem:[%s3220_s7] sm:$0x3] }
 0x222   :  { %v640_v51 = vpop.f32.mrf.mxu0  ;;  %v683_v52 = vpop.f32.mrf.mxu1 }
 0x223   :  { %v641_v53 = vadd.f32 %v640_v51, %v177_v38  ;;  %v684_v54 = vadd.f32 %v683_v52, %v185_v39  ;;  %1589 = vmatpush1.bf16.msra.mxu0 %v2307_v42  ;;  %1632 = vmatpush1.bf16.msra.mxu1 %v2310_v43  ;;  %v635_v38 = vadd.f32 %v2992_v32, %v173_v27  ;;  %v698_v42 = vmax.f32 %v639_v31, 0.0 }
 0x224   :  { %1590 = vmatprep.subr.bf16.mxu0 %v2315_v46  ;;  %1633 = vmatprep.subr.bf16.mxu1 %v2318_v47  ;;  %v678_v39 = vadd.f32 %v2994_v33, %v181_v28  ;;  %v700_v43 = vmax.f32 %v682_v36, 0.0  ;;  %v843_v52 = vrot.slane %v838_v48, %v2910_v13  ;;  %v2367_v28 = vld [vmem:[%s3222_s10 + $0x78] sm:$0xff]  }
 0x225   :  { %v699_v61 = vmax.f32 %v641_v53, 0.0  ;;  %v701_v50 = vmax.f32 %v684_v54, 0.0  ;;  %v690_v44 = vmax.f32 %v635_v38, 0.0  ;;  %v847_v53 = vrot.slane %v838_v48, %v2906_v35  ;;  %v2372_v48 = vld [vmem:[%s3222_s10 + $0x28] sm:$0xff]  }
 0x226   :  { %v692_v45 = vmax.f32 %v678_v39, 0.0 }
 0x227   :  { %v707_v62 = vpack.c.bf16 %v699_v61, %v691_v59  ;;  %v709_v63 = vpack.c.bf16 %v701_v50, %v693_v60  ;;  %1591 = vmatpush1.bf16.msra.mxu0 %v2313_v55  ;;  %1634 = vmatpush1.bf16.msra.mxu1 %v2316_v56  ;;  %v706_v32 = vpack.c.bf16 %v698_v42, %v690_v44 }
 0x228   :  { %1592 = vmatprep.subr.bf16.mxu0 %v2321_v57  ;;  %1635 = vmatprep.subr.bf16.mxu1 %v2324_v58  ;;  %v708_v33 = vpack.c.bf16 %v700_v43, %v692_v45 }
 0x229   :  { %1608 = vmatprep.mubr.bf16.mxu0 %v707_v62  ;;  %1651 = vmatprep.mubr.bf16.mxu1 %v709_v63 }
 0x22b   :  { %1593 = vmatpush2.bf16.msra.mxu0 %v2319_v0  ;;  %1636 = vmatpush2.bf16.msra.mxu1 %v2322_v1 }
 0x22c   :  { %1594 = vmatprep.subr.bf16.mxu0 %v2327_v2  ;;  %1637 = vmatprep.subr.bf16.mxu1 %v2330_v3 }
 0x22f   :  { %1595 = vmatpush2.bf16.msra.mxu0 %v2325_v4  ;;  %1638 = vmatpush2.bf16.msra.mxu1 %v2328_v5 }
 0x230   :  { %1596 = vmatprep.subr.bf16.mxu0 %v2333_v6  ;;  %1639 = vmatprep.subr.bf16.mxu1 %v2336_v7  ;;  %v1662_v7 = vld [vmem:[%s3221_s1] sm:$0xff] }
 0x233   :  { %1597 = vmatpush2.bf16.msra.mxu0 %v2331_v8  ;;  %1640 = vmatpush2.bf16.msra.mxu1 %v2334_v9  ;;  %v1663_v8 = vld [vmem:[%s3221_s1 + $0x8] sm:$0xff] }
 0x234   :  { %1598 = vmatprep.subr.bf16.mxu0 %v2339_v10  ;;  %1641 = vmatprep.subr.bf16.mxu1 %v2342_v11 }
 0x237   :  { %1599 = vmatpush2.bf16.msra.mxu0 %v2337_v12  ;;  %1642 = vmatpush2.bf16.msra.mxu1 %v2340_v14 }
 0x238   :  { %1600 = vmatprep.subr.bf16.mxu0 %v2345_v15  ;;  %1643 = vmatprep.subr.bf16.mxu1 %v2348_v16 }
 0x23b   :  { %1601 = vmatpush2.bf16.msra.mxu0 %v2343_v18  ;;  %1644 = vmatpush2.bf16.msra.mxu1 %v2346_v19 }
 0x23c   :  { %1602 = vmatprep.subr.bf16.mxu0 %v2351_v20  ;;  %1645 = vmatprep.subr.bf16.mxu1 %v2354_v21  ;;  %v1664_v21 = vld [vmem:[%s3221_s1 + $0x10] sm:$0xff] }
 0x23f   :  { %1603 = vmatpush2.bf16.msra.mxu0 %v2349_v24  ;;  %1646 = vmatpush2.bf16.msra.mxu1 %v2352_v25 }
 0x240   :  { %1604 = vmatprep.subr.bf16.mxu0 %v2357_v26  ;;  %1647 = vmatprep.subr.bf16.mxu1 %v2360_v34 }
 0x243   :  { %1605 = vmatpush2.bf16.msra.mxu0 %v2355_v29  ;;  %1648 = vmatpush2.bf16.msra.mxu1 %v2358_v30 }
 0x244   :  { %1606 = vmatprep.subr.bf16.mxu0 %v2363_v17  ;;  %1649 = vmatprep.subr.bf16.mxu1 %v2366_v37 }
 0x247   :  { %1607 = vmatpush2.bf16.msra.mxu0 %v2361_v40  ;;  %1650 = vmatpush2.bf16.msra.mxu1 %v2364_v41 }
 0x248   :  { %2152 = vmatprep.subr.bf16.mxu0 %v2367_v28 }
 0x24a   :  { %1609 = vmatmul.mubr.bf16.vlgmr.msra.gmra.mxu0 %v706_v32  ;;  %1652 = vmatmul.mubr.bf16.vlgmr.msra.gmra.mxu1 %v708_v33  ;;  %v2368_v32 = vld [vmem:[%s3222_s10 + $0x38] sm:$0xff]   ;;  %v2369_v33 = vld [vmem:[%s3222_s10 + $0x70] sm:$0xff]  }
 0x24b   :  { %2153 = vmatpush3.bf16.msra.mxu0 %v2368_v32 }
 0x24c   :  { %2154 = vmatprep.subr.bf16.mxu0 %v2369_v33 }
 0x2ca   :  { %v1524_v46 = vpop.f32.mrf.mxu0  ;;  %v1567_v47 = vpop.f32.mrf.mxu1 }
 0x2cb   :  { %v1525_v56 = vadd.f32 %v1524_v46, %v843_v52  ;;  %v2370_v46 = vld [vmem:[%s3222_s10 + $0x30] sm:$0xff]  }
 0x2cc   :  { %v1526_v49 = vpop.f32.mrf.mxu0  ;;  %v1569_v51 = vpop.f32.mrf.mxu1  ;;  %2155 = vmatpush3.bf16.msra.mxu0 %v2370_v46 }
 0x2cd   :  { %v1527_v57 = vadd.f32 %v1526_v49, %v847_v53  ;;  %v1568_v60 = vadd.f32 %v1567_v47, %v1525_v56  ;;  %v2371_v47 = vld [vmem:[%s3222_s10 + $0x68] sm:$0xff]   ;;  %v2373_v49 = vld [vmem:[%s3222_s10 + $0x60] sm:$0xff]  }
 0x2ce   :  { %v1528_v54 = vpop.f32.mrf.mxu0  ;;  %v1571_v55 = vpop.f32.mrf.mxu1  ;;  %2156 = vmatprep.subr.bf16.mxu0 %v2371_v47  ;;  %v2379_v56 = vld [vmem:[%s3222_s10 + $0x48] sm:$0xff]  }
 0x2cf   :  { %v1529_v61 = vadd.f32 %v1528_v54, %v843_v52  ;;  %v1570_v63 = vadd.f32 %v1569_v51, %v1527_v57  ;;  %v2374_v51 = vld [vmem:[%s3222_s10 + $0x20] sm:$0xff]   ;;  %v2375_v52 = vld [vmem:[%s3222_s10 + $0x58] sm:$0xff]   ;;  %v2377_v54 = vld [vmem:[%s3222_s10 + $0x50] sm:$0xff]  }
 0x2d0   :  { %v1530_v58 = vpop.f32.mrf.mxu0  ;;  %v1573_v59 = vpop.f32.mrf.mxu1  ;;  %2157 = vmatpush3.bf16.msra.mxu0 %v2372_v48  ;;  %v2380_v57 = vld [vmem:[%s3222_s10 + $0x8] sm:$0xff]  }
 0x2d1   :  { %v1531_v0 = vadd.f32 %v1530_v58, %v847_v53  ;;  %v1572_v4 = vadd.f32 %v1571_v55, %v1529_v61  ;;  %2158 = vmatprep.subr.bf16.mxu0 %v2373_v49  ;;  %v2376_v53 = vld [vmem:[%s3222_s10 + $0x18] sm:$0xff]   ;;  %v2378_v55 = vld [vmem:[%s3222_s10 + $0x10] sm:$0xff]   ;;  %v2381_v58 = vld [vmem:[%s3222_s10 + $0x40] sm:$0xff]  }
 0x2d3   :  { %v1574_v11 = vadd.f32 %v1573_v59, %v1531_v0  ;;  %v2382_v59 = vld [vmem:[%s3222_s10] sm:$0xff]  }
 0x2d4   :  { %2159 = vmatpush3.bf16.msra.mxu0 %v2374_v51 }
 0x2d5   :  { %2160 = vmatprep.subr.bf16.mxu0 %v2375_v52 }
 0x2d8   :  { %2161 = vmatpush3.bf16.msra.mxu0 %v2376_v53 }
 0x2d9   :  { %2162 = vmatprep.subr.bf16.mxu0 %v2377_v54 }
 0x2dc   :  { %2163 = vmatpush3.bf16.msra.mxu0 %v2378_v55 }
 0x2dd   :  { %2164 = vmatprep.subr.bf16.mxu0 %v2379_v56 }
 0x2e0   :  { %2165 = vmatpush3.bf16.msra.mxu0 %v2380_v57 }
 0x2e1   :  { %2166 = vmatprep.subr.bf16.mxu0 %v2381_v58 }
 0x2e4   :  { %2167 = vmatpush3.bf16.msra.mxu0 %v2382_v59 }
 0x30a   :  { %v1610_v50 = vpop.f32.mrf.mxu0  ;;  %v1653_v62 = vpop.f32.mrf.mxu1 }
 0x30b   :  { %v1611_v1 = vadd.f32 %v1610_v50, %v1568_v60 }
 0x30c   :  { %v1612_v2 = vpop.f32.mrf.mxu0  ;;  %v1655_v3 = vpop.f32.mrf.mxu1 }
 0x30d   :  { %v1654_v5 = vadd.f32 %v1653_v62, %v1611_v1  ;;  %v1613_v6 = vadd.f32 %v1612_v2, %v1570_v63  ;;  %v1670_v1 = vld [vmem:[%s3223_s8] sm:$0x3] }
 0x30e   :  { %v1614_v9 = vpop.f32.mrf.mxu0  ;;  %v1657_v10 = vpop.f32.mrf.mxu1 }
 0x30f   :  { %v1656_v12 = vadd.f32 %v1655_v3, %v1613_v6  ;;  %v1615_v14 = vadd.f32 %v1614_v9, %v1572_v4  ;;  %v1666_v16 = vadd.f32 %v1662_v7, %v1654_v5  ;;  %v1671_v3 = vld [vmem:[%s3224_s9] sm:$0x3]  ;;  %v1709_v5 = vrot.slane %v1670_v1, %v2910_v13 }
 0x310   :  { %v1616_v15 = vpop.f32.mrf.mxu0  ;;  %v1659_v22 = vpop.f32.mrf.mxu1  ;;  %v1713_v6 = vrot.slane %v1670_v1, %v2906_v35  ;;  %v1724_v9 = vrot.slane %v1671_v3, %v2910_v13 }
 0x311   :  { %v1667_v18 = vadd.f32 %v1663_v8, %v1656_v12  ;;  %v1658_v19 = vadd.f32 %v1657_v10, %v1615_v14  ;;  %v1617_v20 = vadd.f32 %v1616_v15, %v1574_v11  ;;  %v1728_v10 = vrot.slane %v1671_v3, %v2906_v35  ;;  %v2131_v35 = vld [vmem:[%s3225_s11] ss:$0 sm:$0xff] }
 0x313   :  { %v1660_v24 = vadd.f32 %v1659_v22, %v1617_v20  ;;  %v1672_v25 = vadd.f32 %v1667_v18, %v1666_v16  ;;  %v1668_v26 = vadd.f32 %v1664_v21, %v1658_v19 }
 0x315   :  { %v1669_v34 = vadd.f32 %v1665_v23, %v1660_v24  ;;  %1673 = vadd.xlane.f32.xlu0 %v1672_v25 }
 0x317   :  { %v1675_v27 = vadd.f32 %v1669_v34, %v1668_v26 }
 0x319   :  { %1676 = vadd.xlane.f32.xlu1 %v1675_v27 }
 0x39e   :  { %v1674_v29 = vpop.xlane.xlu0 %1673 }
 0x39f   :  { %v1679_v30 = vmul.f32 0.00390625, %v1674_v29 }
 0x3a1   :  { %v1681_v31 = vsub.f32 %v1666_v16, %v1679_v30  ;;  %v1682_v36 = vsub.f32 %v1667_v18, %v1679_v30 }
 0x3a2   :  { %v1677_v17 = vpop.xlane.xlu1 %1676 }
 0x3a3   :  { %v1680_v37 = vmul.f32 0.00390625, %v1677_v17  ;;  %v1685_v38 = vmul.f32 %v1681_v31, %v1681_v31  ;;  %v1686_v39 = vmul.f32 %v1682_v36, %v1682_v36 }
 0x3a5   :  { %v1683_v40 = vsub.f32 %v1668_v26, %v1680_v37  ;;  %v1684_v41 = vsub.f32 %v1669_v34, %v1680_v37  ;;  %v1689_v42 = vadd.f32 %v1686_v39, %v1685_v38 }
 0x3a7   :  { %1690 = vadd.xlane.f32.xlu0 %v1689_v42  ;;  %v1687_v43 = vmul.f32 %v1683_v40, %v1683_v40  ;;  %v1688_v44 = vmul.f32 %v1684_v41, %v1684_v41 }
 0x3a9   :  { %v1692_v45 = vadd.f32 %v1688_v44, %v1687_v43 }
 0x3ab   :  { %1693 = vadd.xlane.f32.xlu1 %v1692_v45 }
 0x430   :  { %v1691_v60 = vpop.xlane.xlu0 %1690 }
 0x431   :  { %v1695_v61 = vmul.f32 0.00390625, %v1691_v60 }
 0x433   :  { %v1697_v50 = vadd.f32 1e-05, %v1695_v61 }
 0x434   :  { %v1694_v62 = vpop.xlane.xlu1 %1693 }
 0x435   :  { %2387 = vrsqrt.f32 %v1697_v50  ;;  %v1696_v63 = vmul.f32 0.00390625, %v1694_v62 }
 0x437   :  { %v1698_v0 = vadd.f32 1e-05, %v1696_v63 }
 0x439   :  { %2389 = vrsqrt.f32 %v1698_v0 }
 0x442   :  { %v2388_v2 = vpop.eup %2387 }
 0x443   :  { %v1702_v4 = vmul.f32 %v2388_v2, %v1682_v36  ;;  %v1701_v7 = vmul.f32 %v2388_v2, %v1681_v31 }
 0x445   :  { %v1717_v12 = vmul.f32 %v1713_v6, %v1702_v4  ;;  %v1716_v15 = vmul.f32 %v1709_v5, %v1701_v7 }
 0x446   :  { %v2390_v8 = vpop.eup %2389 }
 0x447   :  { %v1704_v11 = vmul.f32 %v2390_v8, %v1684_v41  ;;  %v1703_v14 = vmul.f32 %v2390_v8, %v1683_v40  ;;  %v1732_v19 = vadd.f32 %v1728_v10, %v1717_v12  ;;  %v1731_v21 = vadd.f32 %v1724_v9, %v1716_v15 }
 0x449   :  { %v1719_v16 = vmul.f32 %v1713_v6, %v1704_v11  ;;  %v1718_v18 = vmul.f32 %v1709_v5, %v1703_v14 }
 0x44b   :  { %v1734_v20 = vadd.f32 %v1728_v10, %v1719_v16  ;;  %v1733_v22 = vadd.f32 %v1724_v9, %v1718_v18 }
 0x44d   :  { %v1736_v23 = vpack.c.bf16 %v1734_v20, %v1732_v19  ;;  %v1735_v24 = vpack.c.bf16 %v1733_v22, %v1731_v21 }
 0x44f   :  { %1904 = vmatprep.mubr.bf16.mxu0 %v1736_v23 }
 0x450   :  { %1905 = vmatmul.mubr.bf16.vlgmr.msra.gmra.mxu0 %v1735_v24 }
 0x510   :  { %v2168_v25 = vpop.f32.mrf.mxu0 }
 0x512   :  { %v2169_v26 = vpop.f32.mrf.mxu0 }
 0x513   :  { %v2170_v13 = vadd.f32 %v2169_v26, %v2168_v25 }
 0x514   :  { %v2171_v34 = vpop.f32.mrf.mxu0 }
 0x515   :  { %v1907_v27 = vadd.f32 %v2170_v13, %v2131_v35 }
 0x516   :  { %v2172_v28 = vpop.f32.mrf.mxu0 }
 0x517   :  { %v2173_v29 = vadd.f32 %v2172_v28, %v2171_v34  ;;  %1913 = vmax.xlane.f32.xlu0 %v1907_v27 }
 0x519   :  { %v1910_v30 = vadd.f32 %v2173_v29, %v2131_v35 }
 0x51b   :  { %1915 = vmax.xlane.f32.xlu1 %v1910_v30 }
 0x5a0   :  { %v1914_v31 = vpop.xlane.xlu0 %1913 }
 0x5a1   :  { %v1917_v36 = vsub.f32 %v1907_v27, %v1914_v31 }
 0x5a3   :  { %v1919_v17 = vmul.f32 1.442695, %v1917_v36 }
 0x5a4   :  { %v1916_v37 = vpop.xlane.xlu1 %1915 }
 0x5a5   :  { %2391 = vpow2.f32 %v1919_v17  ;;  %v1918_v38 = vsub.f32 %v1910_v30, %v1916_v37 }
 0x5a7   :  { %v1921_v39 = vmul.f32 1.442695, %v1918_v38 }
 0x5a9   :  { %2393 = vpow2.f32 %v1921_v39 }
 0x5b2   :  { %v2392_v40 = vpop.eup %2391 }
 0x5b3   :  { %1923 = vadd.xlane.f32.xlu0 %v2392_v40 }
 0x5b6   :  { %v2394_v41 = vpop.eup %2393 }
 0x5b7   :  { %1925 = vadd.xlane.f32.xlu1 %v2394_v41 }
 0x63c   :  { %v1924_v42 = vpop.xlane.xlu0 %1923 }
 0x63d   :  { %2395 = vrcp.f32 %v1924_v42 }
 0x640   :  { %v1926_v43 = vpop.xlane.xlu1 %1925 }
 0x641   :  { %2397 = vrcp.f32 %v1926_v43 }
 0x64a   :  { %v2396_v44 = vpop.eup %2395 }
 0x64b   :  { %v1928_v45 = vmul.f32 %v2396_v44, %v2392_v40 }
 0x64d   :  { %1931 = vst [vmem:[%s3226_s12] sm:$0xff] %v1928_v45 }
 0x64e   :  { %v2398_v32 = vpop.eup %2397 }
 0x64f   :  { %v1930_v33 = vmul.f32 %v2398_v32, %v2394_v41 }
 0x651   :  { %1932 = vst [vmem:[%s3226_s12 + $0x8] sm:$0xff] %v1930_v33 }

// kernel: feedback_forward.2
= control target key start
LH: loop header
LB: loop body
LE: loop exit
PB: predicated region body
PF: predicated region fallthrough
CT: control target
= control target key end

     0   :  { %v9250_v57 = vmov 0   ;;  %s9234_s1 = inlined_call_operand.vmem [shape: bf16[256,128], index: 1, kind: input, shape index: {}]   ;;  %s9235_s0 = inlined_call_operand.vmem [shape: bf16[8,8,256], index: 0, kind: input, shape index: {}]   ;;  %s9236_s3 = inlined_call_operand.vmem [shape: bf16[128,512], index: 3, kind: input, shape index: {}]   ;;  %s9237_s5 = inlined_call_operand.vmem [shape: bf16[128,512], index: 5, kind: input, shape index: {}]   ;;  %s9238_s2 = inlined_call_operand.vmem [shape: f32[1,128], index: 2, kind: input, shape index: {}]   ;;  %s9239_s4 = inlined_call_operand.vmem [shape: f32[1,512], index: 4, kind: input, shape index: {}]   ;;  %s9240_s6 = inlined_call_operand.vmem [shape: bf16[128,512], index: 6, kind: input, shape index: {}]   ;;  %s9241_s7 = inlined_call_operand.vmem [shape: bf16[128,512], index: 7, kind: input, shape index: {}]   ;;  %s9242_s8 = inlined_call_operand.vmem [shape: f32[1,512], index: 8, kind: input, shape index: {}]   ;;  %s9243_s9 = inlined_call_operand.vmem [shape: bf16[8,8,128], index: 9, kind: output, shape index: {}]  }
   0x1   :  { %v6781_v0 = vld [vmem:[%s9234_s1 + $0x78] sm:$0xff]   ;;  %v6783_v2 = vld [vmem:[%s9234_s1 + $0x70] sm:$0xff]   ;;  %v6785_v4 = vld [vmem:[%s9234_s1 + $0x68] sm:$0xff]   ;;  %539 = vmatprep.mubr.bf16.mxu1 %v9250_v57 }
   0x2   :  { %v6782_v1 = vld [vmem:[%s9234_s1 + $0x38] sm:$0xff]   ;;  %6739 = vmatprep.subr.bf16.mxu0 %v6781_v0  ;;  %v6784_v3 = vld [vmem:[%s9234_s1 + $0x30] sm:$0xff]   ;;  %v6786_v5 = vld [vmem:[%s9234_s1 + $0x28] sm:$0xff]  }
   0x3   :  { %6740 = vmatpush3.bf16.msra.mxu0 %v6782_v1  ;;  %v6787_v6 = vld [vmem:[%s9234_s1 + $0x60] sm:$0xff]   ;;  %v6789_v8 = vld [vmem:[%s9234_s1 + $0x58] sm:$0xff]   ;;  %v6791_v10 = vld [vmem:[%s9234_s1 + $0x50] sm:$0xff]  }
   0x4   :  { %6741 = vmatprep.subr.bf16.mxu0 %v6783_v2  ;;  %v6788_v7 = vld [vmem:[%s9234_s1 + $0x20] sm:$0xff]   ;;  %v6790_v9 = vld [vmem:[%s9234_s1 + $0x18] sm:$0xff]   ;;  %v6792_v12 = vld [vmem:[%s9234_s1 + $0x10] sm:$0xff]  }
   0x5   :  { %v6799_v11 = vld [vmem:[%s9235_s0 + $0x4] ss:$8 sps:$4 sm:$0xff]   ;;  %v6811_v15 = vld [vmem:[%s9236_s3 + $0xe0] ss:$16 sps:$4 sm:$0xff]   ;;  %v6800_v26 = vld [vmem:[%s9235_s0 + $0x14] ss:$8 sps:$4 sm:$0xff]  }
   0x6   :  { %256 = vmatprep.mubr.bf16.mxu0 %v6799_v11  ;;  %v6793_v13 = vld [vmem:[%s9234_s1 + $0x48] sm:$0xff]   ;;  %v6809_v14 = vld [vmem:[%s9236_s3 + $0xe4] ss:$16 sps:$4 sm:$0xff]   ;;  %v6817_v19 = vld [vmem:[%s9236_s3 + $0xc0] ss:$16 sps:$4 sm:$0xff]  }
   0x7   :  { %6742 = vmatpush3.bf16.msra.mxu0 %v6784_v3  ;;  %v6794_v16 = vld [vmem:[%s9234_s1 + $0x8] sm:$0xff]   ;;  %v6795_v17 = vld [vmem:[%s9234_s1 + $0x40] sm:$0xff]   ;;  %507 = vmatprep.subr.bf16.mxu1 %v6809_v14  ;;  %v6802_v34 = vld [vmem:[%s9235_s0 + $0x10] ss:$8 sps:$4 sm:$0xff]  }
   0x8   :  { %6743 = vmatprep.subr.bf16.mxu0 %v6785_v4  ;;  %v6815_v18 = vld [vmem:[%s9236_s3 + $0xc4] ss:$16 sps:$4 sm:$0xff]   ;;  %508 = vmatpush1.bf16.msra.mxu1 %v6811_v15  ;;  %v6814_v22 = vld [vmem:[%s9236_s3 + $0xec] ss:$16 sps:$4 sm:$0xff]   ;;  %v6823_v23 = vld [vmem:[%s9236_s3 + $0xa0] ss:$16 sps:$4 sm:$0xff]  }
   0x9   :  { %509 = vmatprep.subr.bf16.mxu1 %v6815_v18  ;;  %v6796_v20 = vld [vmem:[%s9234_s1] sm:$0xff]   ;;  %v6812_v27 = vld [vmem:[%s9236_s3 + $0xe8] ss:$16 sps:$4 sm:$0xff]   ;;  %v6820_v28 = vld [vmem:[%s9236_s3 + $0xcc] ss:$16 sps:$4 sm:$0xff]  }
   0xa   :  { %v6821_v21 = vld [vmem:[%s9236_s3 + $0xa4] ss:$16 sps:$4 sm:$0xff]   ;;  %v6797_v24 = vld [vmem:[%s9235_s0] ss:$8 sps:$4 sm:$0xff]   ;;  %v6826_v31 = vld [vmem:[%s9236_s3 + $0xac] ss:$16 sps:$4 sm:$0xff]  }
   0xb   :  { %6744 = vmatpush3.bf16.msra.mxu0 %v6786_v5  ;;  %v6827_v25 = vld [vmem:[%s9236_s3 + $0x84] ss:$16 sps:$4 sm:$0xff]   ;;  %v6818_v29 = vld [vmem:[%s9236_s3 + $0xc8] ss:$16 sps:$4 sm:$0xff]   ;;  %v6829_v30 = vld [vmem:[%s9236_s3 + $0x80] ss:$16 sps:$4 sm:$0xff]  }
   0xc   :  { %6745 = vmatprep.subr.bf16.mxu0 %v6787_v6  ;;  %510 = vmatpush1.bf16.msra.mxu1 %v6817_v19  ;;  %v6833_v32 = vld [vmem:[%s9236_s3 + $0x64] ss:$16 sps:$4 sm:$0xff]   ;;  %v6835_v33 = vld [vmem:[%s9236_s3 + $0x60] ss:$16 sps:$4 sm:$0xff]   ;;  %v6824_v36 = vld [vmem:[%s9236_s3 + $0xa8] ss:$16 sps:$4 sm:$0xff]  }
   0xd   :  { %511 = vmatprep.subr.bf16.mxu1 %v6821_v21  ;;  %v6803_v35 = vld [vmem:[%s9235_s0 + $0x24] ss:$8 sps:$4 sm:$0xff]   ;;  %v6830_v38 = vld [vmem:[%s9236_s3 + $0x88] ss:$16 sps:$4 sm:$0xff]   ;;  %v6806_v41 = vld [vmem:[%s9235_s0 + $0x34] ss:$8 sps:$4 sm:$0xff]  }
   0xe   :  { %v6832_v37 = vld [vmem:[%s9236_s3 + $0x8c] ss:$16 sps:$4 sm:$0xff]   ;;  %v6805_v40 = vld [vmem:[%s9235_s0 + $0x20] ss:$8 sps:$4 sm:$0xff]   ;;  %v6808_v43 = vld [vmem:[%s9235_s0 + $0x30] ss:$8 sps:$4 sm:$0xff]  }
   0xf   :  { %6746 = vmatpush3.bf16.msra.mxu0 %v6788_v7  ;;  %v6838_v39 = vld [vmem:[%s9236_s3 + $0x6c] ss:$16 sps:$4 sm:$0xff]   ;;  %v6836_v42 = vld [vmem:[%s9236_s3 + $0x68] ss:$16 sps:$4 sm:$0xff]   ;;  %v6839_v44 = vld [vmem:[%s9236_s3 + $0x44] ss:$16 sps:$4 sm:$0xff]  }
  0x10   :  { %6747 = vmatprep.subr.bf16.mxu0 %v6789_v8  ;;  %512 = vmatpush1.bf16.msra.mxu1 %v6823_v23  ;;  %v6844_v45 = vld [vmem:[%s9236_s3 + $0x4c] ss:$16 sps:$4 sm:$0xff]   ;;  %v6841_v46 = vld [vmem:[%s9236_s3 + $0x40] ss:$16 sps:$4 sm:$0xff]   ;;  %v6842_v47 = vld [vmem:[%s9236_s3 + $0x48] ss:$16 sps:$4 sm:$0xff]  }
  0x11   :  { %513 = vmatprep.subr.bf16.mxu1 %v6827_v25  ;;  %v6845_v48 = vld [vmem:[%s9236_s3 + $0x24] ss:$16 sps:$4 sm:$0xff]   ;;  %v6850_v49 = vld [vmem:[%s9236_s3 + $0x2c] ss:$16 sps:$4 sm:$0xff]   ;;  %v6847_v50 = vld [vmem:[%s9236_s3 + $0x20] ss:$16 sps:$4 sm:$0xff]  }
  0x12   :  { %v6848_v51 = vld [vmem:[%s9236_s3 + $0x28] ss:$16 sps:$4 sm:$0xff]   ;;  %v6851_v52 = vld [vmem:[%s9236_s3 + $0x4] ss:$16 sps:$4 sm:$0xff]   ;;  %v6856_v53 = vld [vmem:[%s9236_s3 + $0xc] ss:$16 sps:$4 sm:$0xff]  }
  0x13   :  { %6748 = vmatpush3.bf16.msra.mxu0 %v6790_v9  ;;  %v6853_v54 = vld [vmem:[%s9236_s3] ss:$16 sps:$4 sm:$0xff]   ;;  %v6854_v55 = vld [vmem:[%s9236_s3 + $0x8] ss:$16 sps:$4 sm:$0xff]   ;;  %v7580_v56 = vld [vmem:[%s9237_s5 + $0xe4] ss:$16 sps:$4 sm:$0xff]  }
  0x14   :  { %6749 = vmatprep.subr.bf16.mxu0 %v6791_v10  ;;  %514 = vmatpush1.bf16.msra.mxu1 %v6829_v30  ;;  %v7588_v58 = vld [vmem:[%s9237_s5 + $0xec] ss:$16 sps:$4 sm:$0xff]   ;;  %v7594_v63 = vld [vmem:[%s9238_s2] ss:$0 sm:$0xff]  ;;  %v7606_v7 = vld [vmem:[%s9237_s5 + $0xe8] ss:$16 sps:$4 sm:$0xff]  }
  0x15   :  { %515 = vmatprep.subr.bf16.mxu1 %v6833_v32  ;;  %v7601_v6 = vld [vmem:[%s9237_s5 + $0xe0] ss:$16 sps:$4 sm:$0xff]   ;;  %v7611_v9 = vld [vmem:[%s9237_s5 + $0xc4] ss:$16 sps:$4 sm:$0xff]   ;;  %v7616_v10 = vld [vmem:[%s9237_s5 + $0xcc] ss:$16 sps:$4 sm:$0xff]  }
  0x16   :  { %v7623_v14 = vld [vmem:[%s9237_s5 + $0xc0] ss:$16 sps:$4 sm:$0xff]   ;;  %v7628_v15 = vld [vmem:[%s9237_s5 + $0xc8] ss:$16 sps:$4 sm:$0xff]   ;;  %v7640_v18 = vld [vmem:[%s9237_s5 + $0xac] ss:$16 sps:$4 sm:$0xff]  }
  0x17   :  { %6750 = vmatpush3.bf16.msra.mxu0 %v6792_v12  ;;  %v7651_v23 = vld [vmem:[%s9237_s5 + $0xa0] ss:$16 sps:$4 sm:$0xff]   ;;  %v7680_v32 = vld [vmem:[%s9237_s5 + $0x88] ss:$16 sps:$4 sm:$0xff]  }
  0x18   :  { %6751 = vmatprep.subr.bf16.mxu0 %v6793_v13  ;;  %516 = vmatpush1.bf16.msra.mxu1 %v6835_v33 }
  0x19   :  { %517 = vmatprep.subr.bf16.mxu1 %v6839_v44  ;;  %v7720_v44 = vld [vmem:[%s9237_s5 + $0x4c] ss:$16 sps:$4 sm:$0xff]  }
  0x1b   :  { %6752 = vmatpush3.bf16.msra.mxu0 %v6794_v16 }
  0x1c   :  { %6753 = vmatprep.subr.bf16.mxu0 %v6795_v17  ;;  %518 = vmatpush1.bf16.msra.mxu1 %v6841_v46  ;;  %v7635_v17 = vld [vmem:[%s9237_s5 + $0xa4] ss:$16 sps:$4 sm:$0xff]  }
  0x1d   :  { %519 = vmatprep.subr.bf16.mxu1 %v6845_v48  ;;  %v7727_v48 = vld [vmem:[%s9237_s5 + $0x40] ss:$16 sps:$4 sm:$0xff]  }
  0x1f   :  { %6754 = vmatpush3.bf16.msra.mxu0 %v6796_v20 }
  0x20   :  { %580 = vmatprep.subr.bf16.mxu0 %v6814_v22  ;;  %520 = vmatpush1.bf16.msra.mxu1 %v6847_v50 }
  0x21   :  { %521 = vmatprep.subr.bf16.mxu1 %v6851_v52  ;;  %v7744_v52 = vld [vmem:[%s9237_s5 + $0x2c] ss:$16 sps:$4 sm:$0xff]  }
  0x22   :  { %257 = vmatmul.mubr.bf16.vlgmr.msra.gmra.mxu0 %v6797_v24  ;;  %v7656_v24 = vld [vmem:[%s9237_s5 + $0xa8] ss:$16 sps:$4 sm:$0xff]  }
  0x23   :  { %264 = vmatprep.mubr.bf16.mxu0 %v6800_v26  ;;  %581 = vmatpush1.bf16.msra.mxu0 %v6812_v27  ;;  %v7663_v26 = vld [vmem:[%s9237_s5 + $0x84] ss:$16 sps:$4 sm:$0xff]   ;;  %v7668_v27 = vld [vmem:[%s9237_s5 + $0x8c] ss:$16 sps:$4 sm:$0xff]  }
  0x24   :  { %582 = vmatprep.subr.bf16.mxu0 %v6820_v28  ;;  %522 = vmatpush1.bf16.msra.mxu1 %v6853_v54 }
  0x25   :  { %884 = vmatprep.subr.bf16.mxu1 %v7580_v56 }
  0x27   :  { %583 = vmatpush1.bf16.msra.mxu0 %v6818_v29 }
  0x28   :  { %584 = vmatprep.subr.bf16.mxu0 %v6826_v31  ;;  %v7675_v31 = vld [vmem:[%s9237_s5 + $0x80] ss:$16 sps:$4 sm:$0xff]  }
  0x2a   :  { %265 = vmatmul.mubr.bf16.gmra.mxu0 %v6802_v34  ;;  %v7687_v34 = vld [vmem:[%s9237_s5 + $0x64] ss:$16 sps:$4 sm:$0xff]  }
  0x2b   :  { %272 = vmatprep.mubr.bf16.mxu0 %v6803_v35  ;;  %585 = vmatpush1.bf16.msra.mxu0 %v6824_v36  ;;  %v7692_v35 = vld [vmem:[%s9237_s5 + $0x6c] ss:$16 sps:$4 sm:$0xff]  }
  0x2c   :  { %586 = vmatprep.subr.bf16.mxu0 %v6832_v37 }
  0x2f   :  { %587 = vmatpush1.bf16.msra.mxu0 %v6830_v38 }
  0x30   :  { %588 = vmatprep.subr.bf16.mxu0 %v6838_v39 }
  0x32   :  { %273 = vmatmul.mubr.bf16.gmra.mxu0 %v6805_v40  ;;  %v7703_v40 = vld [vmem:[%s9237_s5 + $0x60] ss:$16 sps:$4 sm:$0xff]  }
  0x33   :  { %280 = vmatprep.mubr.bf16.mxu0 %v6806_v41  ;;  %589 = vmatpush1.bf16.msra.mxu0 %v6836_v42  ;;  %v7708_v41 = vld [vmem:[%s9237_s5 + $0x68] ss:$16 sps:$4 sm:$0xff]  }
  0x34   :  { %590 = vmatprep.subr.bf16.mxu0 %v6844_v45 }
  0x37   :  { %591 = vmatpush1.bf16.msra.mxu0 %v6842_v47 }
  0x38   :  { %592 = vmatprep.subr.bf16.mxu0 %v6850_v49  ;;  %v7732_v49 = vld [vmem:[%s9237_s5 + $0x48] ss:$16 sps:$4 sm:$0xff]  }
  0x3a   :  { %281 = vmatmul.mubr.bf16.gmra.mxu0 %v6808_v43  ;;  %v7715_v43 = vld [vmem:[%s9237_s5 + $0x44] ss:$16 sps:$4 sm:$0xff]  }
  0x3b   :  { %593 = vmatpush1.bf16.msra.mxu0 %v6848_v51  ;;  %612 = vmatprep.mubr.bf16.mxu0 %v9250_v57  ;;  %v7739_v51 = vld [vmem:[%s9237_s5 + $0x24] ss:$16 sps:$4 sm:$0xff]  }
  0x3c   :  { %594 = vmatprep.subr.bf16.mxu0 %v6856_v53 }
  0x3f   :  { %595 = vmatpush1.bf16.msra.mxu0 %v6854_v55  ;;  %v7755_v55 = vld [vmem:[%s9237_s5 + $0x20] ss:$16 sps:$4 sm:$0xff]  }
  0x40   :  { %925 = vmatprep.subr.bf16.mxu0 %v7588_v58 }
  0xe2   :  { %v6755_v59 = vpop.f32.mrf.mxu0 }
  0xe4   :  { %v6756_v60 = vpop.f32.mrf.mxu0 }
  0xe5   :  { %v6757_v62 = vadd.f32 %v6756_v60, %v6755_v59  ;;  %v7760_v59 = vld [vmem:[%s9237_s5 + $0x28] ss:$16 sps:$4 sm:$0xff]  }
  0xe6   :  { %v6758_v61 = vpop.f32.mrf.mxu0 }
  0xe7   :  { %v259_v3 = vadd.f32 %v6757_v62, %v7594_v63  ;;  %v7772_v62 = vld [vmem:[%s9237_s5 + $0xc] ss:$16 sps:$4 sm:$0xff]  }
  0xe8   :  { %v6759_v0 = vpop.f32.mrf.mxu0 }
  0xe9   :  { %v6760_v1 = vadd.f32 %v6759_v0, %v6758_v61  ;;  %v7767_v61 = vld [vmem:[%s9237_s5 + $0x4] ss:$16 sps:$4 sm:$0xff]   ;;  %v7784_v0 = vld [vmem:[%s9237_s5 + $0x8] ss:$16 sps:$4 sm:$0xff]  }
  0xea   :  { %v6761_v2 = vpop.f32.mrf.mxu0 }
  0xeb   :  { %v262_v4 = vadd.f32 %v6760_v1, %v7594_v63  ;;  %v9248_v1 = vmov 0.0|0.0  }
  0xec   :  { %v6762_v5 = vpop.f32.mrf.mxu0 }
  0xed   :  { %v289_v8 = vpack.c.bf16 %v262_v4, %v259_v3  ;;  %v6763_v12 = vadd.f32 %v6762_v5, %v6761_v2  ;;  %v327_v2 = vlaneseq }
  0xee   :  { %v6764_v11 = vpop.f32.mrf.mxu0 }
  0xef   :  { %540 = vmatmul.mubr.bf16.vlgmr.msra.gmra.mxu1 %v289_v8  ;;  %613 = vmatmul.mubr.bf16.vlgmr.msra.gmra.mxu0 %v289_v8  ;;  %v267_v20 = vadd.f32 %v6763_v12, %v7594_v63  ;;  %v7830_v3 = vshrl.u32 %v327_v2, 7  ;;  %v325_v8 = vld [vmem:[%s9239_s4] sm:$0xf] }
  0xf0   :  { %885 = vmatpush1.bf16.msra.mxu1 %v7601_v6  ;;  %v6765_v13 = vpop.f32.mrf.mxu0  ;;  %926 = vmatpush1.bf16.msra.mxu0 %v7606_v7 }
  0xf1   :  { %v6766_v16 = vadd.f32 %v6765_v13, %v6764_v11  ;;  %886 = vmatprep.subr.bf16.mxu1 %v7611_v9  ;;  %927 = vmatprep.subr.bf16.mxu0 %v7616_v10  ;;  %9254 = vst [vmem:[#allocation9_spill] sm:$0xff] %v7830_v3  ;;  %v9247_v4 = vsub.s32 0, %v7830_v3  ;;  %v9244_v5 = vsub.s32 2, %v7830_v3  ;;  %v9246_v13 = vsub.s32 1, %v7830_v3 }
  0xf2   :  { %v6767_v19 = vpop.f32.mrf.mxu0  ;;  %549 = vmatprep.mubr.bf16.mxu1 %v9250_v57  ;;  %622 = vmatprep.mubr.bf16.mxu0 %v9250_v57 }
  0xf3   :  { %v270_v21 = vadd.f32 %v6766_v16, %v7594_v63  ;;  %v9245_v16 = vsub.s32 3, %v7830_v3 }
  0xf4   :  { %887 = vmatpush1.bf16.msra.mxu1 %v7623_v14  ;;  %v6768_v22 = vpop.f32.mrf.mxu0  ;;  %928 = vmatpush1.bf16.msra.mxu0 %v7628_v15 }
  0xf5   :  { %888 = vmatprep.subr.bf16.mxu1 %v7635_v17  ;;  %v290_v25 = vpack.c.bf16 %v270_v21, %v267_v20  ;;  %929 = vmatprep.subr.bf16.mxu0 %v7640_v18  ;;  %v6769_v29 = vadd.f32 %v6768_v22, %v6767_v19  ;;  %v330_v21 = vrot.slane %v325_v8, %v9247_v4 }
  0xf6   :  { %v6770_v28 = vpop.f32.mrf.mxu0  ;;  %v7851_v22 = vrot.slane %v325_v8, %v9244_v5 }
  0xf7   :  { %550 = vmatmul.mubr.bf16.gmra.mxu1 %v290_v25  ;;  %623 = vmatmul.mubr.bf16.gmra.mxu0 %v290_v25  ;;  %v275_v37 = vadd.f32 %v6769_v29, %v7594_v63  ;;  %v334_v29 = vrot.slane %v325_v8, %v9246_v13 }
  0xf8   :  { %889 = vmatpush1.bf16.msra.mxu1 %v7651_v23  ;;  %v6771_v30 = vpop.f32.mrf.mxu0  ;;  %930 = vmatpush1.bf16.msra.mxu0 %v7656_v24 }
  0xf9   :  { %v6772_v33 = vadd.f32 %v6771_v30, %v6770_v28  ;;  %890 = vmatprep.subr.bf16.mxu1 %v7663_v26  ;;  %931 = vmatprep.subr.bf16.mxu0 %v7668_v27  ;;  %v7857_v30 = vrot.slane %v325_v8, %v9245_v16 }
  0xfa   :  { %v6773_v36 = vpop.f32.mrf.mxu0  ;;  %559 = vmatprep.mubr.bf16.mxu1 %v9250_v57  ;;  %632 = vmatprep.mubr.bf16.mxu0 %v9250_v57 }
  0xfb   :  { %v278_v38 = vadd.f32 %v6772_v33, %v7594_v63 }
  0xfc   :  { %891 = vmatpush1.bf16.msra.mxu1 %v7675_v31  ;;  %v6774_v39 = vpop.f32.mrf.mxu0  ;;  %932 = vmatpush1.bf16.msra.mxu0 %v7680_v32 }
  0xfd   :  { %892 = vmatprep.subr.bf16.mxu1 %v7687_v34  ;;  %v291_v42 = vpack.c.bf16 %v278_v38, %v275_v37  ;;  %933 = vmatprep.subr.bf16.mxu0 %v7692_v35  ;;  %v6775_v46 = vadd.f32 %v6774_v39, %v6773_v36 }
  0xfe   :  { %v6776_v45 = vpop.f32.mrf.mxu0 }
  0xff   :  { %560 = vmatmul.mubr.bf16.gmra.mxu1 %v291_v42  ;;  %633 = vmatmul.mubr.bf16.gmra.mxu0 %v291_v42  ;;  %v283_v53 = vadd.f32 %v6775_v46, %v7594_v63 }
 0x100   :  { %893 = vmatpush1.bf16.msra.mxu1 %v7703_v40  ;;  %v6777_v47 = vpop.f32.mrf.mxu0  ;;  %934 = vmatpush1.bf16.msra.mxu0 %v7708_v41 }
 0x101   :  { %v6778_v50 = vadd.f32 %v6777_v47, %v6776_v45  ;;  %894 = vmatprep.subr.bf16.mxu1 %v7715_v43  ;;  %935 = vmatprep.subr.bf16.mxu0 %v7720_v44 }
 0x102   :  { %569 = vmatprep.mubr.bf16.mxu1 %v9250_v57  ;;  %642 = vmatprep.mubr.bf16.mxu0 %v9250_v57 }
 0x103   :  { %v286_v54 = vadd.f32 %v6778_v50, %v7594_v63  ;;  %v7779_v63 = vld [vmem:[%s9237_s5] ss:$16 sps:$4 sm:$0xff]  }
 0x104   :  { %895 = vmatpush1.bf16.msra.mxu1 %v7727_v48  ;;  %936 = vmatpush1.bf16.msra.mxu0 %v7732_v49 }
 0x105   :  { %896 = vmatprep.subr.bf16.mxu1 %v7739_v51  ;;  %v292_v60 = vpack.c.bf16 %v286_v54, %v283_v53  ;;  %937 = vmatprep.subr.bf16.mxu0 %v7744_v52 }
 0x107   :  { %570 = vmatmul.mubr.bf16.gmra.mxu1 %v292_v60  ;;  %643 = vmatmul.mubr.bf16.gmra.mxu0 %v292_v60 }
 0x108   :  { %897 = vmatpush1.bf16.msra.mxu1 %v7755_v55  ;;  %938 = vmatpush1.bf16.msra.mxu0 %v7760_v59 }
 0x109   :  { %898 = vmatprep.subr.bf16.mxu1 %v7767_v61  ;;  %939 = vmatprep.subr.bf16.mxu0 %v7772_v62 }
 0x10a   :  { %916 = vmatprep.mubr.bf16.mxu1 %v9250_v57  ;;  %957 = vmatprep.mubr.bf16.mxu0 %v9250_v57 }
 0x10c   :  { %899 = vmatpush1.bf16.msra.mxu1 %v7779_v63  ;;  %940 = vmatpush1.bf16.msra.mxu0 %v7784_v0 }
 0x10d   :  { %1193 = vmatprep.subr.bf16.mxu1 %v7580_v56  ;;  %1234 = vmatprep.subr.bf16.mxu0 %v7588_v58 }
 0x10f   :  { %917 = vmatmul.mubr.bf16.vlgmr.msra.gmra.mxu1 %v9248_v1  ;;  %958 = vmatmul.mubr.bf16.vlgmr.msra.gmra.mxu0 %v9248_v1 }
 0x110   :  { %1194 = vmatpush1.bf16.msra.mxu1 %v7601_v6  ;;  %1235 = vmatpush1.bf16.msra.mxu0 %v7606_v7 }
 0x111   :  { %1195 = vmatprep.subr.bf16.mxu1 %v7611_v9  ;;  %1236 = vmatprep.subr.bf16.mxu0 %v7616_v10 }
 0x112   :  { %1225 = vmatprep.mubr.bf16.mxu1 %v9250_v57  ;;  %1266 = vmatprep.mubr.bf16.mxu0 %v9250_v57 }
 0x114   :  { %1196 = vmatpush1.bf16.msra.mxu1 %v7623_v14  ;;  %1237 = vmatpush1.bf16.msra.mxu0 %v7628_v15 }
 0x115   :  { %1197 = vmatprep.subr.bf16.mxu1 %v7635_v17  ;;  %1238 = vmatprep.subr.bf16.mxu0 %v7640_v18 }
 0x118   :  { %1198 = vmatpush1.bf16.msra.mxu1 %v7651_v23  ;;  %1239 = vmatpush1.bf16.msra.mxu0 %v7656_v24 }
 0x119   :  { %1199 = vmatprep.subr.bf16.mxu1 %v7663_v26  ;;  %1240 = vmatprep.subr.bf16.mxu0 %v7668_v27 }
 0x11c   :  { %1200 = vmatpush1.bf16.msra.mxu1 %v7675_v31  ;;  %1241 = vmatpush1.bf16.msra.mxu0 %v7680_v32 }
 0x11d   :  { %1201 = vmatprep.subr.bf16.mxu1 %v7687_v34  ;;  %1242 = vmatprep.subr.bf16.mxu0 %v7692_v35 }
 0x120   :  { %1202 = vmatpush1.bf16.msra.mxu1 %v7703_v40  ;;  %1243 = vmatpush1.bf16.msra.mxu0 %v7708_v41 }
 0x121   :  { %1203 = vmatprep.subr.bf16.mxu1 %v7715_v43  ;;  %1244 = vmatprep.subr.bf16.mxu0 %v7720_v44 }
 0x124   :  { %1204 = vmatpush1.bf16.msra.mxu1 %v7727_v48  ;;  %1245 = vmatpush1.bf16.msra.mxu0 %v7732_v49 }
 0x125   :  { %1205 = vmatprep.subr.bf16.mxu1 %v7739_v51  ;;  %1246 = vmatprep.subr.bf16.mxu0 %v7744_v52 }
 0x128   :  { %1206 = vmatpush1.bf16.msra.mxu1 %v7755_v55  ;;  %1247 = vmatpush1.bf16.msra.mxu0 %v7760_v59 }
 0x129   :  { %1207 = vmatprep.subr.bf16.mxu1 %v7767_v61  ;;  %1248 = vmatprep.subr.bf16.mxu0 %v7772_v62 }
 0x12c   :  { %1208 = vmatpush1.bf16.msra.mxu1 %v7779_v63  ;;  %1249 = vmatpush1.bf16.msra.mxu0 %v7784_v0 }
 0x12d   :  { %1503 = vmatprep.subr.bf16.mxu1 %v7580_v56  ;;  %1544 = vmatprep.subr.bf16.mxu0 %v7588_v58 }
 0x1af   :  { %v7837_v11 = vpop.f32.mrf.mxu1  ;;  %v7839_v12 = vpop.f32.mrf.mxu0 }
 0x1b1   :  { %v7843_v19 = vpop.f32.mrf.mxu1  ;;  %v7845_v20 = vpop.f32.mrf.mxu0 }
 0x1b3   :  { %v545_v25 = vpop.f32.mrf.mxu1  ;;  %v618_v28 = vpop.f32.mrf.mxu0 }
 0x1b4   :  { %v7859_v33 = vadd.f32 %v545_v25, %v330_v21  ;;  %v7862_v36 = vadd.f32 %v618_v28, %v7851_v22 }
 0x1b5   :  { %v547_v37 = vpop.f32.mrf.mxu1  ;;  %v620_v38 = vpop.f32.mrf.mxu0 }
 0x1b6   :  { %v7864_v39 = vadd.f32 %v547_v37, %v334_v29  ;;  %v7867_v42 = vadd.f32 %v620_v38, %v7857_v30 }
 0x1b7   :  { %v551_v45 = vpop.f32.mrf.mxu1  ;;  %v624_v46 = vpop.f32.mrf.mxu0 }
 0x1b8   :  { %v7869_v47 = vadd.f32 %v551_v45, %v330_v21  ;;  %v7872_v50 = vadd.f32 %v624_v46, %v7851_v22 }
 0x1b9   :  { %v553_v53 = vpop.f32.mrf.mxu1  ;;  %v626_v54 = vpop.f32.mrf.mxu0 }
 0x1ba   :  { %9255 = vst [vmem:[#allocation10_spill] sm:$0xff] %v7872_v50  ;;  %v7874_v60 = vadd.f32 %v553_v53, %v334_v29  ;;  %v7877_v2 = vadd.f32 %v626_v54, %v7857_v30 }
 0x1bb   :  { %v555_v8 = vpop.f32.mrf.mxu1  ;;  %v628_v25 = vpop.f32.mrf.mxu0 }
 0x1bc   :  { %v7879_v28 = vadd.f32 %v555_v8, %v330_v21  ;;  %v7882_v37 = vadd.f32 %v628_v25, %v7851_v22 }
 0x1bd   :  { %v557_v38 = vpop.f32.mrf.mxu1  ;;  %v630_v45 = vpop.f32.mrf.mxu0 }
 0x1be   :  { %9256 = vst [vmem:[#allocation11_spill] sm:$0xff] %v7879_v28  ;;  %9257 = vst [vmem:[#allocation12_spill] sm:$0xff] %v7882_v37  ;;  %v7884_v5 = vadd.f32 %v557_v38, %v334_v29  ;;  %v7887_v46 = vadd.f32 %v630_v45, %v7857_v30 }
 0x1bf   :  { %v561_v16 = vpop.f32.mrf.mxu1  ;;  %v634_v53 = vpop.f32.mrf.mxu0 }
 0x1c0   :  { %9258 = vst [vmem:[#allocation13_spill] sm:$0xff] %v7884_v5  ;;  %9259 = vst [vmem:[#allocation14_spill] sm:$0xff] %v7887_v46  ;;  %v7889_v13 = vadd.f32 %v561_v16, %v330_v21  ;;  %v7892_v54 = vadd.f32 %v634_v53, %v7851_v22 }
 0x1c1   :  { %v563_v4 = vpop.f32.mrf.mxu1  ;;  %v636_v8 = vpop.f32.mrf.mxu0 }
 0x1c2   :  { %9260 = vst [vmem:[#allocation15_spill] sm:$0xff] %v7889_v13  ;;  %9261 = vst [vmem:[#allocation16_spill] sm:$0xff] %v7892_v54  ;;  %v7894_v1 = vadd.f32 %v563_v4, %v334_v29  ;;  %v7897_v25 = vadd.f32 %v636_v8, %v7857_v30 }
 0x1c3   :  { %v565_v57 = vpop.f32.mrf.mxu1  ;;  %v638_v38 = vpop.f32.mrf.mxu0 }
 0x1c4   :  { %9262 = vst [vmem:[#allocation17_spill] sm:$0xff] %v7894_v1  ;;  %9263 = vst [vmem:[#allocation18_spill] sm:$0xff] %v7897_v25  ;;  %v7899_v3 = vadd.f32 %v565_v57, %v330_v21  ;;  %v7902_v45 = vadd.f32 %v638_v38, %v7851_v22 }
 0x1c5   :  { %v567_v37 = vpop.f32.mrf.mxu1  ;;  %v640_v16 = vpop.f32.mrf.mxu0 }
 0x1c6   :  { %9264 = vst [vmem:[#allocation19_spill] sm:$0xff] %v7899_v3  ;;  %9265 = vst [vmem:[#allocation20_spill] sm:$0xff] %v7902_v45  ;;  %v7904_v13 = vadd.f32 %v567_v37, %v334_v29  ;;  %v7907_v53 = vadd.f32 %v640_v16, %v7857_v30 }
 0x1c7   :  { %v571_v54 = vpop.f32.mrf.mxu1  ;;  %v644_v4 = vpop.f32.mrf.mxu0 }
 0x1c8   :  { %9266 = vst [vmem:[#allocation21_spill] sm:$0xff] %v7904_v13  ;;  %9267 = vst [vmem:[#allocation22_spill] sm:$0xff] %v7907_v53  ;;  %v7909_v1 = vadd.f32 %v571_v54, %v330_v21  ;;  %v7912_v8 = vadd.f32 %v644_v4, %v7851_v22 }
 0x1c9   :  { %v573_v25 = vpop.f32.mrf.mxu1  ;;  %v646_v57 = vpop.f32.mrf.mxu0 }
 0x1ca   :  { %9268 = vst [vmem:[#allocation23_spill] sm:$0xff] %v7909_v1  ;;  %9269 = vst [vmem:[#allocation24_spill] sm:$0xff] %v7912_v8  ;;  %v7914_v3 = vadd.f32 %v573_v25, %v334_v29  ;;  %v7917_v38 = vadd.f32 %v646_v57, %v7857_v30  ;;  %v542_v1 = vadd.f32 %v7837_v11, %v330_v21 }
 0x1cb   :  { %v575_v45 = vpop.f32.mrf.mxu1  ;;  %v648_v37 = vpop.f32.mrf.mxu0  ;;  %v544_v57 = vadd.f32 %v7843_v19, %v334_v29 }
 0x1cc   :  { %9270 = vst [vmem:[#allocation25_spill] sm:$0xff] %v7914_v3  ;;  %9271 = vst [vmem:[#allocation26_spill] sm:$0xff] %v7917_v38  ;;  %v7919_v13 = vadd.f32 %v575_v45, %v330_v21  ;;  %v7922_v16 = vadd.f32 %v648_v37, %v7851_v22  ;;  %v617_v21 = vadd.f32 %v7845_v20, %v7857_v30 }
 0x1cd   :  { %v577_v53 = vpop.f32.mrf.mxu1  ;;  %v650_v54 = vpop.f32.mrf.mxu0 }
 0x1ce   :  { %9272 = vst [vmem:[#allocation27_spill] sm:$0xff] %v7919_v13  ;;  %9273 = vst [vmem:[#allocation28_spill] sm:$0xff] %v7922_v16  ;;  %v7925_v4 = vadd.f32 %v577_v53, %v334_v29  ;;  %v7928_v8 = vadd.f32 %v650_v54, %v7857_v30  ;;  %v615_v54 = vadd.f32 %v7839_v12, %v7851_v22 }
 0x1cf   :  { %v918_v25 = vpop.f32.mrf.mxu1  ;;  %v959_v3 = vpop.f32.mrf.mxu0 }
 0x1d0   :  { %v966_v38 = vadd.f32 %v918_v25, %v542_v1  ;;  %v968_v29 = vadd.f32 %v959_v3, %v615_v54 }
 0x1d1   :  { %v920_v46 = vpop.f32.mrf.mxu1  ;;  %v961_v45 = vpop.f32.mrf.mxu0 }
 0x1d2   :  { %v6168_v13 = vmul.f32 -1.442695, %v966_v38  ;;  %v967_v5 = vadd.f32 %v920_v46, %v544_v57  ;;  %v969_v53 = vadd.f32 %v961_v45, %v617_v21 }
 0x1d3   :  { %v922_v37 = vpop.f32.mrf.mxu1  ;;  %v963_v16 = vpop.f32.mrf.mxu0 }
 0x1d4   :  { %7101 = vpow2.f32 %v6168_v13  ;;  %v6169_v28 = vmul.f32 -1.442695, %v967_v5  ;;  %v6170_v19 = vmul.f32 -1.442695, %v969_v53  ;;  %v9274_v37 = vmov 0  }
 0x1d5   :  { %v923_v50 = vpop.f32.mrf.mxu1  ;;  %v964_v11 = vpop.f32.mrf.mxu0 }
 0x1d6   :  { %7103 = vpow2.f32 %v6169_v28 }
 0x1d7   :  { %7105 = vpow2.f32 %v6170_v19 }
 0x1e1   :  { %v7102_v1 = vpop.eup %7101 }
 0x1e2   :  { %v973_v25 = vadd.f32 1.0, %v7102_v1 }
 0x1e3   :  { %v7104_v38 = vpop.eup %7103 }
 0x1e4   :  { %7107 = vrcp.f32 %v973_v25  ;;  %v979_v46 = vadd.f32 1.0, %v7104_v38  ;;  %v7106_v5 = vpop.eup %7105 }
 0x1e5   :  { %7109 = vtanh.f32 %v968_v29  ;;  %v986_v16 = vadd.f32 1.0, %v7106_v5 }
 0x1e6   :  { %7111 = vrcp.f32 %v979_v46 }
 0x1e7   :  { %7113 = vrcp.f32 %v986_v16 }
 0x1f1   :  { %v7108_v13 = vpop.eup %7107 }
 0x1f2   :  { %v7110_v50 = vpop.eup %7109 }
 0x1f3   :  { %v7112_v28 = vpop.eup %7111  ;;  %v990_v30 = vmul.f32 %v7110_v50, %v7108_v13 }
 0x1f4   :  { %v989_v20 = vmul.f32 0.0, %v7112_v28  ;;  %v7114_v3 = vpop.eup %7113 }
 0x1f6   :  { %v7935_v57 = vadd.f32 %v990_v30, %v989_v20 }
 0x1f8   :  { %7115 = vtanh.f32 %v7935_v57 }
 0x205   :  { %v7116_v12 = vpop.eup %7115 }
 0x206   :  { %v993_v22 = vmul.f32 %v7116_v12, %v7114_v3 }
 0x208   :  { %v994_v45 = vpack.c.bf16 %v993_v22, %v993_v22 }
 0x20a   :  { %995 = vst [vmem:[#allocation6] sm:$0xf] %v994_v45  ;;  %1226 = vmatmul.mubr.bf16.vlgmr.msra.gmra.mxu1 %v994_v45  ;;  %1267 = vmatmul.mubr.bf16.vlgmr.msra.gmra.mxu0 %v994_v45 }
 0x20b   :  { %1504 = vmatpush1.bf16.msra.mxu1 %v7601_v6  ;;  %1545 = vmatpush1.bf16.msra.mxu0 %v7606_v7 }
 0x20c   :  { %1505 = vmatprep.subr.bf16.mxu1 %v7611_v9  ;;  %1546 = vmatprep.subr.bf16.mxu0 %v7616_v10 }
 0x20d   :  { %1535 = vmatprep.mubr.bf16.mxu1 %v9274_v37  ;;  %1576 = vmatprep.mubr.bf16.mxu0 %v9274_v37 }
 0x20f   :  { %1506 = vmatpush1.bf16.msra.mxu1 %v7623_v14  ;;  %1547 = vmatpush1.bf16.msra.mxu0 %v7628_v15 }
 0x210   :  { %1507 = vmatprep.subr.bf16.mxu1 %v7635_v17  ;;  %1548 = vmatprep.subr.bf16.mxu0 %v7640_v18 }
 0x213   :  { %1508 = vmatpush1.bf16.msra.mxu1 %v7651_v23  ;;  %1549 = vmatpush1.bf16.msra.mxu0 %v7656_v24 }
 0x214   :  { %1509 = vmatprep.subr.bf16.mxu1 %v7663_v26  ;;  %1550 = vmatprep.subr.bf16.mxu0 %v7668_v27 }
 0x217   :  { %1510 = vmatpush1.bf16.msra.mxu1 %v7675_v31  ;;  %1551 = vmatpush1.bf16.msra.mxu0 %v7680_v32 }
 0x218   :  { %1511 = vmatprep.subr.bf16.mxu1 %v7687_v34  ;;  %1552 = vmatprep.subr.bf16.mxu0 %v7692_v35 }
 0x21b   :  { %1512 = vmatpush1.bf16.msra.mxu1 %v7703_v40  ;;  %1553 = vmatpush1.bf16.msra.mxu0 %v7708_v41 }
 0x21c   :  { %1513 = vmatprep.subr.bf16.mxu1 %v7715_v43  ;;  %1554 = vmatprep.subr.bf16.mxu0 %v7720_v44 }
 0x21f   :  { %1514 = vmatpush1.bf16.msra.mxu1 %v7727_v48  ;;  %1555 = vmatpush1.bf16.msra.mxu0 %v7732_v49 }
 0x220   :  { %1515 = vmatprep.subr.bf16.mxu1 %v7739_v51  ;;  %1556 = vmatprep.subr.bf16.mxu0 %v7744_v52 }
 0x223   :  { %1516 = vmatpush1.bf16.msra.mxu1 %v7755_v55  ;;  %1557 = vmatpush1.bf16.msra.mxu0 %v7760_v59 }
 0x224   :  { %1517 = vmatprep.subr.bf16.mxu1 %v7767_v61  ;;  %1558 = vmatprep.subr.bf16.mxu0 %v7772_v62 }
 0x227   :  { %1518 = vmatpush1.bf16.msra.mxu1 %v7779_v63  ;;  %1559 = vmatpush1.bf16.msra.mxu0 %v7784_v0 }
 0x228   :  { %1813 = vmatprep.subr.bf16.mxu1 %v7580_v56  ;;  %1854 = vmatprep.subr.bf16.mxu0 %v7588_v58 }
 0x2ca   :  { %v1227_v11 = vpop.f32.mrf.mxu1  ;;  %v1268_v21 = vpop.f32.mrf.mxu0 }
 0x2cb   :  { %v1275_v53 = vadd.f32 %v1227_v11, %v7859_v33  ;;  %v1277_v58 = vadd.f32 %v1268_v21, %v7862_v36 }
 0x2cc   :  { %v1229_v54 = vpop.f32.mrf.mxu1  ;;  %v1270_v19 = vpop.f32.mrf.mxu0 }
 0x2cd   :  { %v6203_v1 = vmul.f32 -1.442695, %v1275_v53  ;;  %v1276_v29 = vadd.f32 %v1229_v54, %v7864_v39  ;;  %v1278_v56 = vadd.f32 %v1270_v19, %v7867_v42  ;;  %v8035_v19 = vld [vmem:[%s9237_s5 + $0xe0] ss:$16 sps:$4 sm:$0xff]  }
 0x2ce   :  { %v1231_v25 = vpop.f32.mrf.mxu1  ;;  %v1272_v38 = vpop.f32.mrf.mxu0 }
 0x2cf   :  { %7117 = vpow2.f32 %v6203_v1  ;;  %v6204_v46 = vmul.f32 -1.442695, %v1276_v29  ;;  %v6205_v50 = vmul.f32 -1.442695, %v1278_v56  ;;  %v8040_v1 = vld [vmem:[%s9237_s5 + $0xe8] ss:$16 sps:$4 sm:$0xff]  }
 0x2d0   :  { %v1232_v5 = vpop.f32.mrf.mxu1  ;;  %v1273_v13 = vpop.f32.mrf.mxu0  ;;  %v8049_v29 = vld [vmem:[%s9237_s5 + $0xc4] ss:$16 sps:$4 sm:$0xff]   ;;  %v8054_v25 = vld [vmem:[%s9237_s5 + $0xcc] ss:$16 sps:$4 sm:$0xff]   ;;  %v8059_v38 = vld [vmem:[%s9237_s5 + $0xc0] ss:$16 sps:$4 sm:$0xff]  }
 0x2d1   :  { %7119 = vpow2.f32 %v6204_v46  ;;  %v8064_v46 = vld [vmem:[%s9237_s5 + $0xc8] ss:$16 sps:$4 sm:$0xff]   ;;  %v8073_v5 = vld [vmem:[%s9237_s5 + $0xa4] ss:$16 sps:$4 sm:$0xff]   ;;  %v8078_v13 = vld [vmem:[%s9237_s5 + $0xac] ss:$16 sps:$4 sm:$0xff]  }
 0x2d2   :  { %7121 = vtanh.f32 %v1277_v58  ;;  %v8083_v56 = vld [vmem:[%s9237_s5 + $0xa0] ss:$16 sps:$4 sm:$0xff]   ;;  %v8088_v58 = vld [vmem:[%s9237_s5 + $0xa8] ss:$16 sps:$4 sm:$0xff]  }
 0x2d3   :  { %7123 = vpow2.f32 %v6205_v50  ;;  %v8097_v50 = vld [vmem:[%s9237_s5 + $0x84] ss:$16 sps:$4 sm:$0xff]  }
 0x2dc   :  { %v7118_v28 = vpop.eup %7117 }
 0x2dd   :  { %v1282_v16 = vadd.f32 1.0, %v7118_v28  ;;  %v8102_v28 = vld [vmem:[%s9237_s5 + $0x8c] ss:$16 sps:$4 sm:$0xff]  }
 0x2de   :  { %v7120_v33 = vpop.eup %7119 }
 0x2df   :  { %7125 = vrcp.f32 %v1282_v16  ;;  %v1288_v20 = vadd.f32 1.0, %v7120_v33  ;;  %v7122_v39 = vpop.eup %7121  ;;  %v8107_v16 = vld [vmem:[%s9237_s5 + $0x80] ss:$16 sps:$4 sm:$0xff]   ;;  %v8112_v33 = vld [vmem:[%s9237_s5 + $0x88] ss:$16 sps:$4 sm:$0xff]  }
 0x2e0   :  { %v7124_v30 = vpop.eup %7123 }
 0x2e1   :  { %7127 = vrcp.f32 %v1288_v20  ;;  %v1295_v45 = vadd.f32 1.0, %v7124_v30  ;;  %v8119_v20 = vld [vmem:[%s9237_s5 + $0x64] ss:$16 sps:$4 sm:$0xff]   ;;  %v8131_v30 = vld [vmem:[%s9237_s5 + $0x60] ss:$16 sps:$4 sm:$0xff]  }
 0x2e3   :  { %7129 = vrcp.f32 %v1295_v45  ;;  %v8155_v45 = vld [vmem:[%s9237_s5 + $0x40] ss:$16 sps:$4 sm:$0xff]  }
 0x2ec   :  { %v7126_v3 = vpop.eup %7125 }
 0x2ed   :  { %v1299_v12 = vmul.f32 %v7126_v3, %v7122_v39  ;;  %v8124_v39 = vld [vmem:[%s9237_s5 + $0x6c] ss:$16 sps:$4 sm:$0xff]   ;;  %v8136_v3 = vld [vmem:[%s9237_s5 + $0x68] ss:$16 sps:$4 sm:$0xff]  }
 0x2ee   :  { %v7128_v22 = vpop.eup %7127 }
 0x2ef   :  { %v1298_v11 = vmul.f32 %v7128_v22, %v7935_v57  ;;  %v8030_v57 = vld [vmem:[%s9237_s5 + $0xec] ss:$16 sps:$4 sm:$0xff]  }
 0x2f0   :  { %v7130_v36 = vpop.eup %7129  ;;  %v8148_v22 = vld [vmem:[%s9237_s5 + $0x4c] ss:$16 sps:$4 sm:$0xff]  }
 0x2f1   :  { %v7977_v42 = vadd.f32 %v1299_v12, %v1298_v11  ;;  %v8143_v12 = vld [vmem:[%s9237_s5 + $0x44] ss:$16 sps:$4 sm:$0xff]   ;;  %v8160_v11 = vld [vmem:[%s9237_s5 + $0x48] ss:$16 sps:$4 sm:$0xff]  }
 0x2f3   :  { %7131 = vtanh.f32 %v7977_v42 }
 0x300   :  { %v7132_v21 = vpop.eup %7131 }
 0x301   :  { %v1302_v53 = vmul.f32 %v7132_v21, %v7130_v36  ;;  %v8172_v36 = vld [vmem:[%s9237_s5 + $0x2c] ss:$16 sps:$4 sm:$0xff]   ;;  %v8179_v21 = vld [vmem:[%s9237_s5 + $0x20] ss:$16 sps:$4 sm:$0xff]  }
 0x303   :  { %v1303_v54 = vpack.c.bf16 %v1302_v53, %v1302_v53  ;;  %v8184_v53 = vld [vmem:[%s9237_s5 + $0x28] ss:$16 sps:$4 sm:$0xff]  }
 0x305   :  { %1305 = vst [vmem:[#allocation6 + $0x4] sm:$0xf] %v1303_v54  ;;  %1536 = vmatmul.mubr.bf16.vlgmr.msra.gmra.mxu1 %v1303_v54  ;;  %1577 = vmatmul.mubr.bf16.vlgmr.msra.gmra.mxu0 %v1303_v54  ;;  %v8191_v54 = vld [vmem:[%s9237_s5 + $0x4] ss:$16 sps:$4 sm:$0xff]  }
 0x306   :  { %1814 = vmatpush1.bf16.msra.mxu1 %v7601_v6  ;;  %1855 = vmatpush1.bf16.msra.mxu0 %v7606_v7 }
 0x307   :  { %1815 = vmatprep.subr.bf16.mxu1 %v7611_v9  ;;  %1856 = vmatprep.subr.bf16.mxu0 %v7616_v10 }
 0x308   :  { %1845 = vmatprep.mubr.bf16.mxu1 %v9274_v37  ;;  %1886 = vmatprep.mubr.bf16.mxu0 %v9274_v37 }
 0x30a   :  { %1816 = vmatpush1.bf16.msra.mxu1 %v7623_v14  ;;  %1857 = vmatpush1.bf16.msra.mxu0 %v7628_v15 }
 0x30b   :  { %1817 = vmatprep.subr.bf16.mxu1 %v7635_v17  ;;  %1858 = vmatprep.subr.bf16.mxu0 %v7640_v18 }
 0x30e   :  { %1818 = vmatpush1.bf16.msra.mxu1 %v7651_v23  ;;  %1859 = vmatpush1.bf16.msra.mxu0 %v7656_v24 }
 0x30f   :  { %1819 = vmatprep.subr.bf16.mxu1 %v7663_v26  ;;  %1860 = vmatprep.subr.bf16.mxu0 %v7668_v27 }
 0x312   :  { %1820 = vmatpush1.bf16.msra.mxu1 %v7675_v31  ;;  %1861 = vmatpush1.bf16.msra.mxu0 %v7680_v32  ;;  %v9275_v32 = vld [vmem:[#allocation10_spill] sm:$0xff] }
 0x313   :  { %1821 = vmatprep.subr.bf16.mxu1 %v7687_v34  ;;  %1862 = vmatprep.subr.bf16.mxu0 %v7692_v35 }
 0x316   :  { %1822 = vmatpush1.bf16.msra.mxu1 %v7703_v40  ;;  %1863 = vmatpush1.bf16.msra.mxu0 %v7708_v41 }
 0x317   :  { %1823 = vmatprep.subr.bf16.mxu1 %v7715_v43  ;;  %1864 = vmatprep.subr.bf16.mxu0 %v7720_v44 }
 0x31a   :  { %1824 = vmatpush1.bf16.msra.mxu1 %v7727_v48  ;;  %1865 = vmatpush1.bf16.msra.mxu0 %v7732_v49 }
 0x31b   :  { %1825 = vmatprep.subr.bf16.mxu1 %v7739_v51  ;;  %1866 = vmatprep.subr.bf16.mxu0 %v7744_v52 }
 0x31e   :  { %1826 = vmatpush1.bf16.msra.mxu1 %v7755_v55  ;;  %1867 = vmatpush1.bf16.msra.mxu0 %v7760_v59 }
 0x31f   :  { %1827 = vmatprep.subr.bf16.mxu1 %v7767_v61  ;;  %1868 = vmatprep.subr.bf16.mxu0 %v7772_v62 }
 0x322   :  { %1828 = vmatpush1.bf16.msra.mxu1 %v7779_v63  ;;  %1869 = vmatpush1.bf16.msra.mxu0 %v7784_v0 }
 0x323   :  { %2164 = vmatprep.subr.bf16.mxu0 %v8030_v57 }
 0x3c5   :  { %v1537_v6 = vpop.f32.mrf.mxu1  ;;  %v1578_v7 = vpop.f32.mrf.mxu0 }
 0x3c6   :  { %v1585_v9 = vadd.f32 %v1537_v6, %v7869_v47  ;;  %v1587_v34 = vadd.f32 %v1578_v7, %v9275_v32  ;;  %v8196_v6 = vld [vmem:[%s9237_s5 + $0xc] ss:$16 sps:$4 sm:$0xff]   ;;  %v8203_v7 = vld [vmem:[%s9237_s5] ss:$16 sps:$4 sm:$0xff]  }
 0x3c7   :  { %v1539_v10 = vpop.f32.mrf.mxu1  ;;  %v1580_v14 = vpop.f32.mrf.mxu0 }
 0x3c8   :  { %v6238_v15 = vmul.f32 -1.442695, %v1585_v9  ;;  %v1586_v17 = vadd.f32 %v1539_v10, %v7874_v60  ;;  %v1588_v31 = vadd.f32 %v1580_v14, %v7877_v2  ;;  %v8025_v2 = vld [vmem:[%s9237_s5 + $0xe4] ss:$16 sps:$4 sm:$0xff]   ;;  %v8208_v9 = vld [vmem:[%s9237_s5 + $0x8] ss:$16 sps:$4 sm:$0xff]  }
 0x3c9   :  { %v1541_v18 = vpop.f32.mrf.mxu1  ;;  %v1582_v23 = vpop.f32.mrf.mxu0  ;;  %2123 = vmatprep.subr.bf16.mxu1 %v8025_v2 }
 0x3ca   :  { %7133 = vpow2.f32 %v6238_v15  ;;  %v6239_v24 = vmul.f32 -1.442695, %v1586_v17  ;;  %v6240_v35 = vmul.f32 -1.442695, %v1588_v31  ;;  %v9276_v15 = vld [vmem:[#allocation11_spill] sm:$0xff] }
 0x3cb   :  { %v1542_v26 = vpop.f32.mrf.mxu1  ;;  %v1583_v27 = vpop.f32.mrf.mxu0 }
 0x3cc   :  { %7135 = vpow2.f32 %v6239_v24  ;;  %v9277_v26 = vld [vmem:[#allocation13_spill] sm:$0xff] }
 0x3cd   :  { %7137 = vtanh.f32 %v1587_v34 }
 0x3ce   :  { %7139 = vpow2.f32 %v6240_v35 }
 0x3d7   :  { %v7134_v40 = vpop.eup %7133 }
 0x3d8   :  { %v1592_v41 = vadd.f32 1.0, %v7134_v40 }
 0x3d9   :  { %v7136_v43 = vpop.eup %7135 }
 0x3da   :  { %7141 = vrcp.f32 %v1592_v41  ;;  %v1598_v44 = vadd.f32 1.0, %v7136_v43  ;;  %v7138_v48 = vpop.eup %7137  ;;  %v9278_v41 = vld [vmem:[#allocation14_spill] sm:$0xff] }
 0x3db   :  { %v7140_v49 = vpop.eup %7139 }
 0x3dc   :  { %7143 = vrcp.f32 %v1598_v44  ;;  %v1605_v59 = vadd.f32 1.0, %v7140_v49  ;;  %v9279_v44 = vld [vmem:[#allocation12_spill] sm:$0xff] }
 0x3de   :  { %7145 = vrcp.f32 %v1605_v59 }
 0x3e7   :  { %v7142_v51 = vpop.eup %7141 }
 0x3e8   :  { %v1609_v52 = vmul.f32 %v7142_v51, %v7138_v48 }
 0x3e9   :  { %v7144_v55 = vpop.eup %7143 }
 0x3ea   :  { %v1608_v61 = vmul.f32 %v7144_v55, %v7977_v42  ;;  %v8167_v42 = vld [vmem:[%s9237_s5 + $0x24] ss:$16 sps:$4 sm:$0xff]  }
 0x3eb   :  { %v7146_v63 = vpop.eup %7145 }
 0x3ec   :  { %v8017_v62 = vadd.f32 %v1609_v52, %v1608_v61 }
 0x3ee   :  { %7147 = vtanh.f32 %v8017_v62 }
 0x3fb   :  { %v7148_v0 = vpop.eup %7147 }
 0x3fc   :  { %v1612_v47 = vmul.f32 %v7148_v0, %v7146_v63 }
 0x3fe   :  { %v1613_v60 = vpack.c.bf16 %v1612_v47, %v1612_v47 }
 0x400   :  { %1615 = vst [vmem:[#allocation6 + $0x8] sm:$0xf] %v1613_v60  ;;  %1846 = vmatmul.mubr.bf16.vlgmr.msra.gmra.mxu1 %v1613_v60  ;;  %1887 = vmatmul.mubr.bf16.vlgmr.msra.gmra.mxu0 %v1613_v60 }
 0x401   :  { %2155 = vmatprep.mubr.bf16.mxu1 %v9274_v37  ;;  %2196 = vmatprep.mubr.bf16.mxu0 %v9274_v37 }
 0x402   :  { %2124 = vmatpush1.bf16.msra.mxu1 %v8035_v19  ;;  %2165 = vmatpush1.bf16.msra.mxu0 %v8040_v1 }
 0x403   :  { %2125 = vmatprep.subr.bf16.mxu1 %v8049_v29  ;;  %2166 = vmatprep.subr.bf16.mxu0 %v8054_v25 }
 0x406   :  { %2126 = vmatpush1.bf16.msra.mxu1 %v8059_v38  ;;  %2167 = vmatpush1.bf16.msra.mxu0 %v8064_v46 }
 0x407   :  { %2127 = vmatprep.subr.bf16.mxu1 %v8073_v5  ;;  %2168 = vmatprep.subr.bf16.mxu0 %v8078_v13 }
 0x40a   :  { %2128 = vmatpush1.bf16.msra.mxu1 %v8083_v56  ;;  %2169 = vmatpush1.bf16.msra.mxu0 %v8088_v58 }
 0x40b   :  { %2129 = vmatprep.subr.bf16.mxu1 %v8097_v50  ;;  %2170 = vmatprep.subr.bf16.mxu0 %v8102_v28 }
 0x40e   :  { %2130 = vmatpush1.bf16.msra.mxu1 %v8107_v16  ;;  %2171 = vmatpush1.bf16.msra.mxu0 %v8112_v33 }
 0x40f   :  { %2131 = vmatprep.subr.bf16.mxu1 %v8119_v20  ;;  %2172 = vmatprep.subr.bf16.mxu0 %v8124_v39 }
 0x412   :  { %2132 = vmatpush1.bf16.msra.mxu1 %v8131_v30  ;;  %2173 = vmatpush1.bf16.msra.mxu0 %v8136_v3 }
 0x413   :  { %2133 = vmatprep.subr.bf16.mxu1 %v8143_v12  ;;  %2174 = vmatprep.subr.bf16.mxu0 %v8148_v22 }
 0x416   :  { %2134 = vmatpush1.bf16.msra.mxu1 %v8155_v45  ;;  %2175 = vmatpush1.bf16.msra.mxu0 %v8160_v11 }
 0x417   :  { %2135 = vmatprep.subr.bf16.mxu1 %v8167_v42  ;;  %2176 = vmatprep.subr.bf16.mxu0 %v8172_v36 }
 0x41a   :  { %2136 = vmatpush1.bf16.msra.mxu1 %v8179_v21  ;;  %2177 = vmatpush1.bf16.msra.mxu0 %v8184_v53 }
 0x41b   :  { %2137 = vmatprep.subr.bf16.mxu1 %v8191_v54  ;;  %2178 = vmatprep.subr.bf16.mxu0 %v8196_v6 }
 0x41e   :  { %2138 = vmatpush1.bf16.msra.mxu1 %v8203_v7  ;;  %2179 = vmatpush1.bf16.msra.mxu0 %v8208_v9 }
 0x41f   :  { %2433 = vmatprep.subr.bf16.mxu1 %v8025_v2  ;;  %2474 = vmatprep.subr.bf16.mxu0 %v8030_v57 }
 0x4c0   :  { %v1847_v10 = vpop.f32.mrf.mxu1  ;;  %v1888_v14 = vpop.f32.mrf.mxu0 }
 0x4c1   :  { %v1895_v17 = vadd.f32 %v1847_v10, %v9276_v15  ;;  %v1897_v48 = vadd.f32 %v1888_v14, %v9279_v44 }
 0x4c2   :  { %v1849_v18 = vpop.f32.mrf.mxu1  ;;  %v1890_v23 = vpop.f32.mrf.mxu0 }
 0x4c3   :  { %v6273_v24 = vmul.f32 -1.442695, %v1895_v17  ;;  %v1896_v27 = vadd.f32 %v1849_v18, %v9277_v26  ;;  %v1898_v43 = vadd.f32 %v1890_v23, %v9278_v41 }
 0x4c4   :  { %v1851_v31 = vpop.f32.mrf.mxu1  ;;  %v1892_v32 = vpop.f32.mrf.mxu0 }
 0x4c5   :  { %7149 = vpow2.f32 %v6273_v24  ;;  %v6274_v34 = vmul.f32 -1.442695, %v1896_v27  ;;  %v6275_v49 = vmul.f32 -1.442695, %v1898_v43  ;;  %v9280_v27 = vld [vmem:[#allocation15_spill] sm:$0xff] }
 0x4c6   :  { %v1852_v35 = vpop.f32.mrf.mxu1  ;;  %v1893_v40 = vpop.f32.mrf.mxu0 }
 0x4c7   :  { %7151 = vpow2.f32 %v6274_v34  ;;  %v9281_v40 = vld [vmem:[#allocation17_spill] sm:$0xff] }
 0x4c8   :  { %7153 = vtanh.f32 %v1897_v48 }
 0x4c9   :  { %7155 = vpow2.f32 %v6275_v49 }
 0x4d2   :  { %v7150_v51 = vpop.eup %7149 }
 0x4d3   :  { %v1902_v52 = vadd.f32 1.0, %v7150_v51 }
 0x4d4   :  { %v7152_v55 = vpop.eup %7151 }
 0x4d5   :  { %7157 = vrcp.f32 %v1902_v52  ;;  %v1908_v59 = vadd.f32 1.0, %v7152_v55  ;;  %v7154_v61 = vpop.eup %7153  ;;  %v9282_v52 = vld [vmem:[#allocation18_spill] sm:$0xff] }
 0x4d6   :  { %v7156_v63 = vpop.eup %7155 }
 0x4d7   :  { %7159 = vrcp.f32 %v1908_v59  ;;  %v1915_v10 = vadd.f32 1.0, %v7156_v63  ;;  %v9283_v59 = vld [vmem:[#allocation16_spill] sm:$0xff] }
 0x4d9   :  { %7161 = vrcp.f32 %v1915_v10 }
 0x4e2   :  { %v7158_v0 = vpop.eup %7157 }
 0x4e3   :  { %v1919_v47 = vmul.f32 %v7158_v0, %v7154_v61 }
 0x4e4   :  { %v7160_v60 = vpop.eup %7159 }
 0x4e5   :  { %v1918_v15 = vmul.f32 %v7160_v60, %v8017_v62 }
 0x4e6   :  { %v7162_v14 = vpop.eup %7161 }
 0x4e7   :  { %v8221_v17 = vadd.f32 %v1919_v47, %v1918_v15 }
 0x4e9   :  { %7163 = vtanh.f32 %v8221_v17 }
 0x4f6   :  { %v7164_v18 = vpop.eup %7163 }
 0x4f7   :  { %v1922_v23 = vmul.f32 %v7164_v18, %v7162_v14 }
 0x4f9   :  { %v1923_v24 = vpack.c.bf16 %v1922_v23, %v1922_v23 }
 0x4fb   :  { %1925 = vst [vmem:[#allocation6 + $0xc] sm:$0xf] %v1923_v24  ;;  %2156 = vmatmul.mubr.bf16.vlgmr.msra.gmra.mxu1 %v1923_v24  ;;  %2197 = vmatmul.mubr.bf16.vlgmr.msra.gmra.mxu0 %v1923_v24 }
 0x4fc   :  { %2434 = vmatpush1.bf16.msra.mxu1 %v8035_v19  ;;  %2475 = vmatpush1.bf16.msra.mxu0 %v8040_v1 }
 0x4fd   :  { %2435 = vmatprep.subr.bf16.mxu1 %v8049_v29  ;;  %2476 = vmatprep.subr.bf16.mxu0 %v8054_v25 }
 0x4fe   :  { %2465 = vmatprep.mubr.bf16.mxu1 %v9274_v37  ;;  %2506 = vmatprep.mubr.bf16.mxu0 %v9274_v37 }
 0x500   :  { %2436 = vmatpush1.bf16.msra.mxu1 %v8059_v38  ;;  %2477 = vmatpush1.bf16.msra.mxu0 %v8064_v46 }
 0x501   :  { %2437 = vmatprep.subr.bf16.mxu1 %v8073_v5  ;;  %2478 = vmatprep.subr.bf16.mxu0 %v8078_v13 }
 0x504   :  { %2438 = vmatpush1.bf16.msra.mxu1 %v8083_v56  ;;  %2479 = vmatpush1.bf16.msra.mxu0 %v8088_v58 }
 0x505   :  { %2439 = vmatprep.subr.bf16.mxu1 %v8097_v50  ;;  %2480 = vmatprep.subr.bf16.mxu0 %v8102_v28 }
 0x508   :  { %2440 = vmatpush1.bf16.msra.mxu1 %v8107_v16  ;;  %2481 = vmatpush1.bf16.msra.mxu0 %v8112_v33 }
 0x509   :  { %2441 = vmatprep.subr.bf16.mxu1 %v8119_v20  ;;  %2482 = vmatprep.subr.bf16.mxu0 %v8124_v39 }
 0x50c   :  { %2442 = vmatpush1.bf16.msra.mxu1 %v8131_v30  ;;  %2483 = vmatpush1.bf16.msra.mxu0 %v8136_v3 }
 0x50d   :  { %2443 = vmatprep.subr.bf16.mxu1 %v8143_v12  ;;  %2484 = vmatprep.subr.bf16.mxu0 %v8148_v22 }
 0x510   :  { %2444 = vmatpush1.bf16.msra.mxu1 %v8155_v45  ;;  %2485 = vmatpush1.bf16.msra.mxu0 %v8160_v11 }
 0x511   :  { %2445 = vmatprep.subr.bf16.mxu1 %v8167_v42  ;;  %2486 = vmatprep.subr.bf16.mxu0 %v8172_v36 }
 0x514   :  { %2446 = vmatpush1.bf16.msra.mxu1 %v8179_v21  ;;  %2487 = vmatpush1.bf16.msra.mxu0 %v8184_v53 }
 0x515   :  { %2447 = vmatprep.subr.bf16.mxu1 %v8191_v54  ;;  %2488 = vmatprep.subr.bf16.mxu0 %v8196_v6 }
 0x518   :  { %2448 = vmatpush1.bf16.msra.mxu1 %v8203_v7  ;;  %2489 = vmatpush1.bf16.msra.mxu0 %v8208_v9 }
 0x519   :  { %2743 = vmatprep.subr.bf16.mxu1 %v8025_v2  ;;  %2784 = vmatprep.subr.bf16.mxu0 %v8030_v57 }
 0x5bb   :  { %v2157_v62 = vpop.f32.mrf.mxu1  ;;  %v2198_v26 = vpop.f32.mrf.mxu0 }
 0x5bc   :  { %v2205_v31 = vadd.f32 %v2157_v62, %v9280_v27  ;;  %v2207_v61 = vadd.f32 %v2198_v26, %v9283_v59 }
 0x5bd   :  { %v2159_v32 = vpop.f32.mrf.mxu1  ;;  %v2200_v34 = vpop.f32.mrf.mxu0 }
 0x5be   :  { %v6308_v35 = vmul.f32 -1.442695, %v2205_v31  ;;  %v2206_v41 = vadd.f32 %v2159_v32, %v9281_v40  ;;  %v2208_v55 = vadd.f32 %v2200_v34, %v9282_v52 }
 0x5bf   :  { %v2161_v43 = vpop.f32.mrf.mxu1  ;;  %v2202_v44 = vpop.f32.mrf.mxu0 }
 0x5c0   :  { %7165 = vpow2.f32 %v6308_v35  ;;  %v6309_v48 = vmul.f32 -1.442695, %v2206_v41  ;;  %v6310_v63 = vmul.f32 -1.442695, %v2208_v55  ;;  %v9284_v41 = vld [vmem:[#allocation19_spill] sm:$0xff] }
 0x5c1   :  { %v2162_v49 = vpop.f32.mrf.mxu1  ;;  %v2203_v51 = vpop.f32.mrf.mxu0 }
 0x5c2   :  { %7167 = vpow2.f32 %v6309_v48  ;;  %v9285_v51 = vld [vmem:[#allocation21_spill] sm:$0xff] }
 0x5c3   :  { %7169 = vtanh.f32 %v2207_v61 }
 0x5c4   :  { %7171 = vpow2.f32 %v6310_v63 }
 0x5cd   :  { %v7166_v0 = vpop.eup %7165 }
 0x5ce   :  { %v2212_v47 = vadd.f32 1.0, %v7166_v0 }
 0x5cf   :  { %v7168_v60 = vpop.eup %7167 }
 0x5d0   :  { %7173 = vrcp.f32 %v2212_v47  ;;  %v2218_v10 = vadd.f32 1.0, %v7168_v60  ;;  %v7170_v15 = vpop.eup %7169  ;;  %v9286_v47 = vld [vmem:[#allocation22_spill] sm:$0xff]  ;;  %v9287_v60 = vld [vmem:[#allocation20_spill] sm:$0xff] }
 0x5d1   :  { %v7172_v14 = vpop.eup %7171 }
 0x5d2   :  { %7175 = vrcp.f32 %v2218_v10  ;;  %v2225_v62 = vadd.f32 1.0, %v7172_v14 }
 0x5d4   :  { %7177 = vrcp.f32 %v2225_v62 }
 0x5dd   :  { %v7174_v18 = vpop.eup %7173 }
 0x5de   :  { %v2229_v23 = vmul.f32 %v7174_v18, %v7170_v15 }
 0x5df   :  { %v7176_v24 = vpop.eup %7175 }
 0x5e0   :  { %v2228_v27 = vmul.f32 %v7176_v24, %v8221_v17 }
 0x5e1   :  { %v7178_v26 = vpop.eup %7177 }
 0x5e2   :  { %v8263_v31 = vadd.f32 %v2229_v23, %v2228_v27 }
 0x5e4   :  { %7179 = vtanh.f32 %v8263_v31 }
 0x5f1   :  { %v7180_v32 = vpop.eup %7179 }
 0x5f2   :  { %v2232_v34 = vmul.f32 %v7180_v32, %v7178_v26 }
 0x5f4   :  { %v2233_v35 = vpack.c.bf16 %v2232_v34, %v2232_v34 }
 0x5f6   :  { %2235 = vst [vmem:[#allocation6 + $0x10] sm:$0xf] %v2233_v35  ;;  %2466 = vmatmul.mubr.bf16.vlgmr.msra.gmra.mxu1 %v2233_v35  ;;  %2507 = vmatmul.mubr.bf16.vlgmr.msra.gmra.mxu0 %v2233_v35 }
 0x5f7   :  { %2744 = vmatpush1.bf16.msra.mxu1 %v8035_v19  ;;  %2785 = vmatpush1.bf16.msra.mxu0 %v8040_v1 }
 0x5f8   :  { %2745 = vmatprep.subr.bf16.mxu1 %v8049_v29  ;;  %2786 = vmatprep.subr.bf16.mxu0 %v8054_v25 }
 0x5f9   :  { %2775 = vmatprep.mubr.bf16.mxu1 %v9274_v37  ;;  %2816 = vmatprep.mubr.bf16.mxu0 %v9274_v37 }
 0x5fb   :  { %2746 = vmatpush1.bf16.msra.mxu1 %v8059_v38  ;;  %2787 = vmatpush1.bf16.msra.mxu0 %v8064_v46 }
 0x5fc   :  { %2747 = vmatprep.subr.bf16.mxu1 %v8073_v5  ;;  %2788 = vmatprep.subr.bf16.mxu0 %v8078_v13 }
 0x5ff   :  { %2748 = vmatpush1.bf16.msra.mxu1 %v8083_v56  ;;  %2789 = vmatpush1.bf16.msra.mxu0 %v8088_v58 }
 0x600   :  { %2749 = vmatprep.subr.bf16.mxu1 %v8097_v50  ;;  %2790 = vmatprep.subr.bf16.mxu0 %v8102_v28 }
 0x603   :  { %2750 = vmatpush1.bf16.msra.mxu1 %v8107_v16  ;;  %2791 = vmatpush1.bf16.msra.mxu0 %v8112_v33 }
 0x604   :  { %2751 = vmatprep.subr.bf16.mxu1 %v8119_v20  ;;  %2792 = vmatprep.subr.bf16.mxu0 %v8124_v39 }
 0x607   :  { %2752 = vmatpush1.bf16.msra.mxu1 %v8131_v30  ;;  %2793 = vmatpush1.bf16.msra.mxu0 %v8136_v3 }
 0x608   :  { %2753 = vmatprep.subr.bf16.mxu1 %v8143_v12  ;;  %2794 = vmatprep.subr.bf16.mxu0 %v8148_v22 }
 0x60b   :  { %2754 = vmatpush1.bf16.msra.mxu1 %v8155_v45  ;;  %2795 = vmatpush1.bf16.msra.mxu0 %v8160_v11 }
 0x60c   :  { %2755 = vmatprep.subr.bf16.mxu1 %v8167_v42  ;;  %2796 = vmatprep.subr.bf16.mxu0 %v8172_v36 }
 0x60f   :  { %2756 = vmatpush1.bf16.msra.mxu1 %v8179_v21  ;;  %2797 = vmatpush1.bf16.msra.mxu0 %v8184_v53 }
 0x610   :  { %2757 = vmatprep.subr.bf16.mxu1 %v8191_v54  ;;  %2798 = vmatprep.subr.bf16.mxu0 %v8196_v6 }
 0x613   :  { %2758 = vmatpush1.bf16.msra.mxu1 %v8203_v7  ;;  %2799 = vmatpush1.bf16.msra.mxu0 %v8208_v9 }
 0x614   :  { %3053 = vmatprep.subr.bf16.mxu1 %v8025_v2  ;;  %3094 = vmatprep.subr.bf16.mxu0 %v8030_v57 }
 0x6b6   :  { %v2467_v17 = vpop.f32.mrf.mxu1  ;;  %v2508_v40 = vpop.f32.mrf.mxu0 }
 0x6b7   :  { %v2515_v43 = vadd.f32 %v2467_v17, %v9284_v41  ;;  %v2517_v57 = vadd.f32 %v2508_v40, %v9287_v60  ;;  %v6962_v60 = vld [vmem:[%s9240_s6 + $0xc8] ss:$16 sps:$4 sm:$0xff]  }
 0x6b8   :  { %v2469_v44 = vpop.f32.mrf.mxu1  ;;  %v2510_v48 = vpop.f32.mrf.mxu0 }
 0x6b9   :  { %v6343_v49 = vmul.f32 -1.442695, %v2515_v43  ;;  %v2516_v52 = vadd.f32 %v2469_v44, %v9285_v51  ;;  %v2518_v2 = vadd.f32 %v2510_v48, %v9286_v47  ;;  %v6964_v47 = vld [vmem:[%s9240_s6 + $0xcc] ss:$16 sps:$4 sm:$0xff]  }
 0x6ba   :  { %v2471_v55 = vpop.f32.mrf.mxu1  ;;  %v2512_v59 = vpop.f32.mrf.mxu0 }
 0x6bb   :  { %7181 = vpow2.f32 %v6343_v49  ;;  %v6344_v61 = vmul.f32 -1.442695, %v2516_v52  ;;  %v6345_v10 = vmul.f32 -1.442695, %v2518_v2  ;;  %v6953_v59 = vld [vmem:[%s9240_s6 + $0xe0] ss:$16 sps:$4 sm:$0xff]  }
 0x6bc   :  { %v2472_v63 = vpop.f32.mrf.mxu1  ;;  %v2513_v0 = vpop.f32.mrf.mxu0  ;;  %v6959_v2 = vld [vmem:[%s9240_s6 + $0xc0] ss:$16 sps:$4 sm:$0xff]  }
 0x6bd   :  { %7183 = vpow2.f32 %v6344_v61  ;;  %v6956_v61 = vld [vmem:[%s9240_s6 + $0xe8] ss:$16 sps:$4 sm:$0xff]   ;;  %v6961_v0 = vld [vmem:[%s9240_s6 + $0xc4] ss:$16 sps:$4 sm:$0xff]  }
 0x6be   :  { %7185 = vtanh.f32 %v2517_v57  ;;  %v6967_v57 = vld [vmem:[%s9240_s6 + $0xa4] ss:$16 sps:$4 sm:$0xff]  }
 0x6bf   :  { %7187 = vpow2.f32 %v6345_v10  ;;  %v6970_v10 = vld [vmem:[%s9240_s6 + $0xac] ss:$16 sps:$4 sm:$0xff]  }
 0x6c8   :  { %v7182_v15 = vpop.eup %7181 }
 0x6c9   :  { %v2522_v14 = vadd.f32 1.0, %v7182_v15  ;;  %v6965_v15 = vld [vmem:[%s9240_s6 + $0xa0] ss:$16 sps:$4 sm:$0xff]  }
 0x6ca   :  { %v7184_v18 = vpop.eup %7183 }
 0x6cb   :  { %7189 = vrcp.f32 %v2522_v14  ;;  %v2528_v23 = vadd.f32 1.0, %v7184_v18  ;;  %v7186_v24 = vpop.eup %7185  ;;  %v6968_v14 = vld [vmem:[%s9240_s6 + $0xa8] ss:$16 sps:$4 sm:$0xff]   ;;  %v6973_v18 = vld [vmem:[%s9240_s6 + $0x84] ss:$16 sps:$4 sm:$0xff]  }
 0x6cc   :  { %v7188_v62 = vpop.eup %7187 }
 0x6cd   :  { %7191 = vrcp.f32 %v2528_v23  ;;  %v2535_v34 = vadd.f32 1.0, %v7188_v62  ;;  %v6976_v23 = vld [vmem:[%s9240_s6 + $0x8c] ss:$16 sps:$4 sm:$0xff]   ;;  %v6974_v62 = vld [vmem:[%s9240_s6 + $0x88] ss:$16 sps:$4 sm:$0xff]  }
 0x6cf   :  { %7193 = vrcp.f32 %v2535_v34  ;;  %v6980_v34 = vld [vmem:[%s9240_s6 + $0x68] ss:$16 sps:$4 sm:$0xff]  }
 0x6d8   :  { %v7190_v27 = vpop.eup %7189 }
 0x6d9   :  { %v2539_v26 = vmul.f32 %v7190_v27, %v7186_v24  ;;  %v6971_v24 = vld [vmem:[%s9240_s6 + $0x80] ss:$16 sps:$4 sm:$0xff]   ;;  %v6979_v27 = vld [vmem:[%s9240_s6 + $0x64] ss:$16 sps:$4 sm:$0xff]  }
 0x6da   :  { %v7192_v32 = vpop.eup %7191 }
 0x6db   :  { %v2538_v35 = vmul.f32 %v7192_v32, %v8263_v31  ;;  %v6977_v32 = vld [vmem:[%s9240_s6 + $0x60] ss:$16 sps:$4 sm:$0xff]  }
 0x6dc   :  { %v7194_v40 = vpop.eup %7193 }
 0x6dd   :  { %v8305_v17 = vadd.f32 %v2539_v26, %v2538_v35  ;;  %v6982_v26 = vld [vmem:[%s9240_s6 + $0x6c] ss:$16 sps:$4 sm:$0xff]   ;;  %v6985_v35 = vld [vmem:[%s9240_s6 + $0x44] ss:$16 sps:$4 sm:$0xff]  }
 0x6df   :  { %7195 = vtanh.f32 %v8305_v17 }
 0x6ec   :  { %v7196_v41 = vpop.eup %7195 }
 0x6ed   :  { %v2542_v43 = vmul.f32 %v7196_v41, %v7194_v40  ;;  %v6983_v40 = vld [vmem:[%s9240_s6 + $0x40] ss:$16 sps:$4 sm:$0xff]   ;;  %v6986_v41 = vld [vmem:[%s9240_s6 + $0x48] ss:$16 sps:$4 sm:$0xff]  }
 0x6ef   :  { %v2543_v44 = vpack.c.bf16 %v2542_v43, %v2542_v43  ;;  %v6991_v43 = vld [vmem:[%s9240_s6 + $0x24] ss:$16 sps:$4 sm:$0xff]  }
 0x6f1   :  { %2545 = vst [vmem:[#allocation6 + $0x14] sm:$0xf] %v2543_v44  ;;  %2776 = vmatmul.mubr.bf16.vlgmr.msra.gmra.mxu1 %v2543_v44  ;;  %2817 = vmatmul.mubr.bf16.vlgmr.msra.gmra.mxu0 %v2543_v44  ;;  %v6994_v44 = vld [vmem:[%s9240_s6 + $0x2c] ss:$16 sps:$4 sm:$0xff]  }
 0x6f2   :  { %3054 = vmatpush1.bf16.msra.mxu1 %v8035_v19  ;;  %3095 = vmatpush1.bf16.msra.mxu0 %v8040_v1  ;;  %v6955_v19 = vld [vmem:[%s9240_s6 + $0xe4] ss:$16 sps:$4 sm:$0xff]   ;;  %v6958_v1 = vld [vmem:[%s9240_s6 + $0xec] ss:$16 sps:$4 sm:$0xff]  }
 0x6f3   :  { %3055 = vmatprep.subr.bf16.mxu1 %v8049_v29  ;;  %3096 = vmatprep.subr.bf16.mxu0 %v8054_v25 }
 0x6f4   :  { %3085 = vmatprep.mubr.bf16.mxu1 %v9274_v37  ;;  %3126 = vmatprep.mubr.bf16.mxu0 %v9274_v37 }
 0x6f6   :  { %3056 = vmatpush1.bf16.msra.mxu1 %v8059_v38  ;;  %3097 = vmatpush1.bf16.msra.mxu0 %v8064_v46  ;;  %v9288_v38 = vld [vmem:[#allocation23_spill] sm:$0xff] }
 0x6f7   :  { %3057 = vmatprep.subr.bf16.mxu1 %v8073_v5  ;;  %3098 = vmatprep.subr.bf16.mxu0 %v8078_v13 }
 0x6fa   :  { %3058 = vmatpush1.bf16.msra.mxu1 %v8083_v56  ;;  %3099 = vmatpush1.bf16.msra.mxu0 %v8088_v58  ;;  %v9289_v58 = vld [vmem:[#allocation25_spill] sm:$0xff] }
 0x6fb   :  { %3059 = vmatprep.subr.bf16.mxu1 %v8097_v50  ;;  %3100 = vmatprep.subr.bf16.mxu0 %v8102_v28 }
 0x6fe   :  { %3060 = vmatpush1.bf16.msra.mxu1 %v8107_v16  ;;  %3101 = vmatpush1.bf16.msra.mxu0 %v8112_v33 }
 0x6ff   :  { %3061 = vmatprep.subr.bf16.mxu1 %v8119_v20  ;;  %3102 = vmatprep.subr.bf16.mxu0 %v8124_v39 }
 0x702   :  { %3062 = vmatpush1.bf16.msra.mxu1 %v8131_v30  ;;  %3103 = vmatpush1.bf16.msra.mxu0 %v8136_v3  ;;  %v9290_v30 = vld [vmem:[#allocation26_spill] sm:$0xff] }
 0x703   :  { %3063 = vmatprep.subr.bf16.mxu1 %v8143_v12  ;;  %3104 = vmatprep.subr.bf16.mxu0 %v8148_v22  ;;  %v9291_v12 = vld [vmem:[#allocation24_spill] sm:$0xff] }
 0x706   :  { %3064 = vmatpush1.bf16.msra.mxu1 %v8155_v45  ;;  %3105 = vmatpush1.bf16.msra.mxu0 %v8160_v11 }
 0x707   :  { %3065 = vmatprep.subr.bf16.mxu1 %v8167_v42  ;;  %3106 = vmatprep.subr.bf16.mxu0 %v8172_v36 }
 0x70a   :  { %3066 = vmatpush1.bf16.msra.mxu1 %v8179_v21  ;;  %3107 = vmatpush1.bf16.msra.mxu0 %v8184_v53 }
 0x70b   :  { %3067 = vmatprep.subr.bf16.mxu1 %v8191_v54  ;;  %3108 = vmatprep.subr.bf16.mxu0 %v8196_v6 }
 0x70e   :  { %3068 = vmatpush1.bf16.msra.mxu1 %v8203_v7  ;;  %3109 = vmatpush1.bf16.msra.mxu0 %v8208_v9 }
 0x70f   :  { %3414 = vmatprep.subr.bf16.mxu1 %v6955_v19  ;;  %3487 = vmatprep.subr.bf16.mxu0 %v6958_v1  ;;  %v6989_v19 = vld [vmem:[%s9240_s6 + $0x20] ss:$16 sps:$4 sm:$0xff]   ;;  %v6992_v1 = vld [vmem:[%s9240_s6 + $0x28] ss:$16 sps:$4 sm:$0xff]  }
 0x7b1   :  { %v2777_v29 = vpop.f32.mrf.mxu1  ;;  %v2818_v25 = vpop.f32.mrf.mxu0 }
 0x7b2   :  { %v2825_v46 = vadd.f32 %v2777_v29, %v9288_v38  ;;  %v2827_v22 = vadd.f32 %v2818_v25, %v9291_v12  ;;  %v6997_v29 = vld [vmem:[%s9240_s6 + $0x4] ss:$16 sps:$4 sm:$0xff]   ;;  %v7000_v25 = vld [vmem:[%s9240_s6 + $0xc] ss:$16 sps:$4 sm:$0xff]   ;;  %v6995_v38 = vld [vmem:[%s9240_s6] ss:$16 sps:$4 sm:$0xff]  }
 0x7b3   :  { %v2779_v5 = vpop.f32.mrf.mxu1  ;;  %v2820_v13 = vpop.f32.mrf.mxu0  ;;  %v8507_v12 = vld [vmem:[%s9241_s7 + $0xac] ss:$16 sps:$4 sm:$0xff]  }
 0x7b4   :  { %v6378_v56 = vmul.f32 -1.442695, %v2825_v46  ;;  %v2826_v50 = vadd.f32 %v2779_v5, %v9289_v58  ;;  %v2828_v3 = vadd.f32 %v2820_v13, %v9290_v30  ;;  %v6998_v46 = vld [vmem:[%s9240_s6 + $0x8] ss:$16 sps:$4 sm:$0xff]   ;;  %v7001_v5 = vld [vmem:[#allocation6] sm:$0xff]  }
 0x7b5   :  { %v2781_v28 = vpop.f32.mrf.mxu1  ;;  %v2822_v16 = vpop.f32.mrf.mxu0  ;;  %v7002_v13 = vld [vmem:[#allocation6 + $0x8] sm:$0xff]   ;;  %v8455_v58 = vld [vmem:[%s9241_s7 + $0xe4] ss:$16 sps:$4 sm:$0xff]  }
 0x7b6   :  { %7197 = vpow2.f32 %v6378_v56  ;;  %v6379_v33 = vmul.f32 -1.442695, %v2826_v50  ;;  %v6380_v45 = vmul.f32 -1.442695, %v2828_v3  ;;  %v7003_v56 = vld [vmem:[#allocation6 + $0x10] sm:$0xff]  }
 0x7b7   :  { %v2782_v20 = vpop.f32.mrf.mxu1  ;;  %v2823_v39 = vpop.f32.mrf.mxu0  ;;  %v8460_v50 = vld [vmem:[%s9241_s7 + $0xe0] ss:$16 sps:$4 sm:$0xff]   ;;  %v8466_v28 = vld [vmem:[%s9241_s7 + $0xe8] ss:$16 sps:$4 sm:$0xff]   ;;  %v8471_v16 = vld [vmem:[%s9241_s7 + $0xec] ss:$16 sps:$4 sm:$0xff]  }
 0x7b8   :  { %7199 = vpow2.f32 %v6379_v33  ;;  %v8478_v33 = vld [vmem:[%s9241_s7 + $0xc4] ss:$16 sps:$4 sm:$0xff]   ;;  %v8483_v20 = vld [vmem:[%s9241_s7 + $0xcc] ss:$16 sps:$4 sm:$0xff]   ;;  %v8489_v39 = vld [vmem:[%s9241_s7 + $0xc0] ss:$16 sps:$4 sm:$0xff]  }
 0x7b9   :  { %7201 = vtanh.f32 %v2827_v22  ;;  %v8494_v30 = vld [vmem:[%s9241_s7 + $0xc8] ss:$16 sps:$4 sm:$0xff]   ;;  %v8502_v3 = vld [vmem:[%s9241_s7 + $0xa4] ss:$16 sps:$4 sm:$0xff]   ;;  %v8513_v22 = vld [vmem:[%s9241_s7 + $0xa0] ss:$16 sps:$4 sm:$0xff]  }
 0x7ba   :  { %7203 = vpow2.f32 %v6380_v45  ;;  %v8518_v45 = vld [vmem:[%s9241_s7 + $0xa8] ss:$16 sps:$4 sm:$0xff]  }
 0x7c3   :  { %v7198_v11 = vpop.eup %7197 }
 0x7c4   :  { %v2832_v42 = vadd.f32 1.0, %v7198_v11  ;;  %v8526_v11 = vld [vmem:[%s9241_s7 + $0x84] ss:$16 sps:$4 sm:$0xff]  }
 0x7c5   :  { %v7200_v36 = vpop.eup %7199 }
 0x7c6   :  { %7205 = vrcp.f32 %v2832_v42  ;;  %v2838_v21 = vadd.f32 1.0, %v7200_v36  ;;  %v7202_v53 = vpop.eup %7201  ;;  %v8531_v42 = vld [vmem:[%s9241_s7 + $0x8c] ss:$16 sps:$4 sm:$0xff]   ;;  %v8537_v36 = vld [vmem:[%s9241_s7 + $0x80] ss:$16 sps:$4 sm:$0xff]  }
 0x7c7   :  { %v7204_v54 = vpop.eup %7203 }
 0x7c8   :  { %7207 = vrcp.f32 %v2838_v21  ;;  %v2845_v31 = vadd.f32 1.0, %v7204_v54  ;;  %v8542_v21 = vld [vmem:[%s9241_s7 + $0x88] ss:$16 sps:$4 sm:$0xff]   ;;  %v8555_v54 = vld [vmem:[%s9241_s7 + $0x64] ss:$16 sps:$4 sm:$0xff]  }
 0x7ca   :  { %7209 = vrcp.f32 %v2845_v31  ;;  %v8577_v31 = vld [vmem:[%s9241_s7 + $0x40] ss:$16 sps:$4 sm:$0xff]  }
 0x7d3   :  { %v7206_v6 = vpop.eup %7205 }
 0x7d4   :  { %v2849_v7 = vmul.f32 %v7206_v6, %v7202_v53  ;;  %v8550_v53 = vld [vmem:[%s9241_s7 + $0x60] ss:$16 sps:$4 sm:$0xff]   ;;  %v8561_v6 = vld [vmem:[%s9241_s7 + $0x68] ss:$16 sps:$4 sm:$0xff]  }
 0x7d5   :  { %v7208_v9 = vpop.eup %7207 }
 0x7d6   :  { %v2848_v48 = vmul.f32 %v7208_v9, %v8305_v17  ;;  %v6988_v17 = vld [vmem:[%s9240_s6 + $0x4c] ss:$16 sps:$4 sm:$0xff]   ;;  %v8571_v9 = vld [vmem:[%s9241_s7 + $0x44] ss:$16 sps:$4 sm:$0xff]  }
 0x7d7   :  { %v7210_v51 = vpop.eup %7209 }
 0x7d8   :  { %v8351_v49 = vadd.f32 %v2849_v7, %v2848_v48  ;;  %v8566_v7 = vld [vmem:[%s9241_s7 + $0x6c] ss:$16 sps:$4 sm:$0xff]  }
 0x7d9   :  { %v8582_v48 = vld [vmem:[%s9241_s7 + $0x4c] ss:$16 sps:$4 sm:$0xff]  }
 0x7da   :  { %7211 = vtanh.f32 %v8351_v49 }
 0x7e7   :  { %v7212_v52 = vpop.eup %7211 }
 0x7e8   :  { %v2852_v55 = vmul.f32 %v7212_v52, %v7210_v51  ;;  %v8589_v51 = vld [vmem:[%s9241_s7 + $0x48] ss:$16 sps:$4 sm:$0xff]   ;;  %v8594_v52 = vld [vmem:[%s9241_s7 + $0x24] ss:$16 sps:$4 sm:$0xff]  }
 0x7ea   :  { %v2853_v63 = vpack.c.bf16 %v2852_v55, %v2852_v55  ;;  %v8601_v55 = vld [vmem:[%s9241_s7 + $0x20] ss:$16 sps:$4 sm:$0xff]  }
 0x7ec   :  { %2855 = vst [vmem:[#allocation6 + $0x18] sm:$0xf] %v2853_v63  ;;  %3086 = vmatmul.mubr.bf16.vlgmr.msra.gmra.mxu1 %v2853_v63  ;;  %3127 = vmatmul.mubr.bf16.vlgmr.msra.gmra.mxu0 %v2853_v63  ;;  %v8620_v63 = vld [vmem:[%s9241_s7 + $0x4] ss:$16 sps:$4 sm:$0xff]  }
 0x7ed   :  { %3415 = vmatpush1.bf16.msra.mxu1 %v6953_v59  ;;  %3488 = vmatpush1.bf16.msra.mxu0 %v6956_v61  ;;  %v8609_v59 = vld [vmem:[%s9241_s7 + $0x2c] ss:$16 sps:$4 sm:$0xff]   ;;  %v8615_v61 = vld [vmem:[%s9241_s7 + $0x28] ss:$16 sps:$4 sm:$0xff]  }
 0x7ee   :  { %3416 = vmatprep.subr.bf16.mxu1 %v6961_v0  ;;  %3489 = vmatprep.subr.bf16.mxu0 %v6964_v47  ;;  %v8626_v0 = vld [vmem:[%s9241_s7] ss:$16 sps:$4 sm:$0xff]   ;;  %v8631_v47 = vld [vmem:[%s9241_s7 + $0xc] ss:$16 sps:$4 sm:$0xff]  }
 0x7ef   :  { %3446 = vmatprep.mubr.bf16.mxu1 %v9274_v37  ;;  %3519 = vmatprep.mubr.bf16.mxu0 %v9274_v37 }
 0x7f1   :  { %3417 = vmatpush1.bf16.msra.mxu1 %v6959_v2  ;;  %3490 = vmatpush1.bf16.msra.mxu0 %v6962_v60  ;;  %v8637_v2 = vld [vmem:[%s9241_s7 + $0x8] ss:$16 sps:$4 sm:$0xff]  }
 0x7f2   :  { %3418 = vmatprep.subr.bf16.mxu1 %v6967_v57  ;;  %3491 = vmatprep.subr.bf16.mxu0 %v6970_v10  ;;  %v9292_v10 = vld [vmem:[#allocation27_spill] sm:$0xff] }
 0x7f5   :  { %3419 = vmatpush1.bf16.msra.mxu1 %v6965_v15  ;;  %3492 = vmatpush1.bf16.msra.mxu0 %v6968_v14 }
 0x7f6   :  { %3420 = vmatprep.subr.bf16.mxu1 %v6973_v18  ;;  %3493 = vmatprep.subr.bf16.mxu0 %v6976_v23 }
 0x7f9   :  { %3421 = vmatpush1.bf16.msra.mxu1 %v6971_v24  ;;  %3494 = vmatpush1.bf16.msra.mxu0 %v6974_v62 }
 0x7fa   :  { %3422 = vmatprep.subr.bf16.mxu1 %v6979_v27  ;;  %3495 = vmatprep.subr.bf16.mxu0 %v6982_v26 }
 0x7fd   :  { %3423 = vmatpush1.bf16.msra.mxu1 %v6977_v32  ;;  %3496 = vmatpush1.bf16.msra.mxu0 %v6980_v34 }
 0x7fe   :  { %3424 = vmatprep.subr.bf16.mxu1 %v6985_v35  ;;  %3497 = vmatprep.subr.bf16.mxu0 %v6988_v17  ;;  %v9293_v17 = vld [vmem:[#allocation28_spill] sm:$0xff] }
 0x801   :  { %3425 = vmatpush1.bf16.msra.mxu1 %v6983_v40  ;;  %3498 = vmatpush1.bf16.msra.mxu0 %v6986_v41 }
 0x802   :  { %3426 = vmatprep.subr.bf16.mxu1 %v6991_v43  ;;  %3499 = vmatprep.subr.bf16.mxu0 %v6994_v44 }
 0x805   :  { %3427 = vmatpush1.bf16.msra.mxu1 %v6989_v19  ;;  %3500 = vmatpush1.bf16.msra.mxu0 %v6992_v1 }
 0x806   :  { %3428 = vmatprep.subr.bf16.mxu1 %v6997_v29  ;;  %3501 = vmatprep.subr.bf16.mxu0 %v7000_v25 }
 0x809   :  { %3429 = vmatpush1.bf16.msra.mxu1 %v6995_v38  ;;  %3502 = vmatpush1.bf16.msra.mxu0 %v6998_v46 }
 0x80a   :  { %3791 = vmatprep.subr.bf16.mxu1 %v8455_v58  ;;  %3832 = vmatprep.subr.bf16.mxu0 %v8471_v16 }
 0x80c   :  { %3447 = vmatmul.mubr.bf16.vlgmr.msra.gmra.mxu1 %v7001_v5  ;;  %3520 = vmatmul.mubr.bf16.vlgmr.msra.gmra.mxu0 %v7001_v5 }
 0x80d   :  { %3456 = vmatprep.mubr.bf16.mxu1 %v9274_v37  ;;  %3529 = vmatprep.mubr.bf16.mxu0 %v9274_v37 }
 0x80e   :  { %3792 = vmatpush1.bf16.msra.mxu1 %v8460_v50  ;;  %3833 = vmatpush1.bf16.msra.mxu0 %v8466_v28 }
 0x80f   :  { %3793 = vmatprep.subr.bf16.mxu1 %v8478_v33  ;;  %3834 = vmatprep.subr.bf16.mxu0 %v8483_v20 }
 0x812   :  { %3794 = vmatpush1.bf16.msra.mxu1 %v8489_v39  ;;  %3835 = vmatpush1.bf16.msra.mxu0 %v8494_v30 }
 0x813   :  { %3795 = vmatprep.subr.bf16.mxu1 %v8502_v3  ;;  %3836 = vmatprep.subr.bf16.mxu0 %v8507_v12 }
 0x814   :  { %3457 = vmatmul.mubr.bf16.gmra.mxu1 %v7002_v13  ;;  %3530 = vmatmul.mubr.bf16.gmra.mxu0 %v7002_v13 }
 0x815   :  { %3466 = vmatprep.mubr.bf16.mxu1 %v9274_v37  ;;  %3539 = vmatprep.mubr.bf16.mxu0 %v9274_v37 }
 0x816   :  { %3796 = vmatpush1.bf16.msra.mxu1 %v8513_v22  ;;  %3837 = vmatpush1.bf16.msra.mxu0 %v8518_v45 }
 0x817   :  { %3797 = vmatprep.subr.bf16.mxu1 %v8526_v11  ;;  %3838 = vmatprep.subr.bf16.mxu0 %v8531_v42 }
 0x81a   :  { %3798 = vmatpush1.bf16.msra.mxu1 %v8537_v36  ;;  %3839 = vmatpush1.bf16.msra.mxu0 %v8542_v21 }
 0x81b   :  { %3799 = vmatprep.subr.bf16.mxu1 %v8555_v54  ;;  %3840 = vmatprep.subr.bf16.mxu0 %v8566_v7 }
 0x81c   :  { %3467 = vmatmul.mubr.bf16.gmra.mxu1 %v7003_v56  ;;  %3540 = vmatmul.mubr.bf16.gmra.mxu0 %v7003_v56 }
 0x81d   :  { %3476 = vmatprep.mubr.bf16.mxu1 %v9274_v37  ;;  %3549 = vmatprep.mubr.bf16.mxu0 %v9274_v37 }
 0x81e   :  { %3800 = vmatpush1.bf16.msra.mxu1 %v8550_v53  ;;  %3841 = vmatpush1.bf16.msra.mxu0 %v8561_v6 }
 0x81f   :  { %3801 = vmatprep.subr.bf16.mxu1 %v8571_v9  ;;  %3842 = vmatprep.subr.bf16.mxu0 %v8582_v48 }
 0x822   :  { %3802 = vmatpush1.bf16.msra.mxu1 %v8577_v31  ;;  %3843 = vmatpush1.bf16.msra.mxu0 %v8589_v51 }
 0x823   :  { %3803 = vmatprep.subr.bf16.mxu1 %v8594_v52  ;;  %3844 = vmatprep.subr.bf16.mxu0 %v8609_v59 }
 0x826   :  { %3804 = vmatpush1.bf16.msra.mxu1 %v8601_v55  ;;  %3845 = vmatpush1.bf16.msra.mxu0 %v8615_v61 }
 0x827   :  { %3805 = vmatprep.subr.bf16.mxu1 %v8620_v63  ;;  %3846 = vmatprep.subr.bf16.mxu0 %v8631_v47 }
 0x82a   :  { %3806 = vmatpush1.bf16.msra.mxu1 %v8626_v0  ;;  %3847 = vmatpush1.bf16.msra.mxu0 %v8637_v2 }
 0x82b   :  { %4100 = vmatprep.subr.bf16.mxu1 %v8455_v58  ;;  %4141 = vmatprep.subr.bf16.mxu0 %v8471_v16 }
 0x8ac   :  { %v3087_v60 = vpop.f32.mrf.mxu1  ;;  %v3128_v57 = vpop.f32.mrf.mxu0 }
 0x8ad   :  { %v3135_v15 = vadd.f32 %v3087_v60, %v9292_v10  ;;  %v3137_v40 = vadd.f32 %v3128_v57, %v9293_v17 }
 0x8ae   :  { %v3089_v14 = vpop.f32.mrf.mxu1  ;;  %v3130_v18 = vpop.f32.mrf.mxu0 }
 0x8af   :  { %v6413_v23 = vmul.f32 -1.442695, %v3135_v15  ;;  %v3136_v24 = vadd.f32 %v3089_v14, %v7925_v4  ;;  %v3138_v35 = vadd.f32 %v3130_v18, %v7928_v8  ;;  %v9294_v14 = vmov 0.0|0.0  }
 0x8b0   :  { %v3091_v62 = vpop.f32.mrf.mxu1  ;;  %v3132_v27 = vpop.f32.mrf.mxu0 }
 0x8b1   :  { %7213 = vpow2.f32 %v6413_v23  ;;  %v6414_v26 = vmul.f32 -1.442695, %v3136_v24  ;;  %v6415_v41 = vmul.f32 -1.442695, %v3138_v35 }
 0x8b2   :  { %v3092_v32 = vpop.f32.mrf.mxu1  ;;  %v3133_v34 = vpop.f32.mrf.mxu0 }
 0x8b3   :  { %7215 = vpow2.f32 %v6414_v26 }
 0x8b4   :  { %7217 = vtanh.f32 %v3137_v40 }
 0x8b5   :  { %7219 = vpow2.f32 %v6415_v41 }
 0x8be   :  { %v7214_v43 = vpop.eup %7213 }
 0x8bf   :  { %v3142_v44 = vadd.f32 1.0, %v7214_v43 }
 0x8c0   :  { %v7216_v19 = vpop.eup %7215 }
 0x8c1   :  { %7221 = vrcp.f32 %v3142_v44  ;;  %v3148_v1 = vadd.f32 1.0, %v7216_v19  ;;  %v7218_v4 = vpop.eup %7217 }
 0x8c2   :  { %v7220_v29 = vpop.eup %7219 }
 0x8c3   :  { %7223 = vrcp.f32 %v3148_v1  ;;  %v3155_v5 = vadd.f32 1.0, %v7220_v29 }
 0x8c5   :  { %7225 = vrcp.f32 %v3155_v5 }
 0x8cc   :  { %v3521_v18 = vpop.f32.mrf.mxu0 }
 0x8ce   :  { %v7222_v25 = vpop.eup %7221  ;;  %v3523_v24 = vpop.f32.mrf.mxu0 }
 0x8cf   :  { %v3159_v38 = vmul.f32 %v7222_v25, %v7218_v4 }
 0x8d0   :  { %v7224_v46 = vpop.eup %7223  ;;  %v8691_v27 = vpop.f32.mrf.mxu0 }
 0x8d1   :  { %v3158_v13 = vmul.f32 %v7224_v46, %v8351_v49  ;;  %v3448_v49 = vpop.f32.mrf.mxu1 }
 0x8d2   :  { %v7226_v56 = vpop.eup %7225  ;;  %v8695_v32 = vpop.f32.mrf.mxu0 }
 0x8d3   :  { %v3160_v8 = vadd.f32 %v3159_v38, %v3158_v13  ;;  %v3450_v23 = vpop.f32.mrf.mxu1 }
 0x8d4   :  { %v8699_v35 = vpop.f32.mrf.mxu0 }
 0x8d5   :  { %7227 = vtanh.f32 %v3160_v8  ;;  %v8689_v62 = vpop.f32.mrf.mxu1  ;;  %9295 = vst [vmem:[#allocation10_spill] sm:$0xff] %v8699_v35  ;;  %v3208_v8 = vld [vmem:[%s9242_s8] sm:$0xf] }
 0x8d6   :  { %v8703_v40 = vpop.f32.mrf.mxu0 }
 0x8d7   :  { %v8693_v26 = vpop.f32.mrf.mxu1 }
 0x8d8   :  { %v8707_v43 = vpop.f32.mrf.mxu0 }
 0x8d9   :  { %v8697_v34 = vpop.f32.mrf.mxu1  ;;  %9297 = vst [vmem:[#allocation13_spill] sm:$0xff] %v8707_v43 }
 0x8da   :  { %v8711_v19 = vpop.f32.mrf.mxu0 }
 0x8db   :  { %v8701_v17 = vpop.f32.mrf.mxu1  ;;  %9299 = vst [vmem:[#allocation12_spill] sm:$0xff] %v8711_v19 }
 0x8dc   :  { %v8715_v4 = vpop.f32.mrf.mxu0 }
 0x8dd   :  { %v8705_v41 = vpop.f32.mrf.mxu1  ;;  %9301 = vst [vmem:[#allocation17_spill] sm:$0xff] %v8715_v4 }
 0x8de   :  { %9296 = vst [vmem:[#allocation11_spill] sm:$0xff] %v8705_v41  ;;  %v8719_v25 = vpop.f32.mrf.mxu0 }
 0x8df   :  { %v8709_v44 = vpop.f32.mrf.mxu1  ;;  %9303 = vst [vmem:[#allocation16_spill] sm:$0xff] %v8719_v25 }
 0x8e0   :  { %9298 = vst [vmem:[#allocation14_spill] sm:$0xff] %v8709_v44  ;;  %v8723_v46 = vpop.f32.mrf.mxu0 }
 0x8e1   :  { %v8713_v1 = vpop.f32.mrf.mxu1  ;;  %9305 = vst [vmem:[#allocation21_spill] sm:$0xff] %v8723_v46 }
 0x8e2   :  { %v7228_v60 = vpop.eup %7227  ;;  %9300 = vst [vmem:[#allocation15_spill] sm:$0xff] %v8713_v1  ;;  %v8727_v13 = vpop.f32.mrf.mxu0 }
 0x8e3   :  { %v3162_v57 = vmul.f32 %v7228_v60, %v7226_v56  ;;  %v8717_v29 = vpop.f32.mrf.mxu1  ;;  %9307 = vst [vmem:[#allocation20_spill] sm:$0xff] %v8727_v13 }
 0x8e4   :  { %9302 = vst [vmem:[#allocation18_spill] sm:$0xff] %v8717_v29 }
 0x8e5   :  { %v3163_v10 = vpack.c.bf16 %v3162_v57, %v3162_v57  ;;  %v8721_v38 = vpop.f32.mrf.mxu1 }
 0x8e6   :  { %9304 = vst [vmem:[#allocation19_spill] sm:$0xff] %v8721_v38 }
 0x8e7   :  { %3165 = vst [vmem:[#allocation6 + $0x1c] sm:$0xf] %v3163_v10  ;;  %v8725_v5 = vpop.f32.mrf.mxu1 }
 0x8e8   :  { %9306 = vst [vmem:[#allocation22_spill] sm:$0xff] %v8725_v5 }
 0x8ee   :  { %v7043_v15 = vld [vmem:[#allocation6 + $0x18] sm:$0xff]  }
 0x8ef   :  { %3477 = vmatmul.mubr.bf16.gmra.mxu1 %v7043_v15  ;;  %3550 = vmatmul.mubr.bf16.gmra.mxu0 %v7043_v15  ;;  %v9312_v15 = vld [vmem:[#allocation9_spill] sm:$0xff] }
 0x8f0   :  { %3823 = vmatprep.mubr.bf16.mxu1 %v9274_v37  ;;  %3864 = vmatprep.mubr.bf16.mxu0 %v9274_v37  ;;  %v9316_v13 = vsub.s32 1, %v9312_v15  ;;  %v9319_v41 = vsub.s32 3, %v9312_v15 }
 0x8f2   :  { %v8750_v4 = vrot.slane %v3208_v8, %v9316_v13 }
 0x8f4   :  { %v3451_v29 = vadd.f32 %v3450_v23, %v8750_v4  ;;  %v9320_v23 = vsub.s32 2, %v9312_v15 }
 0x8f7   :  { %3824 = vmatmul.mubr.bf16.vlgmr.msra.gmra.mxu1 %v9294_v14  ;;  %3865 = vmatmul.mubr.bf16.vlgmr.msra.gmra.mxu0 %v9294_v14  ;;  %v9313_v14 = vsub.s32 0, %v9312_v15 }
 0x8f8   :  { %4101 = vmatpush1.bf16.msra.mxu1 %v8460_v50  ;;  %4142 = vmatpush1.bf16.msra.mxu0 %v8466_v28 }
 0x8f9   :  { %4102 = vmatprep.subr.bf16.mxu1 %v8478_v33  ;;  %4143 = vmatprep.subr.bf16.mxu0 %v8483_v20  ;;  %v8742_v38 = vrot.slane %v3208_v8, %v9313_v14 }
 0x8fa   :  { %4132 = vmatprep.mubr.bf16.mxu1 %v9274_v37  ;;  %4173 = vmatprep.mubr.bf16.mxu0 %v9274_v37 }
 0x8fc   :  { %4103 = vmatpush1.bf16.msra.mxu1 %v8489_v39  ;;  %4144 = vmatpush1.bf16.msra.mxu0 %v8494_v30 }
 0x8fd   :  { %4104 = vmatprep.subr.bf16.mxu1 %v8502_v3  ;;  %4145 = vmatprep.subr.bf16.mxu0 %v8507_v12 }
 0x900   :  { %4105 = vmatpush1.bf16.msra.mxu1 %v8513_v22  ;;  %4146 = vmatpush1.bf16.msra.mxu0 %v8518_v45 }
 0x901   :  { %4106 = vmatprep.subr.bf16.mxu1 %v8526_v11  ;;  %4147 = vmatprep.subr.bf16.mxu0 %v8531_v42 }
 0x904   :  { %4107 = vmatpush1.bf16.msra.mxu1 %v8537_v36  ;;  %4148 = vmatpush1.bf16.msra.mxu0 %v8542_v21 }
 0x905   :  { %4108 = vmatprep.subr.bf16.mxu1 %v8555_v54  ;;  %4149 = vmatprep.subr.bf16.mxu0 %v8566_v7 }
 0x908   :  { %4109 = vmatpush1.bf16.msra.mxu1 %v8550_v53  ;;  %4150 = vmatpush1.bf16.msra.mxu0 %v8561_v6 }
 0x909   :  { %4110 = vmatprep.subr.bf16.mxu1 %v8571_v9  ;;  %4151 = vmatprep.subr.bf16.mxu0 %v8582_v48 }
 0x90c   :  { %4111 = vmatpush1.bf16.msra.mxu1 %v8577_v31  ;;  %4152 = vmatpush1.bf16.msra.mxu0 %v8589_v51 }
 0x90d   :  { %4112 = vmatprep.subr.bf16.mxu1 %v8594_v52  ;;  %4153 = vmatprep.subr.bf16.mxu0 %v8609_v59 }
 0x910   :  { %4113 = vmatpush1.bf16.msra.mxu1 %v8601_v55  ;;  %4154 = vmatpush1.bf16.msra.mxu0 %v8615_v61 }
 0x911   :  { %4114 = vmatprep.subr.bf16.mxu1 %v8620_v63  ;;  %4155 = vmatprep.subr.bf16.mxu0 %v8631_v47 }
 0x914   :  { %4115 = vmatpush1.bf16.msra.mxu1 %v8626_v0  ;;  %4156 = vmatpush1.bf16.msra.mxu0 %v8637_v2 }
 0x915   :  { %4410 = vmatprep.subr.bf16.mxu1 %v8455_v58  ;;  %4451 = vmatprep.subr.bf16.mxu0 %v8471_v16 }
 0x9af   :  { %v8732_v56 = vpop.f32.mrf.mxu1  ;;  %v8734_v60 = vpop.f32.mrf.mxu0 }
 0x9b0   :  { %9308 = vst [vmem:[#allocation23_spill] sm:$0xff] %v8732_v56  ;;  %9309 = vst [vmem:[#allocation25_spill] sm:$0xff] %v8734_v60  ;;  %v3449_v60 = vadd.f32 %v3448_v49, %v8742_v38 }
 0x9b1   :  { %v8736_v57 = vpop.f32.mrf.mxu1  ;;  %v8738_v10 = vpop.f32.mrf.mxu0 }
 0x9b2   :  { %9310 = vst [vmem:[#allocation26_spill] sm:$0xff] %v8736_v57  ;;  %9311 = vst [vmem:[#allocation24_spill] sm:$0xff] %v8738_v10 }
 0x9b3   :  { %v8744_v46 = vpop.f32.mrf.mxu1  ;;  %v8746_v5 = vpop.f32.mrf.mxu0 }
 0x9b4   :  { %9314 = vst [vmem:[#allocation27_spill] sm:$0xff] %v8744_v46  ;;  %9315 = vst [vmem:[#allocation28_spill] sm:$0xff] %v8746_v5 }
 0x9b5   :  { %v8752_v25 = vpop.f32.mrf.mxu1  ;;  %v8754_v56 = vpop.f32.mrf.mxu0 }
 0x9b6   :  { %9317 = vst [vmem:[#allocation9_spill] sm:$0xff] %v8752_v25  ;;  %9318 = vst [vmem:[#allocation29_spill] sm:$0xff] %v8754_v56  ;;  %v8760_v25 = vrot.slane %v3208_v8, %v9319_v41 }
 0x9b7   :  { %v3825_v57 = vpop.f32.mrf.mxu1  ;;  %v3866_v10 = vpop.f32.mrf.mxu0 }
 0x9b8   :  { %v3873_v14 = vadd.f32 %v3825_v57, %v3449_v60  ;;  %v3524_v49 = vadd.f32 %v3523_v24, %v8760_v25  ;;  %v8765_v60 = vrot.slane %v3208_v8, %v9320_v23 }
 0x9b9   :  { %v3827_v1 = vpop.f32.mrf.mxu1  ;;  %v3868_v43 = vpop.f32.mrf.mxu0 }
 0x9ba   :  { %v6484_v46 = vmul.f32 -1.442695, %v3873_v14  ;;  %v3874_v19 = vadd.f32 %v3827_v1, %v3451_v29  ;;  %v3876_v57 = vadd.f32 %v3868_v43, %v3524_v49  ;;  %v3522_v1 = vadd.f32 %v3521_v18, %v8765_v60 }
 0x9bb   :  { %v3829_v5 = vpop.f32.mrf.mxu1  ;;  %v3870_v44 = vpop.f32.mrf.mxu0 }
 0x9bc   :  { %7229 = vpow2.f32 %v6484_v46  ;;  %v6485_v13 = vmul.f32 -1.442695, %v3874_v19  ;;  %v6486_v29 = vmul.f32 -1.442695, %v3876_v57  ;;  %v3875_v46 = vadd.f32 %v3866_v10, %v3522_v1 }
 0x9bd   :  { %v3830_v56 = vpop.f32.mrf.mxu1  ;;  %v3871_v35 = vpop.f32.mrf.mxu0  ;;  %v3453_v57 = vadd.f32 %v8689_v62, %v8742_v38 }
 0x9be   :  { %7231 = vpow2.f32 %v6485_v13 }
 0x9bf   :  { %7233 = vpow2.f32 %v6486_v29 }
 0x9c9   :  { %v7230_v44 = vpop.eup %7229 }
 0x9ca   :  { %v3880_v19 = vadd.f32 1.0, %v7230_v44  ;;  %v3455_v44 = vadd.f32 %v8693_v26, %v8750_v4 }
 0x9cb   :  { %v7232_v5 = vpop.eup %7231 }
 0x9cc   :  { %7235 = vrcp.f32 %v3880_v19  ;;  %v3886_v41 = vadd.f32 1.0, %v7232_v5  ;;  %v7234_v35 = vpop.eup %7233 }
 0x9cd   :  { %7237 = vtanh.f32 %v3875_v46  ;;  %v3893_v15 = vadd.f32 1.0, %v7234_v35 }
 0x9ce   :  { %7239 = vrcp.f32 %v3886_v41 }
 0x9cf   :  { %7241 = vrcp.f32 %v3893_v15 }
 0x9d9   :  { %v7236_v56 = vpop.eup %7235 }
 0x9da   :  { %v7238_v24 = vpop.eup %7237 }
 0x9db   :  { %v7240_v14 = vpop.eup %7239  ;;  %v3897_v13 = vmul.f32 %v7238_v24, %v7236_v56 }
 0x9dc   :  { %v3896_v8 = vmul.f32 0.0, %v7240_v14  ;;  %v7242_v18 = vpop.eup %7241 }
 0x9de   :  { %v8768_v43 = vadd.f32 %v3897_v13, %v3896_v8  ;;  %v3526_v8 = vadd.f32 %v8691_v27, %v8765_v60 }
 0x9e0   :  { %7243 = vtanh.f32 %v8768_v43 }
 0x9ed   :  { %v7244_v10 = vpop.eup %7243 }
 0x9ee   :  { %v3900_v49 = vmul.f32 %v7244_v10, %v7242_v18 }
 0x9f0   :  { %v3901_v23 = vpack.c.bf16 %v3900_v49, %v3900_v49 }
 0x9f2   :  { %3902 = vst [vmem:[%s9243_s9] sm:$0xf] %v3901_v23  ;;  %4133 = vmatmul.mubr.bf16.vlgmr.msra.gmra.mxu1 %v3901_v23  ;;  %4174 = vmatmul.mubr.bf16.vlgmr.msra.gmra.mxu0 %v3901_v23 }
 0x9f3   :  { %4411 = vmatpush1.bf16.msra.mxu1 %v8460_v50  ;;  %4452 = vmatpush1.bf16.msra.mxu0 %v8466_v28 }
 0x9f4   :  { %4412 = vmatprep.subr.bf16.mxu1 %v8478_v33  ;;  %4453 = vmatprep.subr.bf16.mxu0 %v8483_v20 }
 0x9f5   :  { %4442 = vmatprep.mubr.bf16.mxu1 %v9274_v37  ;;  %4483 = vmatprep.mubr.bf16.mxu0 %v9274_v37 }
 0x9f7   :  { %4413 = vmatpush1.bf16.msra.mxu1 %v8489_v39  ;;  %4454 = vmatpush1.bf16.msra.mxu0 %v8494_v30 }
 0x9f8   :  { %4414 = vmatprep.subr.bf16.mxu1 %v8502_v3  ;;  %4455 = vmatprep.subr.bf16.mxu0 %v8507_v12 }
 0x9fb   :  { %4415 = vmatpush1.bf16.msra.mxu1 %v8513_v22  ;;  %4456 = vmatpush1.bf16.msra.mxu0 %v8518_v45 }
 0x9fc   :  { %4416 = vmatprep.subr.bf16.mxu1 %v8526_v11  ;;  %4457 = vmatprep.subr.bf16.mxu0 %v8531_v42 }
 0x9ff   :  { %4417 = vmatpush1.bf16.msra.mxu1 %v8537_v36  ;;  %4458 = vmatpush1.bf16.msra.mxu0 %v8542_v21 }
 0xa00   :  { %4418 = vmatprep.subr.bf16.mxu1 %v8555_v54  ;;  %4459 = vmatprep.subr.bf16.mxu0 %v8566_v7 }
 0xa03   :  { %4419 = vmatpush1.bf16.msra.mxu1 %v8550_v53  ;;  %4460 = vmatpush1.bf16.msra.mxu0 %v8561_v6 }
 0xa04   :  { %4420 = vmatprep.subr.bf16.mxu1 %v8571_v9  ;;  %4461 = vmatprep.subr.bf16.mxu0 %v8582_v48 }
 0xa07   :  { %4421 = vmatpush1.bf16.msra.mxu1 %v8577_v31  ;;  %4462 = vmatpush1.bf16.msra.mxu0 %v8589_v51 }
 0xa08   :  { %4422 = vmatprep.subr.bf16.mxu1 %v8594_v52  ;;  %4463 = vmatprep.subr.bf16.mxu0 %v8609_v59 }
 0xa0b   :  { %4423 = vmatpush1.bf16.msra.mxu1 %v8601_v55  ;;  %4464 = vmatpush1.bf16.msra.mxu0 %v8615_v61 }
 0xa0c   :  { %4424 = vmatprep.subr.bf16.mxu1 %v8620_v63  ;;  %4465 = vmatprep.subr.bf16.mxu0 %v8631_v47 }
 0xa0f   :  { %4425 = vmatpush1.bf16.msra.mxu1 %v8626_v0  ;;  %4466 = vmatpush1.bf16.msra.mxu0 %v8637_v2 }
 0xa10   :  { %4720 = vmatprep.subr.bf16.mxu1 %v8455_v58  ;;  %4761 = vmatprep.subr.bf16.mxu0 %v8471_v16  ;;  %v3528_v16 = vadd.f32 %v8695_v32, %v8760_v25 }
 0xab2   :  { %v4134_v1 = vpop.f32.mrf.mxu1  ;;  %v4175_v29 = vpop.f32.mrf.mxu0 }
 0xab3   :  { %v4182_v46 = vadd.f32 %v4134_v1, %v3453_v57  ;;  %v4184_v26 = vadd.f32 %v4175_v29, %v3526_v8  ;;  %v8899_v8 = vld [vmem:[%s9241_s7 + $0xc4] ss:$16 sps:$4 sm:$0xff]  }
 0xab4   :  { %v4136_v19 = vpop.f32.mrf.mxu1  ;;  %v4177_v5 = vpop.f32.mrf.mxu0 }
 0xab5   :  { %v6519_v41 = vmul.f32 -1.442695, %v4182_v46  ;;  %v4183_v35 = vadd.f32 %v4136_v19, %v3455_v44  ;;  %v4185_v62 = vadd.f32 %v4177_v5, %v3528_v16  ;;  %v8885_v16 = vld [vmem:[%s9241_s7 + $0xe0] ss:$16 sps:$4 sm:$0xff]  }
 0xab6   :  { %v4138_v56 = vpop.f32.mrf.mxu1  ;;  %v4179_v24 = vpop.f32.mrf.mxu0 }
 0xab7   :  { %7245 = vpow2.f32 %v6519_v41  ;;  %v6520_v14 = vmul.f32 -1.442695, %v4183_v35  ;;  %v6521_v13 = vmul.f32 -1.442695, %v4185_v62  ;;  %v8890_v62 = vld [vmem:[%s9241_s7 + $0xe8] ss:$16 sps:$4 sm:$0xff]  }
 0xab8   :  { %v4139_v58 = vpop.f32.mrf.mxu1  ;;  %v4180_v15 = vpop.f32.mrf.mxu0 }
 0xab9   :  { %7247 = vpow2.f32 %v6520_v14  ;;  %v8875_v58 = vld [vmem:[%s9241_s7 + $0xe4] ss:$16 sps:$4 sm:$0xff]   ;;  %v8880_v15 = vld [vmem:[%s9241_s7 + $0xec] ss:$16 sps:$4 sm:$0xff]  }
 0xaba   :  { %7249 = vtanh.f32 %v4184_v26  ;;  %v8904_v26 = vld [vmem:[%s9241_s7 + $0xcc] ss:$16 sps:$4 sm:$0xff]  }
 0xabb   :  { %7251 = vpow2.f32 %v6521_v13  ;;  %v8909_v13 = vld [vmem:[%s9241_s7 + $0xc0] ss:$16 sps:$4 sm:$0xff]  }
 0xac4   :  { %v7246_v18 = vpop.eup %7245 }
 0xac5   :  { %v4189_v10 = vadd.f32 1.0, %v7246_v18  ;;  %v8914_v18 = vld [vmem:[%s9241_s7 + $0xc8] ss:$16 sps:$4 sm:$0xff]  }
 0xac6   :  { %v7248_v49 = vpop.eup %7247 }
 0xac7   :  { %7253 = vrcp.f32 %v4189_v10  ;;  %v4195_v23 = vadd.f32 1.0, %v7248_v49  ;;  %v7250_v57 = vpop.eup %7249  ;;  %v8923_v10 = vld [vmem:[%s9241_s7 + $0xa4] ss:$16 sps:$4 sm:$0xff]   ;;  %v8928_v49 = vld [vmem:[%s9241_s7 + $0xac] ss:$16 sps:$4 sm:$0xff]  }
 0xac8   :  { %v7252_v1 = vpop.eup %7251 }
 0xac9   :  { %7255 = vrcp.f32 %v4195_v23  ;;  %v4202_v32 = vadd.f32 1.0, %v7252_v1  ;;  %v8933_v23 = vld [vmem:[%s9241_s7 + $0xa0] ss:$16 sps:$4 sm:$0xff]   ;;  %v8947_v1 = vld [vmem:[%s9241_s7 + $0x84] ss:$16 sps:$4 sm:$0xff]  }
 0xacb   :  { %7257 = vrcp.f32 %v4202_v32  ;;  %v8969_v32 = vld [vmem:[%s9241_s7 + $0x64] ss:$16 sps:$4 sm:$0xff]  }
 0xad4   :  { %v7254_v44 = vpop.eup %7253 }
 0xad5   :  { %v4206_v46 = vmul.f32 %v7254_v44, %v7250_v57  ;;  %v8938_v57 = vld [vmem:[%s9241_s7 + $0xa8] ss:$16 sps:$4 sm:$0xff]   ;;  %v8952_v44 = vld [vmem:[%s9241_s7 + $0x8c] ss:$16 sps:$4 sm:$0xff]  }
 0xad6   :  { %v7256_v19 = vpop.eup %7255 }
 0xad7   :  { %v4205_v5 = vmul.f32 %v7256_v19, %v8768_v43  ;;  %v8962_v19 = vld [vmem:[%s9241_s7 + $0x88] ss:$16 sps:$4 sm:$0xff]  }
 0xad8   :  { %v7258_v27 = vpop.eup %7257 }
 0xad9   :  { %v8817_v41 = vadd.f32 %v4206_v46, %v4205_v5  ;;  %v8957_v46 = vld [vmem:[%s9241_s7 + $0x80] ss:$16 sps:$4 sm:$0xff]   ;;  %v8974_v5 = vld [vmem:[%s9241_s7 + $0x6c] ss:$16 sps:$4 sm:$0xff]  }
 0xadb   :  { %7259 = vtanh.f32 %v8817_v41 }
 0xae8   :  { %v7260_v29 = vpop.eup %7259 }
 0xae9   :  { %v4209_v35 = vmul.f32 %v7260_v29, %v7258_v27  ;;  %v8986_v27 = vld [vmem:[%s9241_s7 + $0x68] ss:$16 sps:$4 sm:$0xff]   ;;  %v8993_v29 = vld [vmem:[%s9241_s7 + $0x44] ss:$16 sps:$4 sm:$0xff]  }
 0xaeb   :  { %v4210_v56 = vpack.c.bf16 %v4209_v35, %v4209_v35  ;;  %v8998_v35 = vld [vmem:[%s9241_s7 + $0x4c] ss:$16 sps:$4 sm:$0xff]  }
 0xaed   :  { %6522 = vst [vmem:[%s9243_s9 + $0x4] sm:$0xf] %v4210_v56  ;;  %4443 = vmatmul.mubr.bf16.vlgmr.msra.gmra.mxu1 %v4210_v56  ;;  %4484 = vmatmul.mubr.bf16.vlgmr.msra.gmra.mxu0 %v4210_v56  ;;  %v9005_v56 = vld [vmem:[%s9241_s7 + $0x40] ss:$16 sps:$4 sm:$0xff]  }
 0xaee   :  { %4721 = vmatpush1.bf16.msra.mxu1 %v8460_v50  ;;  %4762 = vmatpush1.bf16.msra.mxu0 %v8466_v28  ;;  %v3459_v50 = vadd.f32 %v8697_v34, %v8742_v38 }
 0xaef   :  { %4722 = vmatprep.subr.bf16.mxu1 %v8478_v33  ;;  %4763 = vmatprep.subr.bf16.mxu0 %v8483_v20  ;;  %v3461_v20 = vadd.f32 %v8701_v17, %v8750_v4 }
 0xaf0   :  { %4752 = vmatprep.mubr.bf16.mxu1 %v9274_v37  ;;  %4793 = vmatprep.mubr.bf16.mxu0 %v9274_v37 }
 0xaf2   :  { %4723 = vmatpush1.bf16.msra.mxu1 %v8489_v39  ;;  %4764 = vmatpush1.bf16.msra.mxu0 %v8494_v30 }
 0xaf3   :  { %4724 = vmatprep.subr.bf16.mxu1 %v8502_v3  ;;  %4765 = vmatprep.subr.bf16.mxu0 %v8507_v12 }
 0xaf6   :  { %4725 = vmatpush1.bf16.msra.mxu1 %v8513_v22  ;;  %4766 = vmatpush1.bf16.msra.mxu0 %v8518_v45 }
 0xaf7   :  { %4726 = vmatprep.subr.bf16.mxu1 %v8526_v11  ;;  %4767 = vmatprep.subr.bf16.mxu0 %v8531_v42 }
 0xafa   :  { %4727 = vmatpush1.bf16.msra.mxu1 %v8537_v36  ;;  %4768 = vmatpush1.bf16.msra.mxu0 %v8542_v21 }
 0xafb   :  { %4728 = vmatprep.subr.bf16.mxu1 %v8555_v54  ;;  %4769 = vmatprep.subr.bf16.mxu0 %v8566_v7 }
 0xafe   :  { %4729 = vmatpush1.bf16.msra.mxu1 %v8550_v53  ;;  %4770 = vmatpush1.bf16.msra.mxu0 %v8561_v6  ;;  %v3534_v53 = vadd.f32 %v8703_v40, %v8760_v25  ;;  %v9321_v6 = vld [vmem:[#allocation10_spill] sm:$0xff] }
 0xaff   :  { %4730 = vmatprep.subr.bf16.mxu1 %v8571_v9  ;;  %4771 = vmatprep.subr.bf16.mxu0 %v8582_v48  ;;  %v3532_v7 = vadd.f32 %v9321_v6, %v8765_v60 }
 0xb02   :  { %4731 = vmatpush1.bf16.msra.mxu1 %v8577_v31  ;;  %4772 = vmatpush1.bf16.msra.mxu0 %v8589_v51 }
 0xb03   :  { %4732 = vmatprep.subr.bf16.mxu1 %v8594_v52  ;;  %4773 = vmatprep.subr.bf16.mxu0 %v8609_v59 }
 0xb06   :  { %4733 = vmatpush1.bf16.msra.mxu1 %v8601_v55  ;;  %4774 = vmatpush1.bf16.msra.mxu0 %v8615_v61 }
 0xb07   :  { %4734 = vmatprep.subr.bf16.mxu1 %v8620_v63  ;;  %4775 = vmatprep.subr.bf16.mxu0 %v8631_v47 }
 0xb0a   :  { %4735 = vmatpush1.bf16.msra.mxu1 %v8626_v0  ;;  %4776 = vmatpush1.bf16.msra.mxu0 %v8637_v2 }
 0xb0b   :  { %5030 = vmatprep.subr.bf16.mxu1 %v8875_v58  ;;  %5071 = vmatprep.subr.bf16.mxu0 %v8880_v15 }
 0xbad   :  { %v4444_v28 = vpop.f32.mrf.mxu1  ;;  %v4485_v33 = vpop.f32.mrf.mxu0 }
 0xbae   :  { %v4492_v39 = vadd.f32 %v4444_v28, %v3459_v50  ;;  %v4494_v9 = vadd.f32 %v4485_v33, %v3532_v7  ;;  %v9010_v50 = vld [vmem:[%s9241_s7 + $0x48] ss:$16 sps:$4 sm:$0xff]   ;;  %v9017_v28 = vld [vmem:[%s9241_s7 + $0x24] ss:$16 sps:$4 sm:$0xff]   ;;  %v9022_v33 = vld [vmem:[%s9241_s7 + $0x2c] ss:$16 sps:$4 sm:$0xff]  }
 0xbaf   :  { %v4446_v30 = vpop.f32.mrf.mxu1  ;;  %v4487_v3 = vpop.f32.mrf.mxu0 }
 0xbb0   :  { %v6555_v12 = vmul.f32 -1.442695, %v4492_v39  ;;  %v4493_v22 = vadd.f32 %v4446_v30, %v3461_v20  ;;  %v4495_v54 = vadd.f32 %v4487_v3, %v3534_v53  ;;  %v9029_v20 = vld [vmem:[%s9241_s7 + $0x20] ss:$16 sps:$4 sm:$0xff]   ;;  %v9034_v39 = vld [vmem:[%s9241_s7 + $0x28] ss:$16 sps:$4 sm:$0xff]  }
 0xbb1   :  { %v4448_v45 = vpop.f32.mrf.mxu1  ;;  %v4489_v11 = vpop.f32.mrf.mxu0  ;;  %v9041_v30 = vld [vmem:[%s9241_s7 + $0x4] ss:$16 sps:$4 sm:$0xff]   ;;  %v9046_v3 = vld [vmem:[%s9241_s7 + $0xc] ss:$16 sps:$4 sm:$0xff]  }
 0xbb2   :  { %7261 = vpow2.f32 %v6555_v12  ;;  %v6556_v42 = vmul.f32 -1.442695, %v4493_v22  ;;  %v6557_v31 = vmul.f32 -1.442695, %v4495_v54  ;;  %v9053_v12 = vld [vmem:[%s9241_s7] ss:$16 sps:$4 sm:$0xff]  }
 0xbb3   :  { %v4449_v36 = vpop.f32.mrf.mxu1  ;;  %v4490_v21 = vpop.f32.mrf.mxu0  ;;  %v9058_v22 = vld [vmem:[%s9241_s7 + $0x8] ss:$16 sps:$4 sm:$0xff]   ;;  %v9322_v45 = vld [vmem:[#allocation11_spill] sm:$0xff] }
 0xbb4   :  { %7263 = vpow2.f32 %v6556_v42  ;;  %v3463_v11 = vadd.f32 %v9322_v45, %v8742_v38  ;;  %v9323_v21 = vld [vmem:[#allocation14_spill] sm:$0xff] }
 0xbb5   :  { %7265 = vtanh.f32 %v4494_v9  ;;  %v3465_v53 = vadd.f32 %v9323_v21, %v8750_v4 }
 0xbb6   :  { %7267 = vpow2.f32 %v6557_v31 }
 0xbbf   :  { %v7262_v48 = vpop.eup %7261 }
 0xbc0   :  { %v4499_v51 = vadd.f32 1.0, %v7262_v48 }
 0xbc1   :  { %v7264_v52 = vpop.eup %7263 }
 0xbc2   :  { %7269 = vrcp.f32 %v4499_v51  ;;  %v4505_v55 = vadd.f32 1.0, %v7264_v52  ;;  %v7266_v59 = vpop.eup %7265 }
 0xbc3   :  { %v7268_v61 = vpop.eup %7267 }
 0xbc4   :  { %7271 = vrcp.f32 %v4505_v55  ;;  %v4512_v2 = vadd.f32 1.0, %v7268_v61  ;;  %v9324_v61 = vld [vmem:[#allocation12_spill] sm:$0xff] }
 0xbc6   :  { %7273 = vrcp.f32 %v4512_v2 }
 0xbcf   :  { %v7270_v63 = vpop.eup %7269 }
 0xbd0   :  { %v4516_v0 = vmul.f32 %v7270_v63, %v7266_v59  ;;  %v3538_v63 = vadd.f32 %v9324_v61, %v8760_v25  ;;  %v9327_v61 = vld [vmem:[#allocation18_spill] sm:$0xff] }
 0xbd1   :  { %v7272_v47 = vpop.eup %7271 }
 0xbd2   :  { %v4515_v34 = vmul.f32 %v7272_v47, %v8817_v41  ;;  %v8981_v41 = vld [vmem:[%s9241_s7 + $0x60] ss:$16 sps:$4 sm:$0xff]  }
 0xbd3   :  { %v7274_v40 = vpop.eup %7273  ;;  %v9325_v47 = vld [vmem:[#allocation13_spill] sm:$0xff] }
 0xbd4   :  { %v8864_v17 = vadd.f32 %v4516_v0, %v4515_v34  ;;  %v3536_v2 = vadd.f32 %v9325_v47, %v8765_v60 }
 0xbd6   :  { %7275 = vtanh.f32 %v8864_v17 }
 0xbe3   :  { %v7276_v43 = vpop.eup %7275 }
 0xbe4   :  { %v4519_v24 = vmul.f32 %v7276_v43, %v7274_v40 }
 0xbe6   :  { %v4520_v14 = vpack.c.bf16 %v4519_v24, %v4519_v24 }
 0xbe8   :  { %6558 = vst [vmem:[%s9243_s9 + $0x8] sm:$0xf] %v4520_v14  ;;  %4753 = vmatmul.mubr.bf16.vlgmr.msra.gmra.mxu1 %v4520_v14  ;;  %4794 = vmatmul.mubr.bf16.vlgmr.msra.gmra.mxu0 %v4520_v14 }
 0xbe9   :  { %5062 = vmatprep.mubr.bf16.mxu1 %v9274_v37  ;;  %5103 = vmatprep.mubr.bf16.mxu0 %v9274_v37 }
 0xbea   :  { %5031 = vmatpush1.bf16.msra.mxu1 %v8885_v16  ;;  %5072 = vmatpush1.bf16.msra.mxu0 %v8890_v62 }
 0xbeb   :  { %5032 = vmatprep.subr.bf16.mxu1 %v8899_v8  ;;  %5073 = vmatprep.subr.bf16.mxu0 %v8904_v26 }
 0xbee   :  { %5033 = vmatpush1.bf16.msra.mxu1 %v8909_v13  ;;  %5074 = vmatpush1.bf16.msra.mxu0 %v8914_v18 }
 0xbef   :  { %5034 = vmatprep.subr.bf16.mxu1 %v8923_v10  ;;  %5075 = vmatprep.subr.bf16.mxu0 %v8928_v49 }
 0xbf2   :  { %5035 = vmatpush1.bf16.msra.mxu1 %v8933_v23  ;;  %5076 = vmatpush1.bf16.msra.mxu0 %v8938_v57 }
 0xbf3   :  { %5036 = vmatprep.subr.bf16.mxu1 %v8947_v1  ;;  %5077 = vmatprep.subr.bf16.mxu0 %v8952_v44 }
 0xbf6   :  { %5037 = vmatpush1.bf16.msra.mxu1 %v8957_v46  ;;  %5078 = vmatpush1.bf16.msra.mxu0 %v8962_v19 }
 0xbf7   :  { %5038 = vmatprep.subr.bf16.mxu1 %v8969_v32  ;;  %5079 = vmatprep.subr.bf16.mxu0 %v8974_v5 }
 0xbfa   :  { %5039 = vmatpush1.bf16.msra.mxu1 %v8981_v41  ;;  %5080 = vmatpush1.bf16.msra.mxu0 %v8986_v27 }
 0xbfb   :  { %5040 = vmatprep.subr.bf16.mxu1 %v8993_v29  ;;  %5081 = vmatprep.subr.bf16.mxu0 %v8998_v35 }
 0xbfe   :  { %5041 = vmatpush1.bf16.msra.mxu1 %v9005_v56  ;;  %5082 = vmatpush1.bf16.msra.mxu0 %v9010_v50 }
 0xbff   :  { %5042 = vmatprep.subr.bf16.mxu1 %v9017_v28  ;;  %5083 = vmatprep.subr.bf16.mxu0 %v9022_v33 }
 0xc02   :  { %5043 = vmatpush1.bf16.msra.mxu1 %v9029_v20  ;;  %5084 = vmatpush1.bf16.msra.mxu0 %v9034_v39 }
 0xc03   :  { %5044 = vmatprep.subr.bf16.mxu1 %v9041_v30  ;;  %5085 = vmatprep.subr.bf16.mxu0 %v9046_v3 }
 0xc06   :  { %5045 = vmatpush1.bf16.msra.mxu1 %v9053_v12  ;;  %5086 = vmatpush1.bf16.msra.mxu0 %v9058_v22 }
 0xc07   :  { %5340 = vmatprep.subr.bf16.mxu1 %v8875_v58  ;;  %5381 = vmatprep.subr.bf16.mxu0 %v8880_v15 }
 0xca8   :  { %v4754_v42 = vpop.f32.mrf.mxu1  ;;  %v4795_v36 = vpop.f32.mrf.mxu0 }
 0xca9   :  { %v4802_v54 = vadd.f32 %v4754_v42, %v3463_v11  ;;  %v4804_v34 = vadd.f32 %v4795_v36, %v3536_v2 }
 0xcaa   :  { %v4756_v6 = vpop.f32.mrf.mxu1  ;;  %v4797_v7 = vpop.f32.mrf.mxu0 }
 0xcab   :  { %v6591_v9 = vmul.f32 -1.442695, %v4802_v54  ;;  %v4803_v31 = vadd.f32 %v4756_v6, %v3465_v53  ;;  %v4805_v0 = vadd.f32 %v4797_v7, %v3538_v63  ;;  %v3471_v63 = vadd.f32 %v9327_v61, %v8750_v4 }
 0xcac   :  { %v4758_v48 = vpop.f32.mrf.mxu1  ;;  %v4799_v51 = vpop.f32.mrf.mxu0 }
 0xcad   :  { %7277 = vpow2.f32 %v6591_v9  ;;  %v6592_v52 = vmul.f32 -1.442695, %v4803_v31  ;;  %v6593_v40 = vmul.f32 -1.442695, %v4805_v0 }
 0xcae   :  { %v4759_v55 = vpop.f32.mrf.mxu1  ;;  %v4800_v59 = vpop.f32.mrf.mxu0 }
 0xcaf   :  { %7279 = vpow2.f32 %v6592_v52 }
 0xcb0   :  { %7281 = vtanh.f32 %v4804_v34 }
 0xcb1   :  { %7283 = vpow2.f32 %v6593_v40 }
 0xcba   :  { %v7278_v43 = vpop.eup %7277 }
 0xcbb   :  { %v4809_v24 = vadd.f32 1.0, %v7278_v43 }
 0xcbc   :  { %v7280_v14 = vpop.eup %7279 }
 0xcbd   :  { %7285 = vrcp.f32 %v4809_v24  ;;  %v4815_v45 = vadd.f32 1.0, %v7280_v14  ;;  %v7282_v11 = vpop.eup %7281 }
 0xcbe   :  { %v7284_v42 = vpop.eup %7283 }
 0xcbf   :  { %7287 = vrcp.f32 %v4815_v45  ;;  %v4822_v6 = vadd.f32 1.0, %v7284_v42  ;;  %v9328_v42 = vld [vmem:[#allocation16_spill] sm:$0xff] }
 0xcc1   :  { %7289 = vrcp.f32 %v4822_v6 }
 0xcca   :  { %v7286_v21 = vpop.eup %7285 }
 0xccb   :  { %v4826_v53 = vmul.f32 %v7286_v21, %v7282_v11  ;;  %v3544_v21 = vadd.f32 %v9328_v42, %v8760_v25  ;;  %v9331_v42 = vld [vmem:[#allocation22_spill] sm:$0xff] }
 0xccc   :  { %v7288_v54 = vpop.eup %7287 }
 0xccd   :  { %v4825_v7 = vmul.f32 %v7288_v54, %v8864_v17  ;;  %v9326_v17 = vld [vmem:[#allocation15_spill] sm:$0xff]  ;;  %v9329_v54 = vld [vmem:[#allocation17_spill] sm:$0xff] }
 0xcce   :  { %v7290_v36 = vpop.eup %7289  ;;  %v3469_v52 = vadd.f32 %v9326_v17, %v8742_v38  ;;  %v3542_v6 = vadd.f32 %v9329_v54, %v8765_v60 }
 0xccf   :  { %v9075_v9 = vadd.f32 %v4826_v53, %v4825_v7 }
 0xcd1   :  { %7291 = vtanh.f32 %v9075_v9 }
 0xcde   :  { %v7292_v31 = vpop.eup %7291 }
 0xcdf   :  { %v4829_v48 = vmul.f32 %v7292_v31, %v7290_v36 }
 0xce1   :  { %v4830_v51 = vpack.c.bf16 %v4829_v48, %v4829_v48 }
 0xce3   :  { %6594 = vst [vmem:[%s9243_s9 + $0xc] sm:$0xf] %v4830_v51  ;;  %5063 = vmatmul.mubr.bf16.vlgmr.msra.gmra.mxu1 %v4830_v51  ;;  %5104 = vmatmul.mubr.bf16.vlgmr.msra.gmra.mxu0 %v4830_v51 }
 0xce4   :  { %5341 = vmatpush1.bf16.msra.mxu1 %v8885_v16  ;;  %5382 = vmatpush1.bf16.msra.mxu0 %v8890_v62 }
 0xce5   :  { %5342 = vmatprep.subr.bf16.mxu1 %v8899_v8  ;;  %5383 = vmatprep.subr.bf16.mxu0 %v8904_v26 }
 0xce6   :  { %5372 = vmatprep.mubr.bf16.mxu1 %v9274_v37  ;;  %5413 = vmatprep.mubr.bf16.mxu0 %v9274_v37 }
 0xce8   :  { %5343 = vmatpush1.bf16.msra.mxu1 %v8909_v13  ;;  %5384 = vmatpush1.bf16.msra.mxu0 %v8914_v18 }
 0xce9   :  { %5344 = vmatprep.subr.bf16.mxu1 %v8923_v10  ;;  %5385 = vmatprep.subr.bf16.mxu0 %v8928_v49 }
 0xcec   :  { %5345 = vmatpush1.bf16.msra.mxu1 %v8933_v23  ;;  %5386 = vmatpush1.bf16.msra.mxu0 %v8938_v57 }
 0xced   :  { %5346 = vmatprep.subr.bf16.mxu1 %v8947_v1  ;;  %5387 = vmatprep.subr.bf16.mxu0 %v8952_v44 }
 0xcf0   :  { %5347 = vmatpush1.bf16.msra.mxu1 %v8957_v46  ;;  %5388 = vmatpush1.bf16.msra.mxu0 %v8962_v19 }
 0xcf1   :  { %5348 = vmatprep.subr.bf16.mxu1 %v8969_v32  ;;  %5389 = vmatprep.subr.bf16.mxu0 %v8974_v5 }
 0xcf4   :  { %5349 = vmatpush1.bf16.msra.mxu1 %v8981_v41  ;;  %5390 = vmatpush1.bf16.msra.mxu0 %v8986_v27 }
 0xcf5   :  { %5350 = vmatprep.subr.bf16.mxu1 %v8993_v29  ;;  %5391 = vmatprep.subr.bf16.mxu0 %v8998_v35 }
 0xcf8   :  { %5351 = vmatpush1.bf16.msra.mxu1 %v9005_v56  ;;  %5392 = vmatpush1.bf16.msra.mxu0 %v9010_v50 }
 0xcf9   :  { %5352 = vmatprep.subr.bf16.mxu1 %v9017_v28  ;;  %5393 = vmatprep.subr.bf16.mxu0 %v9022_v33 }
 0xcfc   :  { %5353 = vmatpush1.bf16.msra.mxu1 %v9029_v20  ;;  %5394 = vmatpush1.bf16.msra.mxu0 %v9034_v39 }
 0xcfd   :  { %5354 = vmatprep.subr.bf16.mxu1 %v9041_v30  ;;  %5395 = vmatprep.subr.bf16.mxu0 %v9046_v3 }
 0xd00   :  { %5355 = vmatpush1.bf16.msra.mxu1 %v9053_v12  ;;  %5396 = vmatpush1.bf16.msra.mxu0 %v9058_v22 }
 0xd01   :  { %5650 = vmatprep.subr.bf16.mxu1 %v8875_v58  ;;  %5691 = vmatprep.subr.bf16.mxu0 %v8880_v15 }
 0xda3   :  { %v5064_v55 = vpop.f32.mrf.mxu1  ;;  %v5105_v59 = vpop.f32.mrf.mxu0 }
 0xda4   :  { %v5112_v0 = vadd.f32 %v5064_v55, %v3469_v52  ;;  %v5114_v7 = vadd.f32 %v5105_v59, %v3542_v6 }
 0xda5   :  { %v5066_v47 = vpop.f32.mrf.mxu1  ;;  %v5107_v2 = vpop.f32.mrf.mxu0 }
 0xda6   :  { %v6627_v34 = vmul.f32 -1.442695, %v5112_v0  ;;  %v5113_v40 = vadd.f32 %v5066_v47, %v3471_v63  ;;  %v5115_v53 = vadd.f32 %v5107_v2, %v3544_v21  ;;  %v3475_v21 = vadd.f32 %v9331_v42, %v8750_v4 }
 0xda7   :  { %v5068_v43 = vpop.f32.mrf.mxu1  ;;  %v5109_v24 = vpop.f32.mrf.mxu0 }
 0xda8   :  { %7293 = vpow2.f32 %v6627_v34  ;;  %v6628_v14 = vmul.f32 -1.442695, %v5113_v40  ;;  %v6629_v36 = vmul.f32 -1.442695, %v5115_v53 }
 0xda9   :  { %v5069_v45 = vpop.f32.mrf.mxu1  ;;  %v5110_v11 = vpop.f32.mrf.mxu0 }
 0xdaa   :  { %7295 = vpow2.f32 %v6628_v14 }
 0xdab   :  { %7297 = vtanh.f32 %v5114_v7 }
 0xdac   :  { %7299 = vpow2.f32 %v6629_v36 }
 0xdb5   :  { %v7294_v31 = vpop.eup %7293 }
 0xdb6   :  { %v5119_v48 = vadd.f32 1.0, %v7294_v31 }
 0xdb7   :  { %v7296_v51 = vpop.eup %7295 }
 0xdb8   :  { %7301 = vrcp.f32 %v5119_v48  ;;  %v5125_v17 = vadd.f32 1.0, %v7296_v51  ;;  %v7298_v52 = vpop.eup %7297 }
 0xdb9   :  { %v7300_v55 = vpop.eup %7299 }
 0xdba   :  { %7303 = vrcp.f32 %v5125_v17  ;;  %v5132_v47 = vadd.f32 1.0, %v7300_v55 }
 0xdbc   :  { %7305 = vrcp.f32 %v5132_v47 }
 0xdc5   :  { %v7302_v61 = vpop.eup %7301 }
 0xdc6   :  { %v5136_v63 = vmul.f32 %v7302_v61, %v7298_v52  ;;  %v9333_v61 = vld [vmem:[#allocation21_spill] sm:$0xff] }
 0xdc7   :  { %v7304_v0 = vpop.eup %7303 }
 0xdc8   :  { %v5135_v2 = vmul.f32 %v7304_v0, %v9075_v9  ;;  %v9330_v9 = vld [vmem:[#allocation19_spill] sm:$0xff] }
 0xdc9   :  { %v7306_v59 = vpop.eup %7305  ;;  %v3473_v14 = vadd.f32 %v9330_v9, %v8742_v38 }
 0xdca   :  { %v9124_v34 = vadd.f32 %v5136_v63, %v5135_v2  ;;  %v3546_v63 = vadd.f32 %v9333_v61, %v8765_v60 }
 0xdcc   :  { %7307 = vtanh.f32 %v9124_v34 }
 0xdd9   :  { %v7308_v40 = vpop.eup %7307 }
 0xdda   :  { %v5139_v43 = vmul.f32 %v7308_v40, %v7306_v59 }
 0xddc   :  { %v5140_v24 = vpack.c.bf16 %v5139_v43, %v5139_v43 }
 0xdde   :  { %6630 = vst [vmem:[%s9243_s9 + $0x10] sm:$0xf] %v5140_v24  ;;  %5373 = vmatmul.mubr.bf16.vlgmr.msra.gmra.mxu1 %v5140_v24  ;;  %5414 = vmatmul.mubr.bf16.vlgmr.msra.gmra.mxu0 %v5140_v24 }
 0xddf   :  { %5651 = vmatpush1.bf16.msra.mxu1 %v8885_v16  ;;  %5692 = vmatpush1.bf16.msra.mxu0 %v8890_v62 }
 0xde0   :  { %5652 = vmatprep.subr.bf16.mxu1 %v8899_v8  ;;  %5693 = vmatprep.subr.bf16.mxu0 %v8904_v26 }
 0xde1   :  { %5682 = vmatprep.mubr.bf16.mxu1 %v9274_v37  ;;  %5723 = vmatprep.mubr.bf16.mxu0 %v9274_v37 }
 0xde3   :  { %5653 = vmatpush1.bf16.msra.mxu1 %v8909_v13  ;;  %5694 = vmatpush1.bf16.msra.mxu0 %v8914_v18 }
 0xde4   :  { %5654 = vmatprep.subr.bf16.mxu1 %v8923_v10  ;;  %5695 = vmatprep.subr.bf16.mxu0 %v8928_v49 }
 0xde7   :  { %5655 = vmatpush1.bf16.msra.mxu1 %v8933_v23  ;;  %5696 = vmatpush1.bf16.msra.mxu0 %v8938_v57 }
 0xde8   :  { %5656 = vmatprep.subr.bf16.mxu1 %v8947_v1  ;;  %5697 = vmatprep.subr.bf16.mxu0 %v8952_v44 }
 0xdeb   :  { %5657 = vmatpush1.bf16.msra.mxu1 %v8957_v46  ;;  %5698 = vmatpush1.bf16.msra.mxu0 %v8962_v19 }
 0xdec   :  { %5658 = vmatprep.subr.bf16.mxu1 %v8969_v32  ;;  %5699 = vmatprep.subr.bf16.mxu0 %v8974_v5 }
 0xdef   :  { %5659 = vmatpush1.bf16.msra.mxu1 %v8981_v41  ;;  %5700 = vmatpush1.bf16.msra.mxu0 %v8986_v27 }
 0xdf0   :  { %5660 = vmatprep.subr.bf16.mxu1 %v8993_v29  ;;  %5701 = vmatprep.subr.bf16.mxu0 %v8998_v35 }
 0xdf3   :  { %5661 = vmatpush1.bf16.msra.mxu1 %v9005_v56  ;;  %5702 = vmatpush1.bf16.msra.mxu0 %v9010_v50 }
 0xdf4   :  { %5662 = vmatprep.subr.bf16.mxu1 %v9017_v28  ;;  %5703 = vmatprep.subr.bf16.mxu0 %v9022_v33 }
 0xdf7   :  { %5663 = vmatpush1.bf16.msra.mxu1 %v9029_v20  ;;  %5704 = vmatpush1.bf16.msra.mxu0 %v9034_v39 }
 0xdf8   :  { %5664 = vmatprep.subr.bf16.mxu1 %v9041_v30  ;;  %5705 = vmatprep.subr.bf16.mxu0 %v9046_v3 }
 0xdfb   :  { %5665 = vmatpush1.bf16.msra.mxu1 %v9053_v12  ;;  %5706 = vmatpush1.bf16.msra.mxu0 %v9058_v22 }
 0xdfc   :  { %5960 = vmatprep.subr.bf16.mxu1 %v8875_v58  ;;  %6001 = vmatprep.subr.bf16.mxu0 %v8880_v15  ;;  %v9332_v15 = vld [vmem:[#allocation20_spill] sm:$0xff] }
 0xdfd   :  { %v3548_v52 = vadd.f32 %v9332_v15, %v8760_v25 }
 0xe9e   :  { %v5374_v45 = vpop.f32.mrf.mxu1  ;;  %v5415_v11 = vpop.f32.mrf.mxu0 }
 0xe9f   :  { %v5422_v53 = vadd.f32 %v5374_v45, %v3473_v14  ;;  %v5424_v0 = vadd.f32 %v5415_v11, %v3546_v63 }
 0xea0   :  { %v5376_v54 = vpop.f32.mrf.mxu1  ;;  %v5417_v6 = vpop.f32.mrf.mxu0 }
 0xea1   :  { %v6663_v7 = vmul.f32 -1.442695, %v5422_v53  ;;  %v5423_v36 = vadd.f32 %v5376_v54, %v3475_v21  ;;  %v5425_v55 = vadd.f32 %v5417_v6, %v3548_v52 }
 0xea2   :  { %v5378_v31 = vpop.f32.mrf.mxu1  ;;  %v5419_v48 = vpop.f32.mrf.mxu0 }
 0xea3   :  { %7309 = vpow2.f32 %v6663_v7  ;;  %v6664_v51 = vmul.f32 -1.442695, %v5423_v36  ;;  %v6665_v47 = vmul.f32 -1.442695, %v5425_v55  ;;  %v9338_v55 = vld [vmem:[#allocation27_spill] sm:$0xff] }
 0xea4   :  { %v5379_v58 = vpop.f32.mrf.mxu1  ;;  %v5420_v17 = vpop.f32.mrf.mxu0  ;;  %v3483_v61 = vadd.f32 %v9338_v55, %v8742_v38 }
 0xea5   :  { %7311 = vpow2.f32 %v6664_v51 }
 0xea6   :  { %7313 = vtanh.f32 %v5424_v0 }
 0xea7   :  { %7315 = vpow2.f32 %v6665_v47  ;;  %v9339_v47 = vld [vmem:[#allocation9_spill] sm:$0xff] }
 0xeb0   :  { %v7310_v2 = vpop.eup %7309 }
 0xeb1   :  { %v5429_v59 = vadd.f32 1.0, %v7310_v2  ;;  %v3485_v2 = vadd.f32 %v9339_v47, %v8750_v4 }
 0xeb2   :  { %v7312_v40 = vpop.eup %7311 }
 0xeb3   :  { %7317 = vrcp.f32 %v5429_v59  ;;  %v5435_v43 = vadd.f32 1.0, %v7312_v40  ;;  %v7314_v24 = vpop.eup %7313 }
 0xeb4   :  { %v7316_v9 = vpop.eup %7315 }
 0xeb5   :  { %7319 = vrcp.f32 %v5435_v43  ;;  %v5442_v21 = vadd.f32 1.0, %v7316_v9 }
 0xeb7   :  { %7321 = vrcp.f32 %v5442_v21 }
 0xec0   :  { %v7318_v14 = vpop.eup %7317 }
 0xec1   :  { %v5446_v45 = vmul.f32 %v7318_v14, %v7314_v24 }
 0xec2   :  { %v7320_v42 = vpop.eup %7319 }
 0xec3   :  { %v5445_v53 = vmul.f32 %v7320_v42, %v9124_v34 }
 0xec4   :  { %v7322_v11 = vpop.eup %7321 }
 0xec5   :  { %v9173_v54 = vadd.f32 %v5446_v45, %v5445_v53 }
 0xec7   :  { %7323 = vtanh.f32 %v9173_v54 }
 0xed4   :  { %v7324_v6 = vpop.eup %7323 }
 0xed5   :  { %v5449_v7 = vmul.f32 %v7324_v6, %v7322_v11  ;;  %v9341_v6 = vld [vmem:[#allocation28_spill] sm:$0xff] }
 0xed7   :  { %v5450_v36 = vpack.c.bf16 %v5449_v7, %v5449_v7  ;;  %v3556_v7 = vadd.f32 %v9341_v6, %v8765_v60 }
 0xed9   :  { %6666 = vst [vmem:[%s9243_s9 + $0x14] sm:$0xf] %v5450_v36  ;;  %5683 = vmatmul.mubr.bf16.vlgmr.msra.gmra.mxu1 %v5450_v36  ;;  %5724 = vmatmul.mubr.bf16.vlgmr.msra.gmra.mxu0 %v5450_v36 }
 0xeda   :  { %5961 = vmatpush1.bf16.msra.mxu1 %v8885_v16  ;;  %6002 = vmatpush1.bf16.msra.mxu0 %v8890_v62 }
 0xedb   :  { %5962 = vmatprep.subr.bf16.mxu1 %v8899_v8  ;;  %6003 = vmatprep.subr.bf16.mxu0 %v8904_v26  ;;  %v9335_v26 = vld [vmem:[#allocation26_spill] sm:$0xff] }
 0xedc   :  { %5992 = vmatprep.mubr.bf16.mxu1 %v9274_v37  ;;  %6033 = vmatprep.mubr.bf16.mxu0 %v9274_v37  ;;  %v9334_v37 = vld [vmem:[#allocation23_spill] sm:$0xff] }
 0xedd   :  { %v3479_v16 = vadd.f32 %v9334_v37, %v8742_v38 }
 0xede   :  { %5963 = vmatpush1.bf16.msra.mxu1 %v8909_v13  ;;  %6004 = vmatpush1.bf16.msra.mxu0 %v8914_v18  ;;  %v3481_v13 = vadd.f32 %v9335_v26, %v8750_v4 }
 0xedf   :  { %5964 = vmatprep.subr.bf16.mxu1 %v8923_v10  ;;  %6005 = vmatprep.subr.bf16.mxu0 %v8928_v49 }
 0xee2   :  { %5965 = vmatpush1.bf16.msra.mxu1 %v8933_v23  ;;  %6006 = vmatpush1.bf16.msra.mxu0 %v8938_v57 }
 0xee3   :  { %5966 = vmatprep.subr.bf16.mxu1 %v8947_v1  ;;  %6007 = vmatprep.subr.bf16.mxu0 %v8952_v44 }
 0xee6   :  { %5967 = vmatpush1.bf16.msra.mxu1 %v8957_v46  ;;  %6008 = vmatpush1.bf16.msra.mxu0 %v8962_v19 }
 0xee7   :  { %5968 = vmatprep.subr.bf16.mxu1 %v8969_v32  ;;  %6009 = vmatprep.subr.bf16.mxu0 %v8974_v5  ;;  %v9336_v5 = vld [vmem:[#allocation24_spill] sm:$0xff] }
 0xeea   :  { %5969 = vmatpush1.bf16.msra.mxu1 %v8981_v41  ;;  %6010 = vmatpush1.bf16.msra.mxu0 %v8986_v27  ;;  %v3554_v41 = vadd.f32 %v9336_v5, %v8760_v25 }
 0xeeb   :  { %5970 = vmatprep.subr.bf16.mxu1 %v8993_v29  ;;  %6011 = vmatprep.subr.bf16.mxu0 %v8998_v35  ;;  %v9337_v29 = vld [vmem:[#allocation25_spill] sm:$0xff] }
 0xeec   :  { %v3552_v35 = vadd.f32 %v9337_v29, %v8765_v60 }
 0xeee   :  { %5971 = vmatpush1.bf16.msra.mxu1 %v9005_v56  ;;  %6012 = vmatpush1.bf16.msra.mxu0 %v9010_v50 }
 0xeef   :  { %5972 = vmatprep.subr.bf16.mxu1 %v9017_v28  ;;  %6013 = vmatprep.subr.bf16.mxu0 %v9022_v33 }
 0xef2   :  { %5973 = vmatpush1.bf16.msra.mxu1 %v9029_v20  ;;  %6014 = vmatpush1.bf16.msra.mxu0 %v9034_v39 }
 0xef3   :  { %5974 = vmatprep.subr.bf16.mxu1 %v9041_v30  ;;  %6015 = vmatprep.subr.bf16.mxu0 %v9046_v3 }
 0xef6   :  { %5975 = vmatpush1.bf16.msra.mxu1 %v9053_v12  ;;  %6016 = vmatpush1.bf16.msra.mxu0 %v9058_v22 }
 0xf99   :  { %v5684_v62 = vpop.f32.mrf.mxu1  ;;  %v5725_v8 = vpop.f32.mrf.mxu0 }
 0xf9a   :  { %v5732_v18 = vadd.f32 %v5684_v62, %v3479_v16  ;;  %v5734_v56 = vadd.f32 %v5725_v8, %v3552_v35 }
 0xf9b   :  { %v5686_v10 = vpop.f32.mrf.mxu1  ;;  %v5727_v49 = vpop.f32.mrf.mxu0 }
 0xf9c   :  { %v6699_v23 = vmul.f32 -1.442695, %v5732_v18  ;;  %v5733_v57 = vadd.f32 %v5686_v10, %v3481_v13  ;;  %v5735_v27 = vadd.f32 %v5727_v49, %v3554_v41 }
 0xf9d   :  { %v5688_v1 = vpop.f32.mrf.mxu1  ;;  %v5729_v44 = vpop.f32.mrf.mxu0 }
 0xf9e   :  { %7325 = vpow2.f32 %v6699_v23  ;;  %v6700_v46 = vmul.f32 -1.442695, %v5733_v57  ;;  %v6701_v50 = vmul.f32 -1.442695, %v5735_v27 }
 0xf9f   :  { %v5689_v19 = vpop.f32.mrf.mxu1  ;;  %v5730_v32 = vpop.f32.mrf.mxu0 }
 0xfa0   :  { %7327 = vpow2.f32 %v6700_v46 }
 0xfa1   :  { %7329 = vtanh.f32 %v5734_v56 }
 0xfa2   :  { %7331 = vpow2.f32 %v6701_v50 }
 0xfab   :  { %v7326_v28 = vpop.eup %7325 }
 0xfac   :  { %v5739_v33 = vadd.f32 1.0, %v7326_v28 }
 0xfad   :  { %v7328_v20 = vpop.eup %7327 }
 0xfae   :  { %7333 = vrcp.f32 %v5739_v33  ;;  %v5745_v39 = vadd.f32 1.0, %v7328_v20  ;;  %v7330_v30 = vpop.eup %7329 }
 0xfaf   :  { %v7332_v3 = vpop.eup %7331 }
 0xfb0   :  { %7335 = vrcp.f32 %v5745_v39  ;;  %v5752_v31 = vadd.f32 1.0, %v7332_v3 }
 0xfb2   :  { %7337 = vrcp.f32 %v5752_v31 }
 0xfbb   :  { %v7334_v12 = vpop.eup %7333 }
 0xfbc   :  { %v5756_v22 = vmul.f32 %v7334_v12, %v7330_v30 }
 0xfbd   :  { %v7336_v34 = vpop.eup %7335 }
 0xfbe   :  { %v5755_v48 = vmul.f32 %v7336_v34, %v9173_v54  ;;  %v9340_v54 = vld [vmem:[#allocation29_spill] sm:$0xff] }
 0xfbf   :  { %v7338_v58 = vpop.eup %7337  ;;  %v3558_v38 = vadd.f32 %v9340_v54, %v8760_v25 }
 0xfc0   :  { %v5757_v51 = vadd.f32 %v5756_v22, %v5755_v48 }
 0xfc2   :  { %7339 = vtanh.f32 %v5757_v51 }
 0xfcf   :  { %v7340_v17 = vpop.eup %7339 }
 0xfd0   :  { %v5759_v15 = vmul.f32 %v7340_v17, %v7338_v58 }
 0xfd2   :  { %v5760_v52 = vpack.c.bf16 %v5759_v15, %v5759_v15 }
 0xfd4   :  { %6702 = vst [vmem:[%s9243_s9 + $0x18] sm:$0xf] %v5760_v52  ;;  %5993 = vmatmul.mubr.bf16.vlgmr.msra.gmra.mxu1 %v5760_v52  ;;  %6034 = vmatmul.mubr.bf16.vlgmr.msra.gmra.mxu0 %v5760_v52 }
0x1094   :  { %v5994_v63 = vpop.f32.mrf.mxu1  ;;  %v6035_v0 = vpop.f32.mrf.mxu0 }
0x1095   :  { %v6042_v59 = vadd.f32 %v5994_v63, %v3483_v61  ;;  %v6044_v4 = vadd.f32 %v6035_v0, %v3556_v7 }
0x1096   :  { %v5996_v40 = vpop.f32.mrf.mxu1  ;;  %v6037_v43 = vpop.f32.mrf.mxu0 }
0x1097   :  { %v6735_v24 = vmul.f32 -1.442695, %v6042_v59  ;;  %v6043_v9 = vadd.f32 %v5996_v40, %v3485_v2  ;;  %v6045_v11 = vadd.f32 %v6037_v43, %v3558_v38 }
0x1098   :  { %v5998_v14 = vpop.f32.mrf.mxu1  ;;  %v6039_v45 = vpop.f32.mrf.mxu0 }
0x1099   :  { %7341 = vpow2.f32 %v6735_v24  ;;  %v6736_v42 = vmul.f32 -1.442695, %v6043_v9  ;;  %v6737_v36 = vmul.f32 -1.442695, %v6045_v11 }
0x109a   :  { %v5999_v21 = vpop.f32.mrf.mxu1  ;;  %v6040_v53 = vpop.f32.mrf.mxu0 }
0x109b   :  { %7343 = vpow2.f32 %v6736_v42 }
0x109c   :  { %7345 = vtanh.f32 %v6044_v4 }
0x109d   :  { %7347 = vpow2.f32 %v6737_v36 }
0x10a6   :  { %v7342_v37 = vpop.eup %7341 }
0x10a7   :  { %v6049_v16 = vadd.f32 1.0, %v7342_v37 }
0x10a8   :  { %v7344_v62 = vpop.eup %7343 }
0x10a9   :  { %7349 = vrcp.f32 %v6049_v16  ;;  %v6055_v8 = vadd.f32 1.0, %v7344_v62  ;;  %v7346_v26 = vpop.eup %7345 }
0x10aa   :  { %v7348_v13 = vpop.eup %7347 }
0x10ab   :  { %7351 = vrcp.f32 %v6055_v8  ;;  %v6062_v25 = vadd.f32 1.0, %v7348_v13 }
0x10ad   :  { %7353 = vrcp.f32 %v6062_v25 }
0x10b6   :  { %v7350_v18 = vpop.eup %7349 }
0x10b7   :  { %v6066_v10 = vmul.f32 %v7350_v18, %v7346_v26 }
0x10b8   :  { %v7352_v49 = vpop.eup %7351 }
0x10b9   :  { %v6065_v23 = vmul.f32 %v7352_v49, %v5757_v51 }
0x10ba   :  { %v7354_v60 = vpop.eup %7353 }
0x10bb   :  { %v6067_v57 = vadd.f32 %v6066_v10, %v6065_v23 }
0x10bd   :  { %7355 = vtanh.f32 %v6067_v57 }
0x10ca   :  { %v7356_v1 = vpop.eup %7355 }
0x10cb   :  { %v6069_v44 = vmul.f32 %v7356_v1, %v7354_v60 }
0x10cd   :  { %v6070_v46 = vpack.c.bf16 %v6069_v44, %v6069_v44 }
0x10cf   :  { %6738 = vst [vmem:[%s9243_s9 + $0x1c] sm:$0xf] %v6070_v46 }

</bundles_post_ra>
